<compile_context>
chip_gen: v6e
topology: v6e:2x2x1
jax: 0.10.0
libtpu: 0.0.40
codegen_flags: <defaults>
</compile_context>

<pallas_src>
import functools
import math

import jax
import jax.numpy as jnp
from jax import lax
from jax.experimental import pallas as pl
from jax.experimental.pallas import tpu as pltpu

# ---------------- model hyper-parameters (toy scale, lane-friendly) ----------------
PATCH = 8                    # patch size
D = 256                      # encoder hidden dim  (2 * 128 lanes)
HEADS = 2                    # encoder attention heads
DH = D // HEADS              # head dim = 128 (full lane width, clean head slices)
MLP_H = 512                  # encoder MLP hidden
CE = 128                     # neck / decoder embedding channels (lane-dense)
CUP = 128                    # upscaled-embedding channels (lane-dense, MXU-native contraction)
R = 4                        # spatial upscale factor (SAM uses 4x)
RR = R * R
NUM_MASK_TOKENS = 4
NUM_MASKS = 3                # SAM multimask output
NTOK = 1 + NUM_MASK_TOKENS   # iou token + mask tokens


# ---------------- in-kernel helpers (operate on values, not refs) ----------------
def _layernorm(x, g, b, eps=1e-6):
    mu = jnp.mean(x, axis=-1, keepdims=True)
    var = jnp.mean((x - mu) ** 2, axis=-1, keepdims=True)
    return (x - mu) * lax.rsqrt(var + eps) * g + b


def _softmax_rows(s):
    s = s - jnp.max(s, axis=-1, keepdims=True)
    p = jnp.exp(s)
    return p * pl.reciprocal(jnp.sum(p, axis=-1, keepdims=True), approx=True)


def _mm(a, b):
    # bf16 MXU matmul, f32 accumulation.
    return jnp.dot(a.astype(jnp.bfloat16), b.astype(jnp.bfloat16),
                   preferred_element_type=jnp.float32)


def _mm_nt(a, b):
    # A @ B^T without materializing a transpose (contract last dims of both).
    return lax.dot_general(a.astype(jnp.bfloat16), b.astype(jnp.bfloat16),
                           (((1,), (1,)), ((), ())),
                           preferred_element_type=jnp.float32)


# ---------------- single fused SAM kernel (one image per grid step) ----------------
# patch embed (norm pre-folded) + pos -> LN -> QKV -> MHA -> proj+res -> LN -> MLP+res
# -> neck linear + LN -> token cross-attention -> hypernetwork -> upscale projection
# -> mask bmm in the UNSHUFFLED layout (pixel-shuffle permutation applied outside on the
#    tiny [B, 3, 256] result).  emb / hyper / up never leave VMEM.
def _sam_kernel(patches_ref, pos_ref,
                pw_ref, pb_ref,
                g1_ref, b1_ref, qkvw_ref, qkvb_ref, projw_ref, projb_ref,
                g2_ref, b2_ref, m1w_ref, m1b_ref, m2w_ref, m2b_ref,
                nw_ref, nb_ref, ng_ref, ngb_ref,
                tok_ref,
                dqw_ref, dqb_ref, dkw_ref, dkb_ref, dvw_ref, dvb_ref,
                dow_ref, dob_ref, hw1_ref, hb1_ref, hw2_ref, hb2_ref,
                upw_ref, upb_ref,
                masks_ref,
                attn_scr, up_scr,
                *, heads, head_dim, num_masks, enc_scale, dec_scale):
    d = heads * head_dim
    n_tok = patches_ref.shape[1]                        # tokens per image (P)

    # ---- encoder: patch embedding (processor normalization pre-folded) + pos ----
    patches = patches_ref[0]                            # [P, PPC] f32 (raw pixels)
    tok = _mm(patches, pw_ref[...]) + pb_ref[...] + pos_ref[...]

    # multi-head self attention: head outputs written straight into VMEM scratch (no concat)
    h = _layernorm(tok, g1_ref[...], b1_ref[...])
    qkv = _mm(h, qkvw_ref[...]) + qkvb_ref[...]         # [P, 3D] f32
    for hh in range(heads):
        c0 = hh * head_dim
        q = qkv[:, c0:c0 + head_dim]
        k = qkv[:, d + c0:d + c0 + head_dim]
        v = qkv[:, 2 * d + c0:2 * d + c0 + head_dim]
        p = _softmax_rows(_mm_nt(q, k) * enc_scale)
        attn_scr[:, c0:c0 + head_dim] = _mm(p, v)

    # projection + residual, MLP + residual (residuals fused; elementwise math stays f32)
    tok = tok + _mm(attn_scr[...], projw_ref[...]) + projb_ref[...]
    h = _layernorm(tok, g2_ref[...], b2_ref[...])
    h = jax.nn.gelu(_mm(h, m1w_ref[...]) + m1b_ref[...])
    tok = tok + _mm(h, m2w_ref[...]) + m2b_ref[...]

    # neck: 1x1 conv (== linear) + LayerNorm -> image embedding (never goes to HBM)
    emb = _layernorm(_mm(tok, nw_ref[...]) + nb_ref[...], ng_ref[...], ngb_ref[...])

    # ---- mask decoder: token -> image cross attention ----
    tokens = tok_ref[...]                               # [NTOK, CE]
    dq = _mm(tokens, dqw_ref[...]) + dqb_ref[...]
    dk = _mm(emb, dkw_ref[...]) + dkb_ref[...]
    dv = _mm(emb, dvw_ref[...]) + dvb_ref[...]
    pa = _softmax_rows(_mm_nt(dq, dk) * dec_scale)      # [NTOK, P]
    t = _mm(pa, dv)                                     # [NTOK, CE]
    t_out = _mm(t, dow_ref[...]) + dob_ref[...] + tokens

    # hypernetwork on the mask tokens (multimask output); stays in vregs/VMEM
    mask_tok = t_out[1:1 + num_masks, :]
    hmid = jnp.maximum(_mm(mask_tok, hw1_ref[...]) + hb1_ref[...], 0.0)
    hyper = _mm(hmid, hw2_ref[...]) + hb2_ref[...]      # [NUM_MASKS, CUP]

    # upscale projection of the image embedding, kept in the UNSHUFFLED layout
    up = _mm(emb, upw_ref[...]) + upb_ref[...]          # [P, RR*CUP]

    # regroup to [RR, P, CUP] via lane-tile slice copies into scratch (tile-aligned, cheap),
    # then a leading-dim collapse reshape (pure vreg relabel) for one MXU-friendly bmm.
    rr = up_scr.shape[0]
    cup = up_scr.shape[2]
    for q_ in range(rr):
        up_scr[q_] = up[:, q_ * cup:(q_ + 1) * cup]
    up_r = up_scr[...].reshape(rr * n_tok, cup)         # [RR*P, CUP]

    # masks in unshuffled (rr-major) layout: [NUM_MASKS, RR*P], lane-dense output store
    masks_ref[0] = _mm_nt(hyper, up_r)


# ---------------- deterministic parameter init (weights in bf16, biases/LN in f32) ----------------
def init_params(key):
    ks = iter(jax.random.split(key, 24))
    f32 = jnp.float32

    def w(shape):
        return (0.02 * jax.random.normal(next(ks), shape, f32)).astype(jnp.bfloat16)

    def wf(shape):
        return 0.02 * jax.random.normal(next(ks), shape, f32)

    return {
        # patch embedding (conv k=stride=PATCH == matmul over flattened patches)
        "patch_w": w((PATCH * PATCH * 3, D)), "patch_b": jnp.zeros((D,), f32),
        # encoder block
        "ln1_g": jnp.ones((D,), f32), "ln1_b": jnp.zeros((D,), f32),
        "qkv_w": w((D, 3 * D)), "qkv_b": jnp.zeros((3 * D,), f32),
        "proj_w": w((D, D)), "proj_b": jnp.zeros((D,), f32),
        "ln2_g": jnp.ones((D,), f32), "ln2_b": jnp.zeros((D,), f32),
        "mlp_w1": w((D, MLP_H)), "mlp_b1": jnp.zeros((MLP_H,), f32),
        "mlp_w2": w((MLP_H, D)), "mlp_b2": jnp.zeros((D,), f32),
        # neck (1x1 conv == linear) + LN
        "neck_w": w((D, CE)), "neck_b": jnp.zeros((CE,), f32),
        "neck_ln_g": jnp.ones((CE,), f32), "neck_ln_b": jnp.zeros((CE,), f32),
        # mask decoder
        "iou_token": wf((1, CE)), "mask_tokens": wf((NUM_MASK_TOKENS, CE)),
        "dq_w": w((CE, CE)), "dq_b": jnp.zeros((CE,), f32),
        "dk_w": w((CE, CE)), "dk_b": jnp.zeros((CE,), f32),
        "dv_w": w((CE, CE)), "dv_b": jnp.zeros((CE,), f32),
        "do_w": w((CE, CE)), "do_b": jnp.zeros((CE,), f32),
        "hw1": w((CE, CE)), "hb1": jnp.zeros((CE,), f32),
        "hw2": w((CE, CUP)), "hb2": jnp.zeros((CUP,), f32),
        "up_w": w((CE, RR * CUP)), "up_b": jnp.zeros((RR * CUP,), f32),
    }


# ---------------- forward (SAMModel.forward analogue) ----------------
def _sam_forward_impl(params, x):
    # x: [B, 3, H, W] float32 (NCHW, like the PyTorch module's input)
    B, C, H, W = x.shape
    gh, gw = H // PATCH, W // PATCH
    P = gh * gw
    PPC = PATCH * PATCH * C

    # ---- processor: per-channel normalize, folded analytically into the patch-embed linear ----
    # patch feature order is (py, px, c) => channel index is j % 3.
    mean = jnp.array([123.675, 116.28, 103.53], jnp.float32)
    std = jnp.array([58.395, 57.12, 57.375], jnp.float32)
    inv_std_vec = jnp.tile(1.0 / std, PATCH * PATCH)            # [PPC]
    mean_vec = jnp.tile(mean, PATCH * PATCH)                    # [PPC]
    pw_f32 = params["patch_w"].astype(jnp.float32)
    pw = (pw_f32 * inv_std_vec[:, None]).astype(jnp.bfloat16)
    pb = params["patch_b"] - (mean_vec * inv_std_vec) @ pw_f32
    # TODO(synk): SamProcessor also bilinearly resizes longest side to 1024 and pads; skipped at toy scale.

    # patchify (pure layout on the tiny raw input, fused by XLA under jit)
    patches = x.reshape(B, C, gh, PATCH, gw, PATCH)
    patches = patches.transpose(0, 2, 4, 3, 5, 1).reshape(B, P, PPC)

    # deterministic positional embedding, [P, D] — constant-folded at compile time under jit
    pos = 0.02 * jnp.sin(jnp.arange(P * D, dtype=jnp.float32)).reshape(P, D)

    tokens = jnp.concatenate([params["iou_token"], params["mask_tokens"]],
                             axis=0).astype(jnp.float32)        # [NTOK, CE]

    row = lambda v: v.reshape(1, -1)

    shared_inputs = (
        pos, pw, row(pb),
        row(params["ln1_g"]), row(params["ln1_b"]),
        params["qkv_w"], row(params["qkv_b"]),
        params["proj_w"], row(params["proj_b"]),
        row(params["ln2_g"]), row(params["ln2_b"]),
        params["mlp_w1"], row(params["mlp_b1"]),
        params["mlp_w2"], row(params["mlp_b2"]),
        params["neck_w"], row(params["neck_b"]),
        row(params["neck_ln_g"]), row(params["neck_ln_b"]),
        tokens,
        params["dq_w"], row(params["dq_b"]),
        params["dk_w"], row(params["dk_b"]),
        params["dv_w"], row(params["dv_b"]),
        params["do_w"], row(params["do_b"]),
        params["hw1"], row(params["hb1"]),
        params["hw2"], row(params["hb2"]),
        params["up_w"], row(params["up_b"]),
    )

    in_specs = [pl.BlockSpec((1, P, PPC), lambda b: (b, 0, 0))]         # per-image patches
    in_specs += [pl.BlockSpec(a.shape, lambda b: (0, 0)) for a in shared_inputs]

    # ---- one fused pallas_call for the whole pipeline, grid over batch (parallel) ----
    masks_unshuf = pl.pallas_call(
        functools.partial(_sam_kernel, heads=HEADS, head_dim=DH,
                          num_masks=NUM_MASKS,
                          enc_scale=1.0 / math.sqrt(DH),
                          dec_scale=1.0 / math.sqrt(CE)),
        grid=(B,),
        out_shape=jax.ShapeDtypeStruct((B, NUM_MASKS, RR * P), jnp.float32),
        in_specs=in_specs,
        out_specs=pl.BlockSpec((1, NUM_MASKS, RR * P), lambda b: (b, 0, 0)),
        scratch_shapes=[pltpu.VMEM((P, D), jnp.float32),        # attention head outputs
                        pltpu.VMEM((RR, P, CUP), jnp.float32)], # unshuffled upscaled embedding
        compiler_params=pltpu.CompilerParams(
            dimension_semantics=("parallel",)),
    )(patches, *shared_inputs)

    # pixel-shuffle permutation applied to the tiny [B, NUM_MASKS, RR*P] result (pure layout)
    m = masks_unshuf.reshape(B, NUM_MASKS, R, R, gh, gw)
    m = m.transpose(0, 1, 4, 2, 5, 3)                           # -> (B, NM, gh, R, gw, R)
    # (B, point_batch, num_masks, H, W) like HF outputs.pred_masks
    return m.reshape(B, 1, NUM_MASKS, gh * R, gw * R)


sam_forward = jax.jit(_sam_forward_impl)


if __name__ == "__main__":
    key = jax.random.PRNGKey(0)
    pkey, xkey = jax.random.split(key)
    params = init_params(pkey)
    # small synthetic "image" batch: B=2, 3 channels, 32x32 pixels, values in [0, 255]
    x = jax.random.uniform(xkey, (2, 3, 32, 32), jnp.float32) * 255.0

    pred_masks = sam_forward(params, x)
    pred_masks = jax.block_until_ready(pred_masks)
    assert pred_masks.shape == (2, 1, NUM_MASKS, 16, 16), pred_masks.shape
    assert jnp.isfinite(pred_masks).all()
    print("KERNEL_OK")
</pallas_src>

<mosaic_0001>
module attributes {stable_mosaic.version = 11 : i64} {
  func.func @_sam_kernel(%arg0: i32, %arg1: memref<1x16x192xf32, #tpu.memory_space<vmem>>, %arg2: memref<16x256xf32, #tpu.memory_space<vmem>>, %arg3: memref<192x256xbf16, #tpu.memory_space<vmem>>, %arg4: memref<1x256xf32, #tpu.memory_space<vmem>>, %arg5: memref<1x256xf32, #tpu.memory_space<vmem>>, %arg6: memref<1x256xf32, #tpu.memory_space<vmem>>, %arg7: memref<256x768xbf16, #tpu.memory_space<vmem>>, %arg8: memref<1x768xf32, #tpu.memory_space<vmem>>, %arg9: memref<256x256xbf16, #tpu.memory_space<vmem>>, %arg10: memref<1x256xf32, #tpu.memory_space<vmem>>, %arg11: memref<1x256xf32, #tpu.memory_space<vmem>>, %arg12: memref<1x256xf32, #tpu.memory_space<vmem>>, %arg13: memref<256x512xbf16, #tpu.memory_space<vmem>>, %arg14: memref<1x512xf32, #tpu.memory_space<vmem>>, %arg15: memref<512x256xbf16, #tpu.memory_space<vmem>>, %arg16: memref<1x256xf32, #tpu.memory_space<vmem>>, %arg17: memref<256x128xbf16, #tpu.memory_space<vmem>>, %arg18: memref<1x128xf32, #tpu.memory_space<vmem>>, %arg19: memref<1x128xf32, #tpu.memory_space<vmem>>, %arg20: memref<1x128xf32, #tpu.memory_space<vmem>>, %arg21: memref<5x128xf32, #tpu.memory_space<vmem>>, %arg22: memref<128x128xbf16, #tpu.memory_space<vmem>>, %arg23: memref<1x128xf32, #tpu.memory_space<vmem>>, %arg24: memref<128x128xbf16, #tpu.memory_space<vmem>>, %arg25: memref<1x128xf32, #tpu.memory_space<vmem>>, %arg26: memref<128x128xbf16, #tpu.memory_space<vmem>>, %arg27: memref<1x128xf32, #tpu.memory_space<vmem>>, %arg28: memref<128x128xbf16, #tpu.memory_space<vmem>>, %arg29: memref<1x128xf32, #tpu.memory_space<vmem>>, %arg30: memref<128x128xbf16, #tpu.memory_space<vmem>>, %arg31: memref<1x128xf32, #tpu.memory_space<vmem>>, %arg32: memref<128x128xbf16, #tpu.memory_space<vmem>>, %arg33: memref<1x128xf32, #tpu.memory_space<vmem>>, %arg34: memref<128x2048xbf16, #tpu.memory_space<vmem>>, %arg35: memref<1x2048xf32, #tpu.memory_space<vmem>>, %arg36: memref<1x3x256xf32, #tpu.memory_space<vmem>>, %arg37: memref<16x256xf32, #tpu.memory_space<vmem>>, %arg38: memref<16x16x128xf32, #tpu.memory_space<vmem>>) attributes {dimension_semantics = [#tpu.dimension_semantics<parallel>], iteration_bounds = array<i64: 2>, scalar_prefetch = 0 : i64, scratch_operands = 2 : i64, tpu.core_type = #tpu.core_type<tc>, window_params = [{transform_indices = @transform_0, window_bounds = array<i64: 1, 16, 192>}, {pipeline_mode = #tpu.pipeline_mode<synchronous>, transform_indices = @transform_1, window_bounds = array<i64: 16, 256>}, {pipeline_mode = #tpu.pipeline_mode<synchronous>, transform_indices = @transform_2, window_bounds = array<i64: 192, 256>}, {pipeline_mode = #tpu.pipeline_mode<synchronous>, transform_indices = @transform_3, window_bounds = array<i64: 1, 256>}, {pipeline_mode = #tpu.pipeline_mode<synchronous>, transform_indices = @transform_4, window_bounds = array<i64: 1, 256>}, {pipeline_mode = #tpu.pipeline_mode<synchronous>, transform_indices = @transform_5, window_bounds = array<i64: 1, 256>}, {pipeline_mode = #tpu.pipeline_mode<synchronous>, transform_indices = @transform_6, window_bounds = array<i64: 256, 768>}, {pipeline_mode = #tpu.pipeline_mode<synchronous>, transform_indices = @transform_7, window_bounds = array<i64: 1, 768>}, {pipeline_mode = #tpu.pipeline_mode<synchronous>, transform_indices = @transform_8, window_bounds = array<i64: 256, 256>}, {pipeline_mode = #tpu.pipeline_mode<synchronous>, transform_indices = @transform_9, window_bounds = array<i64: 1, 256>}, {pipeline_mode = #tpu.pipeline_mode<synchronous>, transform_indices = @transform_10, window_bounds = array<i64: 1, 256>}, {pipeline_mode = #tpu.pipeline_mode<synchronous>, transform_indices = @transform_11, window_bounds = array<i64: 1, 256>}, {pipeline_mode = #tpu.pipeline_mode<synchronous>, transform_indices = @transform_12, window_bounds = array<i64: 256, 512>}, {pipeline_mode = #tpu.pipeline_mode<synchronous>, transform_indices = @transform_13, window_bounds = array<i64: 1, 512>}, {pipeline_mode = #tpu.pipeline_mode<synchronous>, transform_indices = @transform_14, window_bounds = array<i64: 512, 256>}, {pipeline_mode = #tpu.pipeline_mode<synchronous>, transform_indices = @transform_15, window_bounds = array<i64: 1, 256>}, {pipeline_mode = #tpu.pipeline_mode<synchronous>, transform_indices = @transform_16, window_bounds = array<i64: 256, 128>}, {pipeline_mode = #tpu.pipeline_mode<synchronous>, transform_indices = @transform_17, window_bounds = array<i64: 1, 128>}, {pipeline_mode = #tpu.pipeline_mode<synchronous>, transform_indices = @transform_18, window_bounds = array<i64: 1, 128>}, {pipeline_mode = #tpu.pipeline_mode<synchronous>, transform_indices = @transform_19, window_bounds = array<i64: 1, 128>}, {pipeline_mode = #tpu.pipeline_mode<synchronous>, transform_indices = @transform_20, window_bounds = array<i64: 5, 128>}, {pipeline_mode = #tpu.pipeline_mode<synchronous>, transform_indices = @transform_21, window_bounds = array<i64: 128, 128>}, {pipeline_mode = #tpu.pipeline_mode<synchronous>, transform_indices = @transform_22, window_bounds = array<i64: 1, 128>}, {pipeline_mode = #tpu.pipeline_mode<synchronous>, transform_indices = @transform_23, window_bounds = array<i64: 128, 128>}, {pipeline_mode = #tpu.pipeline_mode<synchronous>, transform_indices = @transform_24, window_bounds = array<i64: 1, 128>}, {pipeline_mode = #tpu.pipeline_mode<synchronous>, transform_indices = @transform_25, window_bounds = array<i64: 128, 128>}, {pipeline_mode = #tpu.pipeline_mode<synchronous>, transform_indices = @transform_26, window_bounds = array<i64: 1, 128>}, {pipeline_mode = #tpu.pipeline_mode<synchronous>, transform_indices = @transform_27, window_bounds = array<i64: 128, 128>}, {pipeline_mode = #tpu.pipeline_mode<synchronous>, transform_indices = @transform_28, window_bounds = array<i64: 1, 128>}, {pipeline_mode = #tpu.pipeline_mode<synchronous>, transform_indices = @transform_29, window_bounds = array<i64: 128, 128>}, {pipeline_mode = #tpu.pipeline_mode<synchronous>, transform_indices = @transform_30, window_bounds = array<i64: 1, 128>}, {pipeline_mode = #tpu.pipeline_mode<synchronous>, transform_indices = @transform_31, window_bounds = array<i64: 128, 128>}, {pipeline_mode = #tpu.pipeline_mode<synchronous>, transform_indices = @transform_32, window_bounds = array<i64: 1, 128>}, {pipeline_mode = #tpu.pipeline_mode<synchronous>, transform_indices = @transform_33, window_bounds = array<i64: 128, 2048>}, {pipeline_mode = #tpu.pipeline_mode<synchronous>, transform_indices = @transform_34, window_bounds = array<i64: 1, 2048>}, {transform_indices = @transform_35, window_bounds = array<i64: 1, 3, 256>}]} {
    %c0 = arith.constant 0 : index
    %c0_0 = arith.constant 0 : index
    %c0_1 = arith.constant 0 : index
    %0 = vector.load %arg1[%c0, %c0_0, %c0_1] : memref<1x16x192xf32, #tpu.memory_space<vmem>>, vector<1x16x192xf32>
    %1 = vector.shape_cast %0 : vector<1x16x192xf32> to vector<16x192xf32>
    %c0_2 = arith.constant 0 : index
    %c0_3 = arith.constant 0 : index
    %2 = vector.load %arg3[%c0_2, %c0_3] : memref<192x256xbf16, #tpu.memory_space<vmem>>, vector<192x256xbf16>
    %3 = arith.truncf %1 : vector<16x192xf32> to vector<16x192xbf16>
    %cst = arith.constant dense<0.000000e+00> : vector<16x256xf32>
    %4 = tpu.matmul %3, %2, %cst {dimension_numbers = #tpu.dot_dimension_numbers<[1], [0], [0], [1], [0, 0, 1, 1], [], []>} : vector<16x192xbf16>, vector<192x256xbf16>, vector<16x256xf32> -> vector<16x256xf32>
    %c0_4 = arith.constant 0 : index
    %c0_5 = arith.constant 0 : index
    %5 = vector.load %arg4[%c0_4, %c0_5] : memref<1x256xf32, #tpu.memory_space<vmem>>, vector<1x256xf32>
    %6 = vector.broadcast %5 : vector<1x256xf32> to vector<16x256xf32>
    %7 = arith.addf %4, %6 : vector<16x256xf32>
    %c0_6 = arith.constant 0 : index
    %c0_7 = arith.constant 0 : index
    %8 = vector.load %arg2[%c0_6, %c0_7] : memref<16x256xf32, #tpu.memory_space<vmem>>, vector<16x256xf32>
    %9 = arith.addf %7, %8 : vector<16x256xf32>
    %c0_8 = arith.constant 0 : index
    %c0_9 = arith.constant 0 : index
    %10 = vector.load %arg5[%c0_8, %c0_9] : memref<1x256xf32, #tpu.memory_space<vmem>>, vector<1x256xf32>
    %c0_10 = arith.constant 0 : index
    %c0_11 = arith.constant 0 : index
    %11 = vector.load %arg6[%c0_10, %c0_11] : memref<1x256xf32, #tpu.memory_space<vmem>>, vector<1x256xf32>
    %cst_12 = arith.constant dense<0.000000e+00> : vector<16xf32>
    %12 = vector.multi_reduction <add>, %9, %cst_12 [1] : vector<16x256xf32> to vector<16xf32>
    %13 = vector.shape_cast %12 : vector<16xf32> to vector<16x1xf32>
    %cst_13 = arith.constant 2.560000e+02 : f32
    %14 = vector.broadcast %cst_13 : f32 to vector<16x1xf32>
    %15 = arith.divf %13, %14 : vector<16x1xf32>
    %16 = vector.broadcast %15 : vector<16x1xf32> to vector<16x256xf32>
    %17 = arith.subf %9, %16 : vector<16x256xf32>
    %18 = arith.mulf %17, %17 : vector<16x256xf32>
    %cst_14 = arith.constant dense<0.000000e+00> : vector<16xf32>
    %19 = vector.multi_reduction <add>, %18, %cst_14 [1] : vector<16x256xf32> to vector<16xf32>
    %20 = vector.shape_cast %19 : vector<16xf32> to vector<16x1xf32>
    %cst_15 = arith.constant 2.560000e+02 : f32
    %21 = vector.broadcast %cst_15 : f32 to vector<16x1xf32>
    %22 = arith.divf %20, %21 : vector<16x1xf32>
    %23 = vector.broadcast %15 : vector<16x1xf32> to vector<16x256xf32>
    %24 = arith.subf %9, %23 : vector<16x256xf32>
    %cst_16 = arith.constant 9.99999997E-7 : f32
    %25 = vector.broadcast %cst_16 : f32 to vector<16x1xf32>
    %26 = arith.addf %22, %25 : vector<16x1xf32>
    %27 = math.rsqrt %26 : vector<16x1xf32>
    %28 = vector.broadcast %27 : vector<16x1xf32> to vector<16x256xf32>
    %29 = arith.mulf %24, %28 : vector<16x256xf32>
    %30 = vector.broadcast %10 : vector<1x256xf32> to vector<16x256xf32>
    %31 = arith.mulf %29, %30 : vector<16x256xf32>
    %32 = vector.broadcast %11 : vector<1x256xf32> to vector<16x256xf32>
    %33 = arith.addf %31, %32 : vector<16x256xf32>
    %c0_17 = arith.constant 0 : index
    %c0_18 = arith.constant 0 : index
    %34 = vector.load %arg7[%c0_17, %c0_18] : memref<256x768xbf16, #tpu.memory_space<vmem>>, vector<256x768xbf16>
    %35 = arith.truncf %33 : vector<16x256xf32> to vector<16x256xbf16>
    %cst_19 = arith.constant dense<0.000000e+00> : vector<16x768xf32>
    %36 = tpu.matmul %35, %34, %cst_19 {dimension_numbers = #tpu.dot_dimension_numbers<[1], [0], [0], [1], [0, 0, 1, 1], [], []>} : vector<16x256xbf16>, vector<256x768xbf16>, vector<16x768xf32> -> vector<16x768xf32>
    %c0_20 = arith.constant 0 : index
    %c0_21 = arith.constant 0 : index
    %37 = vector.load %arg8[%c0_20, %c0_21] : memref<1x768xf32, #tpu.memory_space<vmem>>, vector<1x768xf32>
    %38 = vector.broadcast %37 : vector<1x768xf32> to vector<16x768xf32>
    %39 = arith.addf %36, %38 : vector<16x768xf32>
    %40 = vector.extract_strided_slice %39 {offsets = [0, 0], sizes = [16, 128], strides = [1, 1]} : vector<16x768xf32> to vector<16x128xf32>
    %41 = vector.extract_strided_slice %39 {offsets = [0, 256], sizes = [16, 128], strides = [1, 1]} : vector<16x768xf32> to vector<16x128xf32>
    %42 = vector.extract_strided_slice %39 {offsets = [0, 512], sizes = [16, 128], strides = [1, 1]} : vector<16x768xf32> to vector<16x128xf32>
    %43 = arith.truncf %40 : vector<16x128xf32> to vector<16x128xbf16>
    %44 = arith.truncf %41 : vector<16x128xf32> to vector<16x128xbf16>
    %cst_22 = arith.constant dense<0.000000e+00> : vector<16x16xf32>
    %45 = tpu.matmul %43, %44, %cst_22 {dimension_numbers = #tpu.dot_dimension_numbers<[1], [1], [0], [0], [0, 0, 1, 0], [], []>} : vector<16x128xbf16>, vector<16x128xbf16>, vector<16x16xf32> -> vector<16x16xf32>
    %cst_23 = arith.constant 0.0883883461 : f32
    %46 = vector.broadcast %cst_23 : f32 to vector<16x16xf32>
    %47 = arith.mulf %45, %46 : vector<16x16xf32>
    %cst_24 = arith.constant dense<0xFF800000> : vector<16xf32>
    %48 = vector.multi_reduction <maximumf>, %47, %cst_24 [1] : vector<16x16xf32> to vector<16xf32>
    %49 = vector.shape_cast %48 : vector<16xf32> to vector<16x1xf32>
    %50 = vector.broadcast %49 : vector<16x1xf32> to vector<16x16xf32>
    %51 = arith.subf %47, %50 : vector<16x16xf32>
    %52 = math.exp %51 : vector<16x16xf32>
    %cst_25 = arith.constant dense<0.000000e+00> : vector<16xf32>
    %53 = vector.multi_reduction <add>, %52, %cst_25 [1] : vector<16x16xf32> to vector<16xf32>
    %54 = vector.shape_cast %53 : vector<16xf32> to vector<16x1xf32>
    %55 = tpu.reciprocal %54 {approx = true} : vector<16x1xf32> -> vector<16x1xf32>
    %56 = vector.broadcast %55 : vector<16x1xf32> to vector<16x16xf32>
    %57 = arith.mulf %52, %56 : vector<16x16xf32>
    %58 = arith.truncf %57 : vector<16x16xf32> to vector<16x16xbf16>
    %59 = arith.truncf %42 : vector<16x128xf32> to vector<16x128xbf16>
    %cst_26 = arith.constant dense<0.000000e+00> : vector<16x128xf32>
    %60 = tpu.matmul %58, %59, %cst_26 {dimension_numbers = #tpu.dot_dimension_numbers<[1], [0], [0], [1], [0, 0, 1, 1], [], []>} : vector<16x16xbf16>, vector<16x128xbf16>, vector<16x128xf32> -> vector<16x128xf32>
    %c0_27 = arith.constant 0 : index
    %c0_28 = arith.constant 0 : index
    %61 = vector.load %arg37[%c0_27, %c0_28] : memref<16x256xf32, #tpu.memory_space<vmem>>, vector<16x128xf32>
    tpu.vector_store %arg37[%c0_27, %c0_28], %60 {strides = array<i32>} : memref<16x256xf32, #tpu.memory_space<vmem>>, vector<16x128xf32>,
    %62 = vector.extract_strided_slice %39 {offsets = [0, 128], sizes = [16, 128], strides = [1, 1]} : vector<16x768xf32> to vector<16x128xf32>
    %63 = vector.extract_strided_slice %39 {offsets = [0, 384], sizes = [16, 128], strides = [1, 1]} : vector<16x768xf32> to vector<16x128xf32>
    %64 = vector.extract_strided_slice %39 {offsets = [0, 640], sizes = [16, 128], strides = [1, 1]} : vector<16x768xf32> to vector<16x128xf32>
    %65 = arith.truncf %62 : vector<16x128xf32> to vector<16x128xbf16>
    %66 = arith.truncf %63 : vector<16x128xf32> to vector<16x128xbf16>
    %cst_29 = arith.constant dense<0.000000e+00> : vector<16x16xf32>
    %67 = tpu.matmul %65, %66, %cst_29 {dimension_numbers = #tpu.dot_dimension_numbers<[1], [1], [0], [0], [0, 0, 1, 0], [], []>} : vector<16x128xbf16>, vector<16x128xbf16>, vector<16x16xf32> -> vector<16x16xf32>
    %cst_30 = arith.constant 0.0883883461 : f32
    %68 = vector.broadcast %cst_30 : f32 to vector<16x16xf32>
    %69 = arith.mulf %67, %68 : vector<16x16xf32>
    %cst_31 = arith.constant dense<0xFF800000> : vector<16xf32>
    %70 = vector.multi_reduction <maximumf>, %69, %cst_31 [1] : vector<16x16xf32> to vector<16xf32>
    %71 = vector.shape_cast %70 : vector<16xf32> to vector<16x1xf32>
    %72 = vector.broadcast %71 : vector<16x1xf32> to vector<16x16xf32>
    %73 = arith.subf %69, %72 : vector<16x16xf32>
    %74 = math.exp %73 : vector<16x16xf32>
    %cst_32 = arith.constant dense<0.000000e+00> : vector<16xf32>
    %75 = vector.multi_reduction <add>, %74, %cst_32 [1] : vector<16x16xf32> to vector<16xf32>
    %76 = vector.shape_cast %75 : vector<16xf32> to vector<16x1xf32>
    %77 = tpu.reciprocal %76 {approx = true} : vector<16x1xf32> -> vector<16x1xf32>
    %78 = vector.broadcast %77 : vector<16x1xf32> to vector<16x16xf32>
    %79 = arith.mulf %74, %78 : vector<16x16xf32>
    %80 = arith.truncf %79 : vector<16x16xf32> to vector<16x16xbf16>
    %81 = arith.truncf %64 : vector<16x128xf32> to vector<16x128xbf16>
    %cst_33 = arith.constant dense<0.000000e+00> : vector<16x128xf32>
    %82 = tpu.matmul %80, %81, %cst_33 {dimension_numbers = #tpu.dot_dimension_numbers<[1], [0], [0], [1], [0, 0, 1, 1], [], []>} : vector<16x16xbf16>, vector<16x128xbf16>, vector<16x128xf32> -> vector<16x128xf32>
    %c0_34 = arith.constant 0 : index
    %c128 = arith.constant 128 : index
    %83 = vector.load %arg37[%c0_34, %c128] : memref<16x256xf32, #tpu.memory_space<vmem>>, vector<16x128xf32>
    tpu.vector_store %arg37[%c0_34, %c128], %82 {strides = array<i32>} : memref<16x256xf32, #tpu.memory_space<vmem>>, vector<16x128xf32>,
    %c0_35 = arith.constant 0 : index
    %c0_36 = arith.constant 0 : index
    %84 = vector.load %arg37[%c0_35, %c0_36] : memref<16x256xf32, #tpu.memory_space<vmem>>, vector<16x256xf32>
    %c0_37 = arith.constant 0 : index
    %c0_38 = arith.constant 0 : index
    %85 = vector.load %arg9[%c0_37, %c0_38] : memref<256x256xbf16, #tpu.memory_space<vmem>>, vector<256x256xbf16>
    %86 = arith.truncf %84 : vector<16x256xf32> to vector<16x256xbf16>
    %cst_39 = arith.constant dense<0.000000e+00> : vector<16x256xf32>
    %87 = tpu.matmul %86, %85, %cst_39 {dimension_numbers = #tpu.dot_dimension_numbers<[1], [0], [0], [1], [0, 0, 1, 1], [], []>} : vector<16x256xbf16>, vector<256x256xbf16>, vector<16x256xf32> -> vector<16x256xf32>
    %88 = arith.addf %9, %87 : vector<16x256xf32>
    %c0_40 = arith.constant 0 : index
    %c0_41 = arith.constant 0 : index
    %89 = vector.load %arg10[%c0_40, %c0_41] : memref<1x256xf32, #tpu.memory_space<vmem>>, vector<1x256xf32>
    %90 = vector.broadcast %89 : vector<1x256xf32> to vector<16x256xf32>
    %91 = arith.addf %88, %90 : vector<16x256xf32>
    %c0_42 = arith.constant 0 : index
    %c0_43 = arith.constant 0 : index
    %92 = vector.load %arg11[%c0_42, %c0_43] : memref<1x256xf32, #tpu.memory_space<vmem>>, vector<1x256xf32>
    %c0_44 = arith.constant 0 : index
    %c0_45 = arith.constant 0 : index
    %93 = vector.load %arg12[%c0_44, %c0_45] : memref<1x256xf32, #tpu.memory_space<vmem>>, vector<1x256xf32>
    %cst_46 = arith.constant dense<0.000000e+00> : vector<16xf32>
    %94 = vector.multi_reduction <add>, %91, %cst_46 [1] : vector<16x256xf32> to vector<16xf32>
    %95 = vector.shape_cast %94 : vector<16xf32> to vector<16x1xf32>
    %cst_47 = arith.constant 2.560000e+02 : f32
    %96 = vector.broadcast %cst_47 : f32 to vector<16x1xf32>
    %97 = arith.divf %95, %96 : vector<16x1xf32>
    %98 = vector.broadcast %97 : vector<16x1xf32> to vector<16x256xf32>
    %99 = arith.subf %91, %98 : vector<16x256xf32>
    %100 = arith.mulf %99, %99 : vector<16x256xf32>
    %cst_48 = arith.constant dense<0.000000e+00> : vector<16xf32>
    %101 = vector.multi_reduction <add>, %100, %cst_48 [1] : vector<16x256xf32> to vector<16xf32>
    %102 = vector.shape_cast %101 : vector<16xf32> to vector<16x1xf32>
    %cst_49 = arith.constant 2.560000e+02 : f32
    %103 = vector.broadcast %cst_49 : f32 to vector<16x1xf32>
    %104 = arith.divf %102, %103 : vector<16x1xf32>
    %105 = vector.broadcast %97 : vector<16x1xf32> to vector<16x256xf32>
    %106 = arith.subf %91, %105 : vector<16x256xf32>
    %cst_50 = arith.constant 9.99999997E-7 : f32
    %107 = vector.broadcast %cst_50 : f32 to vector<16x1xf32>
    %108 = arith.addf %104, %107 : vector<16x1xf32>
    %109 = math.rsqrt %108 : vector<16x1xf32>
    %110 = vector.broadcast %109 : vector<16x1xf32> to vector<16x256xf32>
    %111 = arith.mulf %106, %110 : vector<16x256xf32>
    %112 = vector.broadcast %92 : vector<1x256xf32> to vector<16x256xf32>
    %113 = arith.mulf %111, %112 : vector<16x256xf32>
    %114 = vector.broadcast %93 : vector<1x256xf32> to vector<16x256xf32>
    %115 = arith.addf %113, %114 : vector<16x256xf32>
    %c0_51 = arith.constant 0 : index
    %c0_52 = arith.constant 0 : index
    %116 = vector.load %arg13[%c0_51, %c0_52] : memref<256x512xbf16, #tpu.memory_space<vmem>>, vector<256x512xbf16>
    %117 = arith.truncf %115 : vector<16x256xf32> to vector<16x256xbf16>
    %cst_53 = arith.constant dense<0.000000e+00> : vector<16x512xf32>
    %118 = tpu.matmul %117, %116, %cst_53 {dimension_numbers = #tpu.dot_dimension_numbers<[1], [0], [0], [1], [0, 0, 1, 1], [], []>} : vector<16x256xbf16>, vector<256x512xbf16>, vector<16x512xf32> -> vector<16x512xf32>
    %c0_54 = arith.constant 0 : index
    %c0_55 = arith.constant 0 : index
    %119 = vector.load %arg14[%c0_54, %c0_55] : memref<1x512xf32, #tpu.memory_space<vmem>>, vector<1x512xf32>
    %120 = vector.broadcast %119 : vector<1x512xf32> to vector<16x512xf32>
    %121 = arith.addf %118, %120 : vector<16x512xf32>
    %122 = arith.mulf %121, %121 : vector<16x512xf32>
    %123 = arith.mulf %121, %122 : vector<16x512xf32>
    %cst_56 = arith.constant 4.471500e-02 : f32
    %124 = vector.broadcast %cst_56 : f32 to vector<16x512xf32>
    %125 = arith.mulf %124, %123 : vector<16x512xf32>
    %126 = arith.addf %121, %125 : vector<16x512xf32>
    %cst_57 = arith.constant 0.797884583 : f32
    %127 = vector.broadcast %cst_57 : f32 to vector<16x512xf32>
    %128 = arith.mulf %127, %126 : vector<16x512xf32>
    %129 = math.tanh %128 : vector<16x512xf32>
    %cst_58 = arith.constant 1.000000e+00 : f32
    %130 = vector.broadcast %cst_58 : f32 to vector<16x512xf32>
    %131 = arith.addf %130, %129 : vector<16x512xf32>
    %cst_59 = arith.constant 5.000000e-01 : f32
    %132 = vector.broadcast %cst_59 : f32 to vector<16x512xf32>
    %133 = arith.mulf %132, %131 : vector<16x512xf32>
    %134 = arith.mulf %121, %133 : vector<16x512xf32>
    %c0_60 = arith.constant 0 : index
    %c0_61 = arith.constant 0 : index
    %135 = vector.load %arg15[%c0_60, %c0_61] : memref<512x256xbf16, #tpu.memory_space<vmem>>, vector<512x256xbf16>
    %136 = arith.truncf %134 : vector<16x512xf32> to vector<16x512xbf16>
    %cst_62 = arith.constant dense<0.000000e+00> : vector<16x256xf32>
    %137 = tpu.matmul %136, %135, %cst_62 {dimension_numbers = #tpu.dot_dimension_numbers<[1], [0], [0], [1], [0, 0, 1, 1], [], []>} : vector<16x512xbf16>, vector<512x256xbf16>, vector<16x256xf32> -> vector<16x256xf32>
    %138 = arith.addf %91, %137 : vector<16x256xf32>
    %c0_63 = arith.constant 0 : index
    %c0_64 = arith.constant 0 : index
    %139 = vector.load %arg16[%c0_63, %c0_64] : memref<1x256xf32, #tpu.memory_space<vmem>>, vector<1x256xf32>
    %140 = vector.broadcast %139 : vector<1x256xf32> to vector<16x256xf32>
    %141 = arith.addf %138, %140 : vector<16x256xf32>
    %c0_65 = arith.constant 0 : index
    %c0_66 = arith.constant 0 : index
    %142 = vector.load %arg17[%c0_65, %c0_66] : memref<256x128xbf16, #tpu.memory_space<vmem>>, vector<256x128xbf16>
    %143 = arith.truncf %141 : vector<16x256xf32> to vector<16x256xbf16>
    %cst_67 = arith.constant dense<0.000000e+00> : vector<16x128xf32>
    %144 = tpu.matmul %143, %142, %cst_67 {dimension_numbers = #tpu.dot_dimension_numbers<[1], [0], [0], [1], [0, 0, 1, 1], [], []>} : vector<16x256xbf16>, vector<256x128xbf16>, vector<16x128xf32> -> vector<16x128xf32>
    %c0_68 = arith.constant 0 : index
    %c0_69 = arith.constant 0 : index
    %145 = vector.load %arg18[%c0_68, %c0_69] : memref<1x128xf32, #tpu.memory_space<vmem>>, vector<1x128xf32>
    %146 = vector.broadcast %145 : vector<1x128xf32> to vector<16x128xf32>
    %147 = arith.addf %144, %146 : vector<16x128xf32>
    %c0_70 = arith.constant 0 : index
    %c0_71 = arith.constant 0 : index
    %148 = vector.load %arg19[%c0_70, %c0_71] : memref<1x128xf32, #tpu.memory_space<vmem>>, vector<1x128xf32>
    %c0_72 = arith.constant 0 : index
    %c0_73 = arith.constant 0 : index
    %149 = vector.load %arg20[%c0_72, %c0_73] : memref<1x128xf32, #tpu.memory_space<vmem>>, vector<1x128xf32>
    %cst_74 = arith.constant dense<0.000000e+00> : vector<16xf32>
    %150 = vector.multi_reduction <add>, %147, %cst_74 [1] : vector<16x128xf32> to vector<16xf32>
    %151 = vector.shape_cast %150 : vector<16xf32> to vector<16x1xf32>
    %cst_75 = arith.constant 1.280000e+02 : f32
    %152 = vector.broadcast %cst_75 : f32 to vector<16x1xf32>
    %153 = arith.divf %151, %152 : vector<16x1xf32>
    %154 = vector.broadcast %153 : vector<16x1xf32> to vector<16x128xf32>
    %155 = arith.subf %147, %154 : vector<16x128xf32>
    %156 = arith.mulf %155, %155 : vector<16x128xf32>
    %cst_76 = arith.constant dense<0.000000e+00> : vector<16xf32>
    %157 = vector.multi_reduction <add>, %156, %cst_76 [1] : vector<16x128xf32> to vector<16xf32>
    %158 = vector.shape_cast %157 : vector<16xf32> to vector<16x1xf32>
    %cst_77 = arith.constant 1.280000e+02 : f32
    %159 = vector.broadcast %cst_77 : f32 to vector<16x1xf32>
    %160 = arith.divf %158, %159 : vector<16x1xf32>
    %161 = vector.broadcast %153 : vector<16x1xf32> to vector<16x128xf32>
    %162 = arith.subf %147, %161 : vector<16x128xf32>
    %cst_78 = arith.constant 9.99999997E-7 : f32
    %163 = vector.broadcast %cst_78 : f32 to vector<16x1xf32>
    %164 = arith.addf %160, %163 : vector<16x1xf32>
    %165 = math.rsqrt %164 : vector<16x1xf32>
    %166 = vector.broadcast %165 : vector<16x1xf32> to vector<16x128xf32>
    %167 = arith.mulf %162, %166 : vector<16x128xf32>
    %168 = vector.broadcast %148 : vector<1x128xf32> to vector<16x128xf32>
    %169 = arith.mulf %167, %168 : vector<16x128xf32>
    %170 = vector.broadcast %149 : vector<1x128xf32> to vector<16x128xf32>
    %171 = arith.addf %169, %170 : vector<16x128xf32>
    %c0_79 = arith.constant 0 : index
    %c0_80 = arith.constant 0 : index
    %172 = vector.load %arg21[%c0_79, %c0_80] : memref<5x128xf32, #tpu.memory_space<vmem>>, vector<5x128xf32>
    %c0_81 = arith.constant 0 : index
    %c0_82 = arith.constant 0 : index
    %173 = vector.load %arg22[%c0_81, %c0_82] : memref<128x128xbf16, #tpu.memory_space<vmem>>, vector<128x128xbf16>
    %174 = arith.truncf %172 : vector<5x128xf32> to vector<5x128xbf16>
    %cst_83 = arith.constant dense<0.000000e+00> : vector<5x128xf32>
    %175 = tpu.matmul %174, %173, %cst_83 {dimension_numbers = #tpu.dot_dimension_numbers<[1], [0], [0], [1], [0, 0, 1, 1], [], []>} : vector<5x128xbf16>, vector<128x128xbf16>, vector<5x128xf32> -> vector<5x128xf32>
    %c0_84 = arith.constant 0 : index
    %c0_85 = arith.constant 0 : index
    %176 = vector.load %arg23[%c0_84, %c0_85] : memref<1x128xf32, #tpu.memory_space<vmem>>, vector<1x128xf32>
    %177 = vector.broadcast %176 : vector<1x128xf32> to vector<5x128xf32>
    %178 = arith.addf %175, %177 : vector<5x128xf32>
    %c0_86 = arith.constant 0 : index
    %c0_87 = arith.constant 0 : index
    %179 = vector.load %arg24[%c0_86, %c0_87] : memref<128x128xbf16, #tpu.memory_space<vmem>>, vector<128x128xbf16>
    %180 = arith.truncf %171 : vector<16x128xf32> to vector<16x128xbf16>
    %cst_88 = arith.constant dense<0.000000e+00> : vector<16x128xf32>
    %181 = tpu.matmul %180, %179, %cst_88 {dimension_numbers = #tpu.dot_dimension_numbers<[1], [0], [0], [1], [0, 0, 1, 1], [], []>} : vector<16x128xbf16>, vector<128x128xbf16>, vector<16x128xf32> -> vector<16x128xf32>
    %c0_89 = arith.constant 0 : index
    %c0_90 = arith.constant 0 : index
    %182 = vector.load %arg25[%c0_89, %c0_90] : memref<1x128xf32, #tpu.memory_space<vmem>>, vector<1x128xf32>
    %183 = vector.broadcast %182 : vector<1x128xf32> to vector<16x128xf32>
    %184 = arith.addf %181, %183 : vector<16x128xf32>
    %c0_91 = arith.constant 0 : index
    %c0_92 = arith.constant 0 : index
    %185 = vector.load %arg26[%c0_91, %c0_92] : memref<128x128xbf16, #tpu.memory_space<vmem>>, vector<128x128xbf16>
    %186 = arith.truncf %171 : vector<16x128xf32> to vector<16x128xbf16>
    %cst_93 = arith.constant dense<0.000000e+00> : vector<16x128xf32>
    %187 = tpu.matmul %186, %185, %cst_93 {dimension_numbers = #tpu.dot_dimension_numbers<[1], [0], [0], [1], [0, 0, 1, 1], [], []>} : vector<16x128xbf16>, vector<128x128xbf16>, vector<16x128xf32> -> vector<16x128xf32>
    %c0_94 = arith.constant 0 : index
    %c0_95 = arith.constant 0 : index
    %188 = vector.load %arg27[%c0_94, %c0_95] : memref<1x128xf32, #tpu.memory_space<vmem>>, vector<1x128xf32>
    %189 = vector.broadcast %188 : vector<1x128xf32> to vector<16x128xf32>
    %190 = arith.addf %187, %189 : vector<16x128xf32>
    %191 = arith.truncf %178 : vector<5x128xf32> to vector<5x128xbf16>
    %192 = arith.truncf %184 : vector<16x128xf32> to vector<16x128xbf16>
    %cst_96 = arith.constant dense<0.000000e+00> : vector<5x16xf32>
    %193 = tpu.matmul %191, %192, %cst_96 {dimension_numbers = #tpu.dot_dimension_numbers<[1], [1], [0], [0], [0, 0, 1, 0], [], []>} : vector<5x128xbf16>, vector<16x128xbf16>, vector<5x16xf32> -> vector<5x16xf32>
    %cst_97 = arith.constant 0.0883883461 : f32
    %194 = vector.broadcast %cst_97 : f32 to vector<5x16xf32>
    %195 = arith.mulf %193, %194 : vector<5x16xf32>
    %cst_98 = arith.constant dense<0xFF800000> : vector<5xf32>
    %196 = vector.multi_reduction <maximumf>, %195, %cst_98 [1] : vector<5x16xf32> to vector<5xf32>
    %197 = vector.shape_cast %196 : vector<5xf32> to vector<5x1xf32>
    %198 = vector.broadcast %197 : vector<5x1xf32> to vector<5x16xf32>
    %199 = arith.subf %195, %198 : vector<5x16xf32>
    %200 = math.exp %199 : vector<5x16xf32>
    %cst_99 = arith.constant dense<0.000000e+00> : vector<5xf32>
    %201 = vector.multi_reduction <add>, %200, %cst_99 [1] : vector<5x16xf32> to vector<5xf32>
    %202 = vector.shape_cast %201 : vector<5xf32> to vector<5x1xf32>
    %203 = tpu.reciprocal %202 {approx = true} : vector<5x1xf32> -> vector<5x1xf32>
    %204 = vector.broadcast %203 : vector<5x1xf32> to vector<5x16xf32>
    %205 = arith.mulf %200, %204 : vector<5x16xf32>
    %206 = arith.truncf %205 : vector<5x16xf32> to vector<5x16xbf16>
    %207 = arith.truncf %190 : vector<16x128xf32> to vector<16x128xbf16>
    %cst_100 = arith.constant dense<0.000000e+00> : vector<5x128xf32>
    %208 = tpu.matmul %206, %207, %cst_100 {dimension_numbers = #tpu.dot_dimension_numbers<[1], [0], [0], [1], [0, 0, 1, 1], [], []>} : vector<5x16xbf16>, vector<16x128xbf16>, vector<5x128xf32> -> vector<5x128xf32>
    %c0_101 = arith.constant 0 : index
    %c0_102 = arith.constant 0 : index
    %209 = vector.load %arg28[%c0_101, %c0_102] : memref<128x128xbf16, #tpu.memory_space<vmem>>, vector<128x128xbf16>
    %210 = arith.truncf %208 : vector<5x128xf32> to vector<5x128xbf16>
    %cst_103 = arith.constant dense<0.000000e+00> : vector<5x128xf32>
    %211 = tpu.matmul %210, %209, %cst_103 {dimension_numbers = #tpu.dot_dimension_numbers<[1], [0], [0], [1], [0, 0, 1, 1], [], []>} : vector<5x128xbf16>, vector<128x128xbf16>, vector<5x128xf32> -> vector<5x128xf32>
    %c0_104 = arith.constant 0 : index
    %c0_105 = arith.constant 0 : index
    %212 = vector.load %arg29[%c0_104, %c0_105] : memref<1x128xf32, #tpu.memory_space<vmem>>, vector<1x128xf32>
    %213 = vector.broadcast %212 : vector<1x128xf32> to vector<5x128xf32>
    %214 = arith.addf %211, %213 : vector<5x128xf32>
    %215 = arith.addf %214, %172 : vector<5x128xf32>
    %216 = vector.extract_strided_slice %215 {offsets = [1, 0], sizes = [3, 128], strides = [1, 1]} : vector<5x128xf32> to vector<3x128xf32>
    %c0_106 = arith.constant 0 : index
    %c0_107 = arith.constant 0 : index
    %217 = vector.load %arg30[%c0_106, %c0_107] : memref<128x128xbf16, #tpu.memory_space<vmem>>, vector<128x128xbf16>
    %218 = arith.truncf %216 : vector<3x128xf32> to vector<3x128xbf16>
    %cst_108 = arith.constant dense<0.000000e+00> : vector<3x128xf32>
    %219 = tpu.matmul %218, %217, %cst_108 {dimension_numbers = #tpu.dot_dimension_numbers<[1], [0], [0], [1], [0, 0, 1, 1], [], []>} : vector<3x128xbf16>, vector<128x128xbf16>, vector<3x128xf32> -> vector<3x128xf32>
    %c0_109 = arith.constant 0 : index
    %c0_110 = arith.constant 0 : index
    %220 = vector.load %arg31[%c0_109, %c0_110] : memref<1x128xf32, #tpu.memory_space<vmem>>, vector<1x128xf32>
    %221 = vector.broadcast %220 : vector<1x128xf32> to vector<3x128xf32>
    %222 = arith.addf %219, %221 : vector<3x128xf32>
    %cst_111 = arith.constant 0.000000e+00 : f32
    %223 = vector.broadcast %cst_111 : f32 to vector<3x128xf32>
    %224 = arith.maximumf %222, %223 : vector<3x128xf32>
    %c0_112 = arith.constant 0 : index
    %c0_113 = arith.constant 0 : index
    %225 = vector.load %arg32[%c0_112, %c0_113] : memref<128x128xbf16, #tpu.memory_space<vmem>>, vector<128x128xbf16>
    %226 = arith.truncf %224 : vector<3x128xf32> to vector<3x128xbf16>
    %cst_114 = arith.constant dense<0.000000e+00> : vector<3x128xf32>
    %227 = tpu.matmul %226, %225, %cst_114 {dimension_numbers = #tpu.dot_dimension_numbers<[1], [0], [0], [1], [0, 0, 1, 1], [], []>} : vector<3x128xbf16>, vector<128x128xbf16>, vector<3x128xf32> -> vector<3x128xf32>
    %c0_115 = arith.constant 0 : index
    %c0_116 = arith.constant 0 : index
    %228 = vector.load %arg33[%c0_115, %c0_116] : memref<1x128xf32, #tpu.memory_space<vmem>>, vector<1x128xf32>
    %229 = vector.broadcast %228 : vector<1x128xf32> to vector<3x128xf32>
    %230 = arith.addf %227, %229 : vector<3x128xf32>
    %c0_117 = arith.constant 0 : index
    %c0_118 = arith.constant 0 : index
    %231 = vector.load %arg34[%c0_117, %c0_118] : memref<128x2048xbf16, #tpu.memory_space<vmem>>, vector<128x2048xbf16>
    %232 = arith.truncf %171 : vector<16x128xf32> to vector<16x128xbf16>
    %cst_119 = arith.constant dense<0.000000e+00> : vector<16x2048xf32>
    %233 = tpu.matmul %232, %231, %cst_119 {dimension_numbers = #tpu.dot_dimension_numbers<[1], [0], [0], [1], [0, 0, 1, 1], [], []>} : vector<16x128xbf16>, vector<128x2048xbf16>, vector<16x2048xf32> -> vector<16x2048xf32>
    %c0_120 = arith.constant 0 : index
    %c0_121 = arith.constant 0 : index
    %234 = vector.load %arg35[%c0_120, %c0_121] : memref<1x2048xf32, #tpu.memory_space<vmem>>, vector<1x2048xf32>
    %235 = vector.broadcast %234 : vector<1x2048xf32> to vector<16x2048xf32>
    %236 = arith.addf %233, %235 : vector<16x2048xf32>
    %237 = vector.extract_strided_slice %236 {offsets = [0, 0], sizes = [16, 128], strides = [1, 1]} : vector<16x2048xf32> to vector<16x128xf32>
    %c0_122 = arith.constant 0 : index
    %c0_123 = arith.constant 0 : index
    %c0_124 = arith.constant 0 : index
    %238 = vector.load %arg38[%c0_122, %c0_123, %c0_124] : memref<16x16x128xf32, #tpu.memory_space<vmem>>, vector<1x16x128xf32>
    %239 = vector.shape_cast %238 : vector<1x16x128xf32> to vector<16x128xf32>
    %240 = vector.shape_cast %237 : vector<16x128xf32> to vector<1x16x128xf32>
    tpu.vector_store %arg38[%c0_122, %c0_123, %c0_124], %240 {strides = array<i32>} : memref<16x16x128xf32, #tpu.memory_space<vmem>>, vector<1x16x128xf32>,
    %241 = vector.extract_strided_slice %236 {offsets = [0, 128], sizes = [16, 128], strides = [1, 1]} : vector<16x2048xf32> to vector<16x128xf32>
    %c1 = arith.constant 1 : index
    %c0_125 = arith.constant 0 : index
    %c0_126 = arith.constant 0 : index
    %242 = vector.load %arg38[%c1, %c0_125, %c0_126] : memref<16x16x128xf32, #tpu.memory_space<vmem>>, vector<1x16x128xf32>
    %243 = vector.shape_cast %242 : vector<1x16x128xf32> to vector<16x128xf32>
    %244 = vector.shape_cast %241 : vector<16x128xf32> to vector<1x16x128xf32>
    tpu.vector_store %arg38[%c1, %c0_125, %c0_126], %244 {strides = array<i32>} : memref<16x16x128xf32, #tpu.memory_space<vmem>>, vector<1x16x128xf32>,
    %245 = vector.extract_strided_slice %236 {offsets = [0, 256], sizes = [16, 128], strides = [1, 1]} : vector<16x2048xf32> to vector<16x128xf32>
    %c2 = arith.constant 2 : index
    %c0_127 = arith.constant 0 : index
    %c0_128 = arith.constant 0 : index
    %246 = vector.load %arg38[%c2, %c0_127, %c0_128] : memref<16x16x128xf32, #tpu.memory_space<vmem>>, vector<1x16x128xf32>
    %247 = vector.shape_cast %246 : vector<1x16x128xf32> to vector<16x128xf32>
    %248 = vector.shape_cast %245 : vector<16x128xf32> to vector<1x16x128xf32>
    tpu.vector_store %arg38[%c2, %c0_127, %c0_128], %248 {strides = array<i32>} : memref<16x16x128xf32, #tpu.memory_space<vmem>>, vector<1x16x128xf32>,
    %249 = vector.extract_strided_slice %236 {offsets = [0, 384], sizes = [16, 128], strides = [1, 1]} : vector<16x2048xf32> to vector<16x128xf32>
    %c3 = arith.constant 3 : index
    %c0_129 = arith.constant 0 : index
    %c0_130 = arith.constant 0 : index
    %250 = vector.load %arg38[%c3, %c0_129, %c0_130] : memref<16x16x128xf32, #tpu.memory_space<vmem>>, vector<1x16x128xf32>
    %251 = vector.shape_cast %250 : vector<1x16x128xf32> to vector<16x128xf32>
    %252 = vector.shape_cast %249 : vector<16x128xf32> to vector<1x16x128xf32>
    tpu.vector_store %arg38[%c3, %c0_129, %c0_130], %252 {strides = array<i32>} : memref<16x16x128xf32, #tpu.memory_space<vmem>>, vector<1x16x128xf32>,
    %253 = vector.extract_strided_slice %236 {offsets = [0, 512], sizes = [16, 128], strides = [1, 1]} : vector<16x2048xf32> to vector<16x128xf32>
    %c4 = arith.constant 4 : index
    %c0_131 = arith.constant 0 : index
    %c0_132 = arith.constant 0 : index
    %254 = vector.load %arg38[%c4, %c0_131, %c0_132] : memref<16x16x128xf32, #tpu.memory_space<vmem>>, vector<1x16x128xf32>
    %255 = vector.shape_cast %254 : vector<1x16x128xf32> to vector<16x128xf32>
    %256 = vector.shape_cast %253 : vector<16x128xf32> to vector<1x16x128xf32>
    tpu.vector_store %arg38[%c4, %c0_131, %c0_132], %256 {strides = array<i32>} : memref<16x16x128xf32, #tpu.memory_space<vmem>>, vector<1x16x128xf32>,
    %257 = vector.extract_strided_slice %236 {offsets = [0, 640], sizes = [16, 128], strides = [1, 1]} : vector<16x2048xf32> to vector<16x128xf32>
    %c5 = arith.constant 5 : index
    %c0_133 = arith.constant 0 : index
    %c0_134 = arith.constant 0 : index
    %258 = vector.load %arg38[%c5, %c0_133, %c0_134] : memref<16x16x128xf32, #tpu.memory_space<vmem>>, vector<1x16x128xf32>
    %259 = vector.shape_cast %258 : vector<1x16x128xf32> to vector<16x128xf32>
    %260 = vector.shape_cast %257 : vector<16x128xf32> to vector<1x16x128xf32>
    tpu.vector_store %arg38[%c5, %c0_133, %c0_134], %260 {strides = array<i32>} : memref<16x16x128xf32, #tpu.memory_space<vmem>>, vector<1x16x128xf32>,
    %261 = vector.extract_strided_slice %236 {offsets = [0, 768], sizes = [16, 128], strides = [1, 1]} : vector<16x2048xf32> to vector<16x128xf32>
    %c6 = arith.constant 6 : index
    %c0_135 = arith.constant 0 : index
    %c0_136 = arith.constant 0 : index
    %262 = vector.load %arg38[%c6, %c0_135, %c0_136] : memref<16x16x128xf32, #tpu.memory_space<vmem>>, vector<1x16x128xf32>
    %263 = vector.shape_cast %262 : vector<1x16x128xf32> to vector<16x128xf32>
    %264 = vector.shape_cast %261 : vector<16x128xf32> to vector<1x16x128xf32>
    tpu.vector_store %arg38[%c6, %c0_135, %c0_136], %264 {strides = array<i32>} : memref<16x16x128xf32, #tpu.memory_space<vmem>>, vector<1x16x128xf32>,
    %265 = vector.extract_strided_slice %236 {offsets = [0, 896], sizes = [16, 128], strides = [1, 1]} : vector<16x2048xf32> to vector<16x128xf32>
    %c7 = arith.constant 7 : index
    %c0_137 = arith.constant 0 : index
    %c0_138 = arith.constant 0 : index
    %266 = vector.load %arg38[%c7, %c0_137, %c0_138] : memref<16x16x128xf32, #tpu.memory_space<vmem>>, vector<1x16x128xf32>
    %267 = vector.shape_cast %266 : vector<1x16x128xf32> to vector<16x128xf32>
    %268 = vector.shape_cast %265 : vector<16x128xf32> to vector<1x16x128xf32>
    tpu.vector_store %arg38[%c7, %c0_137, %c0_138], %268 {strides = array<i32>} : memref<16x16x128xf32, #tpu.memory_space<vmem>>, vector<1x16x128xf32>,
    %269 = vector.extract_strided_slice %236 {offsets = [0, 1024], sizes = [16, 128], strides = [1, 1]} : vector<16x2048xf32> to vector<16x128xf32>
    %c8 = arith.constant 8 : index
    %c0_139 = arith.constant 0 : index
    %c0_140 = arith.constant 0 : index
    %270 = vector.load %arg38[%c8, %c0_139, %c0_140] : memref<16x16x128xf32, #tpu.memory_space<vmem>>, vector<1x16x128xf32>
    %271 = vector.shape_cast %270 : vector<1x16x128xf32> to vector<16x128xf32>
    %272 = vector.shape_cast %269 : vector<16x128xf32> to vector<1x16x128xf32>
    tpu.vector_store %arg38[%c8, %c0_139, %c0_140], %272 {strides = array<i32>} : memref<16x16x128xf32, #tpu.memory_space<vmem>>, vector<1x16x128xf32>,
    %273 = vector.extract_strided_slice %236 {offsets = [0, 1152], sizes = [16, 128], strides = [1, 1]} : vector<16x2048xf32> to vector<16x128xf32>
    %c9 = arith.constant 9 : index
    %c0_141 = arith.constant 0 : index
    %c0_142 = arith.constant 0 : index
    %274 = vector.load %arg38[%c9, %c0_141, %c0_142] : memref<16x16x128xf32, #tpu.memory_space<vmem>>, vector<1x16x128xf32>
    %275 = vector.shape_cast %274 : vector<1x16x128xf32> to vector<16x128xf32>
    %276 = vector.shape_cast %273 : vector<16x128xf32> to vector<1x16x128xf32>
    tpu.vector_store %arg38[%c9, %c0_141, %c0_142], %276 {strides = array<i32>} : memref<16x16x128xf32, #tpu.memory_space<vmem>>, vector<1x16x128xf32>,
    %277 = vector.extract_strided_slice %236 {offsets = [0, 1280], sizes = [16, 128], strides = [1, 1]} : vector<16x2048xf32> to vector<16x128xf32>
    %c10 = arith.constant 10 : index
    %c0_143 = arith.constant 0 : index
    %c0_144 = arith.constant 0 : index
    %278 = vector.load %arg38[%c10, %c0_143, %c0_144] : memref<16x16x128xf32, #tpu.memory_space<vmem>>, vector<1x16x128xf32>
    %279 = vector.shape_cast %278 : vector<1x16x128xf32> to vector<16x128xf32>
    %280 = vector.shape_cast %277 : vector<16x128xf32> to vector<1x16x128xf32>
    tpu.vector_store %arg38[%c10, %c0_143, %c0_144], %280 {strides = array<i32>} : memref<16x16x128xf32, #tpu.memory_space<vmem>>, vector<1x16x128xf32>,
    %281 = vector.extract_strided_slice %236 {offsets = [0, 1408], sizes = [16, 128], strides = [1, 1]} : vector<16x2048xf32> to vector<16x128xf32>
    %c11 = arith.constant 11 : index
    %c0_145 = arith.constant 0 : index
    %c0_146 = arith.constant 0 : index
    %282 = vector.load %arg38[%c11, %c0_145, %c0_146] : memref<16x16x128xf32, #tpu.memory_space<vmem>>, vector<1x16x128xf32>
    %283 = vector.shape_cast %282 : vector<1x16x128xf32> to vector<16x128xf32>
    %284 = vector.shape_cast %281 : vector<16x128xf32> to vector<1x16x128xf32>
    tpu.vector_store %arg38[%c11, %c0_145, %c0_146], %284 {strides = array<i32>} : memref<16x16x128xf32, #tpu.memory_space<vmem>>, vector<1x16x128xf32>,
    %285 = vector.extract_strided_slice %236 {offsets = [0, 1536], sizes = [16, 128], strides = [1, 1]} : vector<16x2048xf32> to vector<16x128xf32>
    %c12 = arith.constant 12 : index
    %c0_147 = arith.constant 0 : index
    %c0_148 = arith.constant 0 : index
    %286 = vector.load %arg38[%c12, %c0_147, %c0_148] : memref<16x16x128xf32, #tpu.memory_space<vmem>>, vector<1x16x128xf32>
    %287 = vector.shape_cast %286 : vector<1x16x128xf32> to vector<16x128xf32>
    %288 = vector.shape_cast %285 : vector<16x128xf32> to vector<1x16x128xf32>
    tpu.vector_store %arg38[%c12, %c0_147, %c0_148], %288 {strides = array<i32>} : memref<16x16x128xf32, #tpu.memory_space<vmem>>, vector<1x16x128xf32>,
    %289 = vector.extract_strided_slice %236 {offsets = [0, 1664], sizes = [16, 128], strides = [1, 1]} : vector<16x2048xf32> to vector<16x128xf32>
    %c13 = arith.constant 13 : index
    %c0_149 = arith.constant 0 : index
    %c0_150 = arith.constant 0 : index
    %290 = vector.load %arg38[%c13, %c0_149, %c0_150] : memref<16x16x128xf32, #tpu.memory_space<vmem>>, vector<1x16x128xf32>
    %291 = vector.shape_cast %290 : vector<1x16x128xf32> to vector<16x128xf32>
    %292 = vector.shape_cast %289 : vector<16x128xf32> to vector<1x16x128xf32>
    tpu.vector_store %arg38[%c13, %c0_149, %c0_150], %292 {strides = array<i32>} : memref<16x16x128xf32, #tpu.memory_space<vmem>>, vector<1x16x128xf32>,
    %293 = vector.extract_strided_slice %236 {offsets = [0, 1792], sizes = [16, 128], strides = [1, 1]} : vector<16x2048xf32> to vector<16x128xf32>
    %c14 = arith.constant 14 : index
    %c0_151 = arith.constant 0 : index
    %c0_152 = arith.constant 0 : index
    %294 = vector.load %arg38[%c14, %c0_151, %c0_152] : memref<16x16x128xf32, #tpu.memory_space<vmem>>, vector<1x16x128xf32>
    %295 = vector.shape_cast %294 : vector<1x16x128xf32> to vector<16x128xf32>
    %296 = vector.shape_cast %293 : vector<16x128xf32> to vector<1x16x128xf32>
    tpu.vector_store %arg38[%c14, %c0_151, %c0_152], %296 {strides = array<i32>} : memref<16x16x128xf32, #tpu.memory_space<vmem>>, vector<1x16x128xf32>,
    %297 = vector.extract_strided_slice %236 {offsets = [0, 1920], sizes = [16, 128], strides = [1, 1]} : vector<16x2048xf32> to vector<16x128xf32>
    %c15 = arith.constant 15 : index
    %c0_153 = arith.constant 0 : index
    %c0_154 = arith.constant 0 : index
    %298 = vector.load %arg38[%c15, %c0_153, %c0_154] : memref<16x16x128xf32, #tpu.memory_space<vmem>>, vector<1x16x128xf32>
    %299 = vector.shape_cast %298 : vector<1x16x128xf32> to vector<16x128xf32>
    %300 = vector.shape_cast %297 : vector<16x128xf32> to vector<1x16x128xf32>
    tpu.vector_store %arg38[%c15, %c0_153, %c0_154], %300 {strides = array<i32>} : memref<16x16x128xf32, #tpu.memory_space<vmem>>, vector<1x16x128xf32>,
    %c0_155 = arith.constant 0 : index
    %c0_156 = arith.constant 0 : index
    %c0_157 = arith.constant 0 : index
    %301 = vector.load %arg38[%c0_155, %c0_156, %c0_157] : memref<16x16x128xf32, #tpu.memory_space<vmem>>, vector<16x16x128xf32>
    %302 = vector.shape_cast %301 : vector<16x16x128xf32> to vector<256x128xf32>
    %303 = arith.truncf %230 : vector<3x128xf32> to vector<3x128xbf16>
    %304 = arith.truncf %302 : vector<256x128xf32> to vector<256x128xbf16>
    %cst_158 = arith.constant dense<0.000000e+00> : vector<3x256xf32>
    %305 = tpu.matmul %303, %304, %cst_158 {dimension_numbers = #tpu.dot_dimension_numbers<[1], [1], [0], [0], [0, 0, 1, 0], [], []>} : vector<3x128xbf16>, vector<256x128xbf16>, vector<3x256xf32> -> vector<3x256xf32>
    %c0_159 = arith.constant 0 : index
    %c0_160 = arith.constant 0 : index
    %c0_161 = arith.constant 0 : index
    %306 = vector.load %arg36[%c0_159, %c0_160, %c0_161] : memref<1x3x256xf32, #tpu.memory_space<vmem>>, vector<1x3x256xf32>
    %307 = vector.shape_cast %306 : vector<1x3x256xf32> to vector<3x256xf32>
    %308 = vector.shape_cast %305 : vector<3x256xf32> to vector<1x3x256xf32>
    tpu.vector_store %arg36[%c0_159, %c0_160, %c0_161], %308 {strides = array<i32>} : memref<1x3x256xf32, #tpu.memory_space<vmem>>, vector<1x3x256xf32>,
    return
  }
  func.func @transform_0(%arg0: i32) -> (i32, i32, i32) {
    %c0_i32 = arith.constant 0 : i32
    %c0_i32_0 = arith.constant 0 : i32
    %c0_i32_1 = arith.constant 0 : i32
    return %arg0, %c0_i32, %c0_i32_0 : i32, i32, i32
  }
  func.func @transform_1(%arg0: i32) -> (i32, i32) {
    %c0_i32 = arith.constant 0 : i32
    %c0_i32_0 = arith.constant 0 : i32
    %c0_i32_1 = arith.constant 0 : i32
    return %c0_i32, %c0_i32_0 : i32, i32
  }
  func.func @transform_2(%arg0: i32) -> (i32, i32) {
    %c0_i32 = arith.constant 0 : i32
    %c0_i32_0 = arith.constant 0 : i32
    %c0_i32_1 = arith.constant 0 : i32
    return %c0_i32, %c0_i32_0 : i32, i32
  }
  func.func @transform_3(%arg0: i32) -> (i32, i32) {
    %c0_i32 = arith.constant 0 : i32
    %c0_i32_0 = arith.constant 0 : i32
    %c0_i32_1 = arith.constant 0 : i32
    return %c0_i32, %c0_i32_0 : i32, i32
  }
  func.func @transform_4(%arg0: i32) -> (i32, i32) {
    %c0_i32 = arith.constant 0 : i32
    %c0_i32_0 = arith.constant 0 : i32
    %c0_i32_1 = arith.constant 0 : i32
    return %c0_i32, %c0_i32_0 : i32, i32
  }
  func.func @transform_5(%arg0: i32) -> (i32, i32) {
    %c0_i32 = arith.constant 0 : i32
    %c0_i32_0 = arith.constant 0 : i32
    %c0_i32_1 = arith.constant 0 : i32
    return %c0_i32, %c0_i32_0 : i32, i32
  }
  func.func @transform_6(%arg0: i32) -> (i32, i32) {
    %c0_i32 = arith.constant 0 : i32
    %c0_i32_0 = arith.constant 0 : i32
    %c0_i32_1 = arith.constant 0 : i32
    return %c0_i32, %c0_i32_0 : i32, i32
  }
  func.func @transform_7(%arg0: i32) -> (i32, i32) {
    %c0_i32 = arith.constant 0 : i32
    %c0_i32_0 = arith.constant 0 : i32
    %c0_i32_1 = arith.constant 0 : i32
    return %c0_i32, %c0_i32_0 : i32, i32
  }
  func.func @transform_8(%arg0: i32) -> (i32, i32) {
    %c0_i32 = arith.constant 0 : i32
    %c0_i32_0 = arith.constant 0 : i32
    %c0_i32_1 = arith.constant 0 : i32
    return %c0_i32, %c0_i32_0 : i32, i32
  }
  func.func @transform_9(%arg0: i32) -> (i32, i32) {
    %c0_i32 = arith.constant 0 : i32
    %c0_i32_0 = arith.constant 0 : i32
    %c0_i32_1 = arith.constant 0 : i32
    return %c0_i32, %c0_i32_0 : i32, i32
  }
  func.func @transform_10(%arg0: i32) -> (i32, i32) {
    %c0_i32 = arith.constant 0 : i32
    %c0_i32_0 = arith.constant 0 : i32
    %c0_i32_1 = arith.constant 0 : i32
    return %c0_i32, %c0_i32_0 : i32, i32
  }
  func.func @transform_11(%arg0: i32) -> (i32, i32) {
    %c0_i32 = arith.constant 0 : i32
    %c0_i32_0 = arith.constant 0 : i32
    %c0_i32_1 = arith.constant 0 : i32
    return %c0_i32, %c0_i32_0 : i32, i32
  }
  func.func @transform_12(%arg0: i32) -> (i32, i32) {
    %c0_i32 = arith.constant 0 : i32
    %c0_i32_0 = arith.constant 0 : i32
    %c0_i32_1 = arith.constant 0 : i32
    return %c0_i32, %c0_i32_0 : i32, i32
  }
  func.func @transform_13(%arg0: i32) -> (i32, i32) {
    %c0_i32 = arith.constant 0 : i32
    %c0_i32_0 = arith.constant 0 : i32
    %c0_i32_1 = arith.constant 0 : i32
    return %c0_i32, %c0_i32_0 : i32, i32
  }
  func.func @transform_14(%arg0: i32) -> (i32, i32) {
    %c0_i32 = arith.constant 0 : i32
    %c0_i32_0 = arith.constant 0 : i32
    %c0_i32_1 = arith.constant 0 : i32
    return %c0_i32, %c0_i32_0 : i32, i32
  }
  func.func @transform_15(%arg0: i32) -> (i32, i32) {
    %c0_i32 = arith.constant 0 : i32
    %c0_i32_0 = arith.constant 0 : i32
    %c0_i32_1 = arith.constant 0 : i32
    return %c0_i32, %c0_i32_0 : i32, i32
  }
  func.func @transform_16(%arg0: i32) -> (i32, i32) {
    %c0_i32 = arith.constant 0 : i32
    %c0_i32_0 = arith.constant 0 : i32
    %c0_i32_1 = arith.constant 0 : i32
    return %c0_i32, %c0_i32_0 : i32, i32
  }
  func.func @transform_17(%arg0: i32) -> (i32, i32) {
    %c0_i32 = arith.constant 0 : i32
    %c0_i32_0 = arith.constant 0 : i32
    %c0_i32_1 = arith.constant 0 : i32
    return %c0_i32, %c0_i32_0 : i32, i32
  }
  func.func @transform_18(%arg0: i32) -> (i32, i32) {
    %c0_i32 = arith.constant 0 : i32
    %c0_i32_0 = arith.constant 0 : i32
    %c0_i32_1 = arith.constant 0 : i32
    return %c0_i32, %c0_i32_0 : i32, i32
  }
  func.func @transform_19(%arg0: i32) -> (i32, i32) {
    %c0_i32 = arith.constant 0 : i32
    %c0_i32_0 = arith.constant 0 : i32
    %c0_i32_1 = arith.constant 0 : i32
    return %c0_i32, %c0_i32_0 : i32, i32
  }
  func.func @transform_20(%arg0: i32) -> (i32, i32) {
    %c0_i32 = arith.constant 0 : i32
    %c0_i32_0 = arith.constant 0 : i32
    %c0_i32_1 = arith.constant 0 : i32
    return %c0_i32, %c0_i32_0 : i32, i32
  }
  func.func @transform_21(%arg0: i32) -> (i32, i32) {
    %c0_i32 = arith.constant 0 : i32
    %c0_i32_0 = arith.constant 0 : i32
    %c0_i32_1 = arith.constant 0 : i32
    return %c0_i32, %c0_i32_0 : i32, i32
  }
  func.func @transform_22(%arg0: i32) -> (i32, i32) {
    %c0_i32 = arith.constant 0 : i32
    %c0_i32_0 = arith.constant 0 : i32
    %c0_i32_1 = arith.constant 0 : i32
    return %c0_i32, %c0_i32_0 : i32, i32
  }
  func.func @transform_23(%arg0: i32) -> (i32, i32) {
    %c0_i32 = arith.constant 0 : i32
    %c0_i32_0 = arith.constant 0 : i32
    %c0_i32_1 = arith.constant 0 : i32
    return %c0_i32, %c0_i32_0 : i32, i32
  }
  func.func @transform_24(%arg0: i32) -> (i32, i32) {
    %c0_i32 = arith.constant 0 : i32
    %c0_i32_0 = arith.constant 0 : i32
    %c0_i32_1 = arith.constant 0 : i32
    return %c0_i32, %c0_i32_0 : i32, i32
  }
  func.func @transform_25(%arg0: i32) -> (i32, i32) {
    %c0_i32 = arith.constant 0 : i32
    %c0_i32_0 = arith.constant 0 : i32
    %c0_i32_1 = arith.constant 0 : i32
    return %c0_i32, %c0_i32_0 : i32, i32
  }
  func.func @transform_26(%arg0: i32) -> (i32, i32) {
    %c0_i32 = arith.constant 0 : i32
    %c0_i32_0 = arith.constant 0 : i32
    %c0_i32_1 = arith.constant 0 : i32
    return %c0_i32, %c0_i32_0 : i32, i32
  }
  func.func @transform_27(%arg0: i32) -> (i32, i32) {
    %c0_i32 = arith.constant 0 : i32
    %c0_i32_0 = arith.constant 0 : i32
    %c0_i32_1 = arith.constant 0 : i32
    return %c0_i32, %c0_i32_0 : i32, i32
  }
  func.func @transform_28(%arg0: i32) -> (i32, i32) {
    %c0_i32 = arith.constant 0 : i32
    %c0_i32_0 = arith.constant 0 : i32
    %c0_i32_1 = arith.constant 0 : i32
    return %c0_i32, %c0_i32_0 : i32, i32
  }
  func.func @transform_29(%arg0: i32) -> (i32, i32) {
    %c0_i32 = arith.constant 0 : i32
    %c0_i32_0 = arith.constant 0 : i32
    %c0_i32_1 = arith.constant 0 : i32
    return %c0_i32, %c0_i32_0 : i32, i32
  }
  func.func @transform_30(%arg0: i32) -> (i32, i32) {
    %c0_i32 = arith.constant 0 : i32
    %c0_i32_0 = arith.constant 0 : i32
    %c0_i32_1 = arith.constant 0 : i32
    return %c0_i32, %c0_i32_0 : i32, i32
  }
  func.func @transform_31(%arg0: i32) -> (i32, i32) {
    %c0_i32 = arith.constant 0 : i32
    %c0_i32_0 = arith.constant 0 : i32
    %c0_i32_1 = arith.constant 0 : i32
    return %c0_i32, %c0_i32_0 : i32, i32
  }
  func.func @transform_32(%arg0: i32) -> (i32, i32) {
    %c0_i32 = arith.constant 0 : i32
    %c0_i32_0 = arith.constant 0 : i32
    %c0_i32_1 = arith.constant 0 : i32
    return %c0_i32, %c0_i32_0 : i32, i32
  }
  func.func @transform_33(%arg0: i32) -> (i32, i32) {
    %c0_i32 = arith.constant 0 : i32
    %c0_i32_0 = arith.constant 0 : i32
    %c0_i32_1 = arith.constant 0 : i32
    return %c0_i32, %c0_i32_0 : i32, i32
  }
  func.func @transform_34(%arg0: i32) -> (i32, i32) {
    %c0_i32 = arith.constant 0 : i32
    %c0_i32_0 = arith.constant 0 : i32
    %c0_i32_1 = arith.constant 0 : i32
    return %c0_i32, %c0_i32_0 : i32, i32
  }
  func.func @transform_35(%arg0: i32) -> (i32, i32, i32) {
    %c0_i32 = arith.constant 0 : i32
    %c0_i32_0 = arith.constant 0 : i32
    %c0_i32_1 = arith.constant 0 : i32
    return %arg0, %c0_i32, %c0_i32_0 : i32, i32, i32
  }
}

</mosaic_0001>

<bundles_post_ra>
// kernel: tile.15
= control target key start
LH: loop header
LB: loop body
LE: loop exit
PB: predicated region body
PF: predicated region fallthrough
CT: control target
= control target key end

     0   :  { %s64_s0 = inlined_call_operand.vmem [shape: f32[3], index: 0, kind: input, shape index: {}]   ;;  %s65_s1 = inlined_call_operand.vmem [shape: f32[64,3], index: 1, kind: output, shape index: {}]  }
   0x1   :  { %v4_v0 = vld [vmem:[%s64_s0] ss:$0 sm:$0xff] }
   0x2   :  { %5 = vst [vmem:[%s65_s1] sm:$0xff] %v4_v0  ;;  %20 = vst [vmem:[%s65_s1 + $0x8] sm:$0xff] %v4_v0 }
   0x3   :  { %21 = vst [vmem:[%s65_s1 + $0x10] sm:$0xff] %v4_v0  ;;  %22 = vst [vmem:[%s65_s1 + $0x18] sm:$0xff] %v4_v0 }
   0x4   :  { %23 = vst [vmem:[%s65_s1 + $0x20] sm:$0xff] %v4_v0  ;;  %24 = vst [vmem:[%s65_s1 + $0x28] sm:$0xff] %v4_v0 }
   0x5   :  { %25 = vst [vmem:[%s65_s1 + $0x30] sm:$0xff] %v4_v0  ;;  %26 = vst [vmem:[%s65_s1 + $0x38] sm:$0xff] %v4_v0 }

// kernel: tile.16
= control target key start
LH: loop header
LB: loop body
LE: loop exit
PB: predicated region body
PF: predicated region fallthrough
CT: control target
= control target key end

     0   :  { %vm9_vm0 = vcmask 15360   ;;  %s546_s12 = smov 126   ;;  %s547_s13 = smov 120   ;;  %vm3_vm1 = vcmask 23552   ;;  %vm13_vm2 = vcmask 7168   ;;  %vm16_vm3 = vcmask 1048560   ;;  %s817_s0 = inlined_call_operand.vmem [shape: f32[64,3], index: 0, kind: input, shape index: {}]   ;;  %s818_s1 = inlined_call_operand.vmem [shape: f32[192], index: 1, kind: output, shape index: {}]  }
   0x1   :  { %v419_v0 = vld [vmem:[%s817_s0 + $0x2a] sm:$0x1]   ;;  %v422_v3 = vld [vmem:[%s817_s0 + $0x28] sm:$0x1]   ;;  %v421_v4 = vld [vmem:[%s817_s0 + $0x29] sm:$0x1]  }
   0x2   :  { %v420_v1 = vld [vmem:[%s817_s0 + $0x2a] sm:$0x1]   ;;  %26 = vrot.lane.b32.xlu1 %v422_v3, %s547_s13  ;;  %v423_v5 = vld [vmem:[%s817_s0 + $0x27] sm:$0x1]   ;;  %s548_s18 = smov 123   ;;  %s549_s19 = smov 117  }
   0x3   :  { %v10_v2 = vsel %vm9_vm0, %v420_v1, %v419_v0  ;;  %v424_v6 = vld [vmem:[%s817_s0 + $0x26] sm:$0x1]   ;;  %v425_v7 = vld [vmem:[%s817_s0 + $0x25] sm:$0x1]   ;;  %s550_s24 = smov 114   ;;  %s551_s25 = smov 111  }
   0x4   :  { %11 = vrot.lane.b32.xlu0 %v10_v2, %s546_s12  ;;  %v426_v8 = vld [vmem:[%s817_s0 + $0x24] sm:$0x1]   ;;  %v427_v9 = vld [vmem:[%s817_s0 + $0x23] sm:$0x1]   ;;  %s552_s30 = smov 108   ;;  %s553_s2 = smov 105  }
   0x5   :  { %v428_v10 = vld [vmem:[%s817_s0 + $0x22] sm:$0x1]   ;;  %v429_v11 = vld [vmem:[%s817_s0 + $0x21] sm:$0x1]   ;;  %s554_s7 = smov 102   ;;  %s555_s8 = smov 99  }
   0x6   :  { %32 = vrot.lane.b32.xlu1 %v423_v5, %s549_s19  ;;  %v430_v12 = vld [vmem:[%s817_s0 + $0x20] sm:$0x1]   ;;  %v431_v13 = vld [vmem:[%s817_s0 + $0x1f] sm:$0x1]   ;;  %s556_s13 = smov 96   ;;  %s557_s14 = smov 93  }
   0x7   :  { %v432_v14 = vld [vmem:[%s817_s0 + $0x1e] sm:$0x1]   ;;  %v433_v15 = vld [vmem:[%s817_s0 + $0x1d] sm:$0x1]   ;;  %s558_s19 = smov 90   ;;  %s559_s20 = smov 87  }
   0x8   :  { %20 = vrot.lane.b32.xlu0 %v421_v4, %s548_s18  ;;  %v434_v16 = vld [vmem:[%s817_s0 + $0x1c] sm:$0x1]   ;;  %v435_v17 = vld [vmem:[%s817_s0 + $0x1b] sm:$0x1]   ;;  %v2_v18 = vld [vmem:[%s817_s0] sm:$0x1]  }
   0x9   :  { %s560_s27 = smov 84   ;;  %s561_s28 = smov 81   ;;  %4 = vst.msk [vmem:[#allocation0] sm:$0x1] %vm3_vm1, %v2_v18   ;;  %v436_v19 = vld [vmem:[%s817_s0 + $0x1a] sm:$0x1]  }
   0xa   :  { %44 = vrot.lane.b32.xlu1 %v425_v7, %s551_s25  ;;  %v437_v20 = vld [vmem:[%s817_s0 + $0x19] sm:$0x1]   ;;  %s562_s4 = smov 78   ;;  %s563_s5 = smov 75   ;;  %v438_v21 = vld [vmem:[%s817_s0 + $0x18] sm:$0x1]  }
   0xb   :  { %v439_v22 = vld [vmem:[%s817_s0 + $0x17] sm:$0x1]   ;;  %s564_s10 = smov 72   ;;  %s565_s11 = smov 69   ;;  %v440_v23 = vld [vmem:[%s817_s0 + $0x16] sm:$0x1]  }
   0xc   :  { %38 = vrot.lane.b32.xlu0 %v424_v6, %s550_s24  ;;  %v441_v24 = vld [vmem:[%s817_s0 + $0x15] sm:$0x1]   ;;  %s566_s16 = smov 66   ;;  %s567_s17 = smov 63   ;;  %v442_v25 = vld [vmem:[%s817_s0 + $0x3f] sm:$0x1]  }
   0xd   :  { %v443_v26 = vld [vmem:[%s817_s0 + $0x14] sm:$0x1]   ;;  %s568_s22 = smov 61   ;;  %s569_s23 = smov 60   ;;  %v444_v27 = vld [vmem:[%s817_s0 + $0x3e] sm:$0x1]  }
   0xe   :  { %56 = vrot.lane.b32.xlu1 %v427_v9, %s553_s2  ;;  %v445_v28 = vld [vmem:[%s817_s0 + $0x13] sm:$0x1]   ;;  %s571_s29 = smov 57   ;;  %v446_v29 = vld [vmem:[%s817_s0 + $0x3d] sm:$0x1]   ;;  %s573_s6 = smov 54  }
   0xf   :  { %v447_v30 = vld [vmem:[%s817_s0 + $0x12] sm:$0x1]   ;;  %v448_v31 = vld [vmem:[%s817_s0 + $0x3c] sm:$0x1]   ;;  %v449_v32 = vld [vmem:[%s817_s0 + $0x11] sm:$0x1]  }
  0x10   :  { %50 = vrot.lane.b32.xlu0 %v426_v8, %s552_s30  ;;  %s575_s12 = smov 51   ;;  %v450_v33 = vld [vmem:[%s817_s0 + $0x3b] sm:$0x1]   ;;  %v451_v34 = vld [vmem:[%s817_s0 + $0x10] sm:$0x1]   ;;  %s577_s18 = smov 48  }
  0x11   :  { %v452_v35 = vld [vmem:[%s817_s0 + $0x3a] sm:$0x1]   ;;  %v453_v36 = vld [vmem:[%s817_s0 + $0xf] sm:$0x1]   ;;  %s579_s24 = smov 45   ;;  %s581_s30 = smov 42  }
  0x12   :  { %68 = vrot.lane.b32.xlu1 %v429_v11, %s555_s8  ;;  %v454_v37 = vld [vmem:[%s817_s0 + $0x39] sm:$0x1]   ;;  %v455_v38 = vld [vmem:[%s817_s0 + $0xe] sm:$0x1]   ;;  %v456_v39 = vld [vmem:[%s817_s0 + $0x38] sm:$0x1]  }
  0x13   :  { %v457_v40 = vld [vmem:[%s817_s0 + $0xd] sm:$0x1]   ;;  %v458_v41 = vld [vmem:[%s817_s0 + $0x37] sm:$0x1]   ;;  %v459_v42 = vld [vmem:[%s817_s0 + $0xc] sm:$0x1]  }
  0x14   :  { %62 = vrot.lane.b32.xlu0 %v428_v10, %s554_s7  ;;  %s583_s7 = smov 39   ;;  %v460_v43 = vld [vmem:[%s817_s0 + $0x36] sm:$0x1]   ;;  %v461_v44 = vld [vmem:[%s817_s0 + $0xb] sm:$0x1]   ;;  %s589_s25 = smov 30  }
  0x15   :  { %v462_v45 = vld [vmem:[%s817_s0 + $0x35] sm:$0x1]   ;;  %v463_v46 = vld [vmem:[%s817_s0 + $0xa] sm:$0x1]   ;;  %v464_v47 = vld [vmem:[%s817_s0 + $0x34] sm:$0x1]  }
  0x16   :  { %80 = vrot.lane.b32.xlu1 %v431_v13, %s557_s14  ;;  %v465_v48 = vld [vmem:[%s817_s0 + $0x9] sm:$0x1]   ;;  %s591_s2 = smov 27   ;;  %v466_v49 = vld [vmem:[%s817_s0 + $0x33] sm:$0x1]   ;;  %s593_s8 = smov 24  }
  0x17   :  { %v467_v50 = vld [vmem:[%s817_s0 + $0x8] sm:$0x1]   ;;  %v468_v51 = vld [vmem:[%s817_s0 + $0x32] sm:$0x1]   ;;  %v469_v52 = vld [vmem:[%s817_s0 + $0x7] sm:$0x1]  }
  0x18   :  { %74 = vrot.lane.b32.xlu0 %v430_v12, %s556_s13  ;;  %s585_s13 = smov 36   ;;  %s595_s14 = smov 21   ;;  %v470_v53 = vld [vmem:[%s817_s0 + $0x31] sm:$0x1]   ;;  %v471_v54 = vld [vmem:[%s817_s0 + $0x6] sm:$0x1]  }
  0x19   :  { %v472_v55 = vld [vmem:[%s817_s0 + $0x30] sm:$0x1]   ;;  %v473_v56 = vld [vmem:[%s817_s0 + $0x5] sm:$0x1]   ;;  %s599_s26 = smov 15   ;;  %s601_s3 = smov 12  }
  0x1a   :  { %92 = vrot.lane.b32.xlu1 %v433_v15, %s559_s20  ;;  %s597_s20 = smov 18   ;;  %v474_v57 = vld [vmem:[%s817_s0 + $0x2f] sm:$0x1]   ;;  %v475_v58 = vld [vmem:[%s817_s0 + $0x4] sm:$0x1]   ;;  %s603_s9 = smov 9  }
  0x1b   :  { %v476_v59 = vld [vmem:[%s817_s0 + $0x2e] sm:$0x1]   ;;  %v477_v60 = vld [vmem:[%s817_s0 + $0x3] sm:$0x1]   ;;  %v478_v61 = vld [vmem:[%s817_s0 + $0x2d] sm:$0x1]  }
  0x1c   :  { %86 = vrot.lane.b32.xlu0 %v432_v14, %s558_s19  ;;  %s587_s19 = smov 33   ;;  %v479_v62 = vld [vmem:[%s817_s0 + $0x2] sm:$0x1]   ;;  %vm28_vm4 = vcmask 1007552   ;;  %vm22_vm5 = vcmask 1032152   ;;  %s605_s15 = smov 6  }
  0x1d   :  { %v480_v1 = vld [vmem:[%s817_s0 + $0x2c] sm:$0x1]   ;;  %v481_v2 = vld [vmem:[%s817_s0 + $0x1] sm:$0x1]   ;;  %vm34_vm6 = vcmask 982952   ;;  %vm40_vm7 = vcmask 958352  }
  0x1e   :  { %104 = vrot.lane.b32.xlu1 %v435_v17, %s561_s28  ;;  %s570_s28 = smov 58   ;;  %s607_s21 = smov 3   ;;  %v482_v5 = vld [vmem:[%s817_s0 + $0x2b] sm:$0x1]   ;;  %vm46_vm8 = vcmask 933752   ;;  %vm52_vm9 = vcmask 909152  }
  0x1f   :  { %s608_s0 = smov 1   ;;  %vm58_vm10 = vcmask 884552   ;;  %vm64_vm11 = vcmask 859952   ;;  %vm70_vm12 = vcmask 835352   ;;  %vm76_vm13 = vcmask 810752  }
  0x20   :  { %98 = vrot.lane.b32.xlu0 %v434_v16, %s560_s27  ;;  %vm82_vm14 = vcmask 786152   ;;  %vm88_vm15 = vcmask 761552   ;;  %vm94_vm0 = vcmask 736952   ;;  %vm100_vm1 = vcmask 712352  }
  0x22   :  { %116 = vrot.lane.b32.xlu1 %v437_v20, %s563_s5  ;;  %s572_s5 = smov 55  }
  0x24   :  { %110 = vrot.lane.b32.xlu0 %v436_v19, %s562_s4 }
  0x26   :  { %128 = vrot.lane.b32.xlu1 %v439_v22, %s565_s11  ;;  %s574_s11 = smov 52  }
  0x28   :  { %122 = vrot.lane.b32.xlu0 %v438_v21, %s564_s10 }
  0x2a   :  { %140 = vrot.lane.b32.xlu1 %v441_v24, %s567_s17  ;;  %s576_s17 = smov 49  }
  0x2c   :  { %134 = vrot.lane.b32.xlu0 %v440_v23, %s566_s16 }
  0x2e   :  { %153 = vrot.lane.b32.xlu1 %v443_v26, %s569_s23  ;;  %s578_s23 = smov 46  }
  0x30   :  { %146 = vrot.lane.b32.xlu0 %v442_v25, %s568_s22 }
  0x32   :  { %166 = vrot.lane.b32.xlu1 %v445_v28, %s571_s29  ;;  %s580_s29 = smov 43  }
  0x34   :  { %159 = vrot.lane.b32.xlu0 %v444_v27, %s570_s28 }
  0x36   :  { %179 = vrot.lane.b32.xlu1 %v447_v30, %s573_s6  ;;  %s582_s6 = smov 40  }
  0x38   :  { %172 = vrot.lane.b32.xlu0 %v446_v29, %s572_s5 }
  0x3a   :  { %192 = vrot.lane.b32.xlu1 %v449_v32, %s575_s12  ;;  %s584_s12 = smov 37  }
  0x3c   :  { %185 = vrot.lane.b32.xlu0 %v448_v31, %s574_s11 }
  0x3e   :  { %205 = vrot.lane.b32.xlu1 %v451_v34, %s577_s18  ;;  %s586_s18 = smov 34  }
  0x40   :  { %198 = vrot.lane.b32.xlu0 %v450_v33, %s576_s17 }
  0x42   :  { %218 = vrot.lane.b32.xlu1 %v453_v36, %s579_s24  ;;  %s588_s24 = smov 31  }
  0x44   :  { %211 = vrot.lane.b32.xlu0 %v452_v35, %s578_s23 }
  0x46   :  { %231 = vrot.lane.b32.xlu1 %v455_v38, %s581_s30  ;;  %s590_s30 = smov 28  }
  0x48   :  { %224 = vrot.lane.b32.xlu0 %v454_v37, %s580_s29 }
  0x4a   :  { %244 = vrot.lane.b32.xlu1 %v457_v40, %s583_s7  ;;  %s592_s7 = smov 25  }
  0x4c   :  { %237 = vrot.lane.b32.xlu0 %v456_v39, %s582_s6 }
  0x4e   :  { %257 = vrot.lane.b32.xlu1 %v459_v42, %s585_s13  ;;  %s594_s13 = smov 22  }
  0x50   :  { %250 = vrot.lane.b32.xlu0 %v458_v41, %s584_s12 }
  0x52   :  { %270 = vrot.lane.b32.xlu1 %v461_v44, %s587_s19  ;;  %s596_s19 = smov 19  }
  0x54   :  { %263 = vrot.lane.b32.xlu0 %v460_v43, %s586_s18 }
  0x56   :  { %283 = vrot.lane.b32.xlu1 %v463_v46, %s589_s25  ;;  %s598_s25 = smov 16  }
  0x58   :  { %276 = vrot.lane.b32.xlu0 %v462_v45, %s588_s24 }
  0x5a   :  { %296 = vrot.lane.b32.xlu1 %v465_v48, %s591_s2  ;;  %s600_s2 = smov 13  }
  0x5c   :  { %289 = vrot.lane.b32.xlu0 %v464_v47, %s590_s30 }
  0x5e   :  { %309 = vrot.lane.b32.xlu1 %v467_v50, %s593_s8  ;;  %s602_s8 = smov 10  }
  0x60   :  { %302 = vrot.lane.b32.xlu0 %v466_v49, %s592_s7 }
  0x62   :  { %322 = vrot.lane.b32.xlu1 %v469_v52, %s595_s14  ;;  %s604_s14 = smov 7  }
  0x64   :  { %315 = vrot.lane.b32.xlu0 %v468_v51, %s594_s13 }
  0x66   :  { %335 = vrot.lane.b32.xlu1 %v471_v54, %s597_s20  ;;  %s606_s20 = smov 4  }
  0x68   :  { %328 = vrot.lane.b32.xlu0 %v470_v53, %s596_s19 }
  0x6a   :  { %348 = vrot.lane.b32.xlu1 %v473_v56, %s599_s26 }
  0x6c   :  { %341 = vrot.lane.b32.xlu0 %v472_v55, %s598_s25 }
  0x6e   :  { %361 = vrot.lane.b32.xlu1 %v475_v58, %s601_s3 }
  0x70   :  { %354 = vrot.lane.b32.xlu0 %v474_v57, %s600_s2 }
  0x72   :  { %374 = vrot.lane.b32.xlu1 %v477_v60, %s603_s9 }
  0x74   :  { %367 = vrot.lane.b32.xlu0 %v476_v59, %s602_s8  ;;  %v27_v0 = vpop.permute.xlu1 %26  }
  0x76   :  { %v12_v63 = vpop.permute.xlu0 %11   ;;  %387 = vrot.lane.b32.xlu1 %v479_v62, %s605_s15 }
  0x77   :  { %15 = vst.msk [vmem:[#allocation0 + $0x1] sm:$0x1] %vm13_vm2, %v12_v63   ;;  %vm106_vm2 = vcmask 687752  }
  0x78   :  { %17 = vst.msk [vmem:[#allocation0] sm:$0x1] %vm16_vm3, %v12_v63   ;;  %380 = vrot.lane.b32.xlu0 %v478_v61, %s604_s14  ;;  %v33_v4 = vpop.permute.xlu1 %32   ;;  %vm112_vm3 = vcmask 663152  }
  0x7a   :  { %v21_v3 = vpop.permute.xlu0 %20   ;;  %400 = vrot.lane.b32.xlu1 %v481_v2, %s607_s21 }
  0x7b   :  { %23 = vst.msk [vmem:[#allocation0] sm:$0x1] %vm22_vm5, %v21_v3   ;;  %vm124_vm5 = vcmask 613952  }
  0x7c   :  { %29 = vst.msk [vmem:[#allocation0] sm:$0x1] %vm28_vm4, %v27_v0   ;;  %393 = vrot.lane.b32.xlu0 %v480_v1, %s606_s20  ;;  %v45_v7 = vpop.permute.xlu1 %44   ;;  %vm118_vm4 = vcmask 638552  }
  0x7d   :  { %35 = vst.msk [vmem:[#allocation0] sm:$0x1] %vm34_vm6, %v33_v4   ;;  %vm130_vm6 = vcmask 589352  }
  0x7e   :  { %v39_v6 = vpop.permute.xlu0 %38  }
  0x7f   :  { %41 = vst.msk [vmem:[#allocation0] sm:$0x1] %vm40_vm7, %v39_v6   ;;  %vm136_vm7 = vcmask 564752  }
  0x80   :  { %406 = vrot.lane.b32.xlu0 %v482_v5, %s608_s0  ;;  %47 = vst.msk [vmem:[#allocation0] sm:$0x1] %vm46_vm8, %v45_v7   ;;  %v57_v9 = vpop.permute.xlu1 %56   ;;  %vm142_vm8 = vcmask 540152  }
  0x82   :  { %v51_v8 = vpop.permute.xlu0 %50  }
  0x83   :  { %53 = vst.msk [vmem:[#allocation0] sm:$0x1] %vm52_vm9, %v51_v8   ;;  %vm148_vm9 = vcmask 523752  }
  0x84   :  { %59 = vst.msk [vmem:[#allocation0] sm:$0x1] %vm58_vm10, %v57_v9   ;;  %v69_v11 = vpop.permute.xlu1 %68   ;;  %vm155_vm10 = vcmask 515552  }
  0x86   :  { %v63_v10 = vpop.permute.xlu0 %62  }
  0x87   :  { %65 = vst.msk [vmem:[#allocation0] sm:$0x1] %vm64_vm11, %v63_v10   ;;  %vm161_vm11 = vcmask 499152  }
  0x88   :  { %71 = vst.msk [vmem:[#allocation0] sm:$0x1] %vm70_vm12, %v69_v11   ;;  %v81_v13 = vpop.permute.xlu1 %80   ;;  %vm168_vm12 = vcmask 490952  }
  0x8a   :  { %v75_v12 = vpop.permute.xlu0 %74  }
  0x8b   :  { %77 = vst.msk [vmem:[#allocation0] sm:$0x1] %vm76_vm13, %v75_v12   ;;  %vm174_vm13 = vcmask 474552  }
  0x8c   :  { %83 = vst.msk [vmem:[#allocation0] sm:$0x1] %vm82_vm14, %v81_v13   ;;  %v93_v15 = vpop.permute.xlu1 %92   ;;  %vm181_vm14 = vcmask 466352  }
  0x8e   :  { %v87_v14 = vpop.permute.xlu0 %86  }
  0x8f   :  { %89 = vst.msk [vmem:[#allocation0] sm:$0x1] %vm88_vm15, %v87_v14   ;;  %vm187_vm15 = vcmask 449952  }
  0x90   :  { %95 = vst.msk [vmem:[#allocation0] sm:$0x1] %vm94_vm0, %v93_v15   ;;  %v105_v17 = vpop.permute.xlu1 %104   ;;  %vm194_vm0 = vcmask 441752  }
  0x92   :  { %v99_v16 = vpop.permute.xlu0 %98  }
  0x93   :  { %101 = vst.msk [vmem:[#allocation0] sm:$0x1] %vm100_vm1, %v99_v16   ;;  %vm200_vm1 = vcmask 425352  }
  0x94   :  { %107 = vst.msk [vmem:[#allocation0] sm:$0x1] %vm106_vm2, %v105_v17   ;;  %v117_v19 = vpop.permute.xlu1 %116   ;;  %vm207_vm2 = vcmask 417152  }
  0x96   :  { %v111_v18 = vpop.permute.xlu0 %110  }
  0x97   :  { %113 = vst.msk [vmem:[#allocation0] sm:$0x1] %vm112_vm3, %v111_v18   ;;  %vm213_vm3 = vcmask 400752  }
  0x98   :  { %119 = vst.msk [vmem:[#allocation0] sm:$0x1] %vm118_vm4, %v117_v19   ;;  %v129_v21 = vpop.permute.xlu1 %128   ;;  %vm220_vm4 = vcmask 392552  }
  0x9a   :  { %v123_v20 = vpop.permute.xlu0 %122  }
  0x9b   :  { %125 = vst.msk [vmem:[#allocation0] sm:$0x1] %vm124_vm5, %v123_v20   ;;  %vm226_vm5 = vcmask 376152  }
  0x9c   :  { %131 = vst.msk [vmem:[#allocation0] sm:$0x1] %vm130_vm6, %v129_v21   ;;  %v141_v23 = vpop.permute.xlu1 %140   ;;  %vm233_vm6 = vcmask 367952  }
  0x9e   :  { %v135_v22 = vpop.permute.xlu0 %134  }
  0x9f   :  { %137 = vst.msk [vmem:[#allocation0] sm:$0x1] %vm136_vm7, %v135_v22   ;;  %vm239_vm7 = vcmask 351552  }
  0xa0   :  { %143 = vst.msk [vmem:[#allocation0] sm:$0x1] %vm142_vm8, %v141_v23   ;;  %v154_v25 = vpop.permute.xlu1 %153   ;;  %vm246_vm8 = vcmask 343352  }
  0xa1   :  { %156 = vst.msk [vmem:[#allocation0] sm:$0x1] %vm155_vm10, %v154_v25   ;;  %vm259_vm10 = vcmask 318752  }
  0xa2   :  { %v147_v24 = vpop.permute.xlu0 %146  }
  0xa3   :  { %150 = vst.msk [vmem:[#allocation0 + $0x1] sm:$0x1] %vm148_vm9, %v147_v24   ;;  %vm252_vm9 = vcmask 326952  }
  0xa4   :  { %v167_v27 = vpop.permute.xlu1 %166  }
  0xa5   :  { %169 = vst.msk [vmem:[#allocation0] sm:$0x1] %vm168_vm12, %v167_v27   ;;  %vm272_vm12 = vcmask 294152  }
  0xa6   :  { %v160_v26 = vpop.permute.xlu0 %159  }
  0xa7   :  { %163 = vst.msk [vmem:[#allocation0 + $0x1] sm:$0x1] %vm161_vm11, %v160_v26   ;;  %vm265_vm11 = vcmask 302352  }
  0xa8   :  { %v180_v29 = vpop.permute.xlu1 %179  }
  0xa9   :  { %182 = vst.msk [vmem:[#allocation0] sm:$0x1] %vm181_vm14, %v180_v29   ;;  %vm285_vm14 = vcmask 269552  }
  0xaa   :  { %v173_v28 = vpop.permute.xlu0 %172  }
  0xab   :  { %176 = vst.msk [vmem:[#allocation0 + $0x1] sm:$0x1] %vm174_vm13, %v173_v28   ;;  %vm278_vm13 = vcmask 277752  }
  0xac   :  { %v193_v31 = vpop.permute.xlu1 %192  }
  0xad   :  { %195 = vst.msk [vmem:[#allocation0] sm:$0x1] %vm194_vm0, %v193_v31   ;;  %vm298_vm0 = vcmask 244952  }
  0xae   :  { %v186_v30 = vpop.permute.xlu0 %185  }
  0xaf   :  { %189 = vst.msk [vmem:[#allocation0 + $0x1] sm:$0x1] %vm187_vm15, %v186_v30   ;;  %vm291_vm15 = vcmask 253152  }
  0xb0   :  { %v206_v33 = vpop.permute.xlu1 %205  }
  0xb1   :  { %208 = vst.msk [vmem:[#allocation0] sm:$0x1] %vm207_vm2, %v206_v33   ;;  %vm311_vm2 = vcmask 220352  }
  0xb2   :  { %v199_v32 = vpop.permute.xlu0 %198  }
  0xb3   :  { %202 = vst.msk [vmem:[#allocation0 + $0x1] sm:$0x1] %vm200_vm1, %v199_v32   ;;  %vm304_vm1 = vcmask 228552  }
  0xb4   :  { %v219_v35 = vpop.permute.xlu1 %218  }
  0xb5   :  { %221 = vst.msk [vmem:[#allocation0] sm:$0x1] %vm220_vm4, %v219_v35   ;;  %vm324_vm4 = vcmask 195752  }
  0xb6   :  { %v212_v34 = vpop.permute.xlu0 %211  }
  0xb7   :  { %215 = vst.msk [vmem:[#allocation0 + $0x1] sm:$0x1] %vm213_vm3, %v212_v34   ;;  %vm317_vm3 = vcmask 203952  }
  0xb8   :  { %v232_v37 = vpop.permute.xlu1 %231  }
  0xb9   :  { %234 = vst.msk [vmem:[#allocation0] sm:$0x1] %vm233_vm6, %v232_v37   ;;  %vm337_vm6 = vcmask 171152  }
  0xba   :  { %v225_v36 = vpop.permute.xlu0 %224  }
  0xbb   :  { %228 = vst.msk [vmem:[#allocation0 + $0x1] sm:$0x1] %vm226_vm5, %v225_v36   ;;  %vm330_vm5 = vcmask 179352  }
  0xbc   :  { %v245_v39 = vpop.permute.xlu1 %244  }
  0xbd   :  { %247 = vst.msk [vmem:[#allocation0] sm:$0x1] %vm246_vm8, %v245_v39   ;;  %vm350_vm8 = vcmask 146552  }
  0xbe   :  { %v238_v38 = vpop.permute.xlu0 %237  }
  0xbf   :  { %241 = vst.msk [vmem:[#allocation0 + $0x1] sm:$0x1] %vm239_vm7, %v238_v38   ;;  %vm343_vm7 = vcmask 154752  }
  0xc0   :  { %v258_v41 = vpop.permute.xlu1 %257  }
  0xc1   :  { %260 = vst.msk [vmem:[#allocation0] sm:$0x1] %vm259_vm10, %v258_v41   ;;  %vm363_vm10 = vcmask 121952  }
  0xc2   :  { %v251_v40 = vpop.permute.xlu0 %250  }
  0xc3   :  { %254 = vst.msk [vmem:[#allocation0 + $0x1] sm:$0x1] %vm252_vm9, %v251_v40   ;;  %vm356_vm9 = vcmask 130152  }
  0xc4   :  { %v271_v43 = vpop.permute.xlu1 %270  }
  0xc5   :  { %273 = vst.msk [vmem:[#allocation0] sm:$0x1] %vm272_vm12, %v271_v43   ;;  %vm376_vm12 = vcmask 97352  }
  0xc6   :  { %v264_v42 = vpop.permute.xlu0 %263  }
  0xc7   :  { %267 = vst.msk [vmem:[#allocation0 + $0x1] sm:$0x1] %vm265_vm11, %v264_v42   ;;  %vm369_vm11 = vcmask 105552  }
  0xc8   :  { %v284_v45 = vpop.permute.xlu1 %283  }
  0xc9   :  { %286 = vst.msk [vmem:[#allocation0] sm:$0x1] %vm285_vm14, %v284_v45   ;;  %vm389_vm14 = vcmask 72752  }
  0xca   :  { %v277_v44 = vpop.permute.xlu0 %276  }
  0xcb   :  { %280 = vst.msk [vmem:[#allocation0 + $0x1] sm:$0x1] %vm278_vm13, %v277_v44   ;;  %vm382_vm13 = vcmask 80952  }
  0xcc   :  { %v297_v47 = vpop.permute.xlu1 %296  }
  0xcd   :  { %299 = vst.msk [vmem:[#allocation0] sm:$0x1] %vm298_vm0, %v297_v47   ;;  %vm402_vm0 = vcmask 48152  }
  0xce   :  { %v290_v46 = vpop.permute.xlu0 %289  }
  0xcf   :  { %293 = vst.msk [vmem:[#allocation0 + $0x1] sm:$0x1] %vm291_vm15, %v290_v46   ;;  %vm395_vm15 = vcmask 56352  }
  0xd0   :  { %v310_v49 = vpop.permute.xlu1 %309  }
  0xd1   :  { %312 = vst.msk [vmem:[#allocation0] sm:$0x1] %vm311_vm2, %v310_v49  }
  0xd2   :  { %v303_v48 = vpop.permute.xlu0 %302  }
  0xd3   :  { %306 = vst.msk [vmem:[#allocation0 + $0x1] sm:$0x1] %vm304_vm1, %v303_v48   ;;  %vm408_vm1 = vcmask 31752  }
  0xd4   :  { %v323_v51 = vpop.permute.xlu1 %322  }
  0xd5   :  { %325 = vst.msk [vmem:[#allocation0] sm:$0x1] %vm324_vm4, %v323_v51  }
  0xd6   :  { %v316_v50 = vpop.permute.xlu0 %315  }
  0xd7   :  { %319 = vst.msk [vmem:[#allocation0 + $0x1] sm:$0x1] %vm317_vm3, %v316_v50  }
  0xd8   :  { %v336_v53 = vpop.permute.xlu1 %335  }
  0xd9   :  { %338 = vst.msk [vmem:[#allocation0] sm:$0x1] %vm337_vm6, %v336_v53  }
  0xda   :  { %v329_v52 = vpop.permute.xlu0 %328  }
  0xdb   :  { %332 = vst.msk [vmem:[#allocation0 + $0x1] sm:$0x1] %vm330_vm5, %v329_v52  }
  0xdc   :  { %v349_v55 = vpop.permute.xlu1 %348  }
  0xdd   :  { %351 = vst.msk [vmem:[#allocation0] sm:$0x1] %vm350_vm8, %v349_v55  }
  0xde   :  { %v342_v54 = vpop.permute.xlu0 %341  }
  0xdf   :  { %345 = vst.msk [vmem:[#allocation0 + $0x1] sm:$0x1] %vm343_vm7, %v342_v54  }
  0xe0   :  { %v362_v57 = vpop.permute.xlu1 %361  }
  0xe1   :  { %364 = vst.msk [vmem:[#allocation0] sm:$0x1] %vm363_vm10, %v362_v57  }
  0xe2   :  { %v355_v56 = vpop.permute.xlu0 %354  }
  0xe3   :  { %358 = vst.msk [vmem:[#allocation0 + $0x1] sm:$0x1] %vm356_vm9, %v355_v56  }
  0xe4   :  { %v375_v59 = vpop.permute.xlu1 %374  }
  0xe5   :  { %377 = vst.msk [vmem:[#allocation0] sm:$0x1] %vm376_vm12, %v375_v59  }
  0xe6   :  { %v368_v58 = vpop.permute.xlu0 %367  }
  0xe7   :  { %371 = vst.msk [vmem:[#allocation0 + $0x1] sm:$0x1] %vm369_vm11, %v368_v58  }
  0xe8   :  { %v388_v61 = vpop.permute.xlu1 %387  }
  0xe9   :  { %390 = vst.msk [vmem:[#allocation0] sm:$0x1] %vm389_vm14, %v388_v61  }
  0xea   :  { %v381_v60 = vpop.permute.xlu0 %380  }
  0xeb   :  { %384 = vst.msk [vmem:[#allocation0 + $0x1] sm:$0x1] %vm382_vm13, %v381_v60  }
  0xec   :  { %v401_v63 = vpop.permute.xlu1 %400  }
  0xed   :  { %403 = vst.msk [vmem:[#allocation0] sm:$0x1] %vm402_vm0, %v401_v63  }
  0xee   :  { %v394_v62 = vpop.permute.xlu0 %393  }
  0xef   :  { %397 = vst.msk [vmem:[#allocation0 + $0x1] sm:$0x1] %vm395_vm15, %v394_v62  }
  0xf2   :  { %v407_v0 = vpop.permute.xlu0 %406  }
  0xf3   :  { %410 = vst.msk [vmem:[#allocation0 + $0x1] sm:$0x1] %vm408_vm1, %v407_v0  }
  0xfa   :  { %v415_v1 = vld [vmem:[#allocation0] sm:$0x3] }
  0xfb   :  { %418 = vst [vmem:[%s818_s1] sm:$0x3] %v415_v1 }

// kernel: mul.12
= control target key start
LH: loop header
LB: loop body
LE: loop exit
PB: predicated region body
PF: predicated region fallthrough
CT: control target
= control target key end

     0   :  { %s34_s0 = inlined_call_operand.vmem [shape: f32[192], index: 0, kind: input, shape index: {}]   ;;  %s35_s1 = inlined_call_operand.vmem [shape: f32[192], index: 1, kind: input, shape index: {}]   ;;  %s36_s2 = inlined_call_operand.vmem [shape: f32[192], index: 2, kind: output, shape index: {}]  }
   0x1   :  { %v3_v0 = vld [vmem:[%s34_s0] sm:$0x3] }
   0x2   :  { %v4_v1 = vld [vmem:[%s35_s1] sm:$0x3] }
   0x3   :  { %v7_v2 = vmul.f32 %v4_v1, %v3_v0 }
   0x5   :  { %9 = vst [vmem:[%s36_s2] sm:$0x3] %v7_v2 }

// kernel: sub.1
= control target key start
LH: loop header
LB: loop body
LE: loop exit
PB: predicated region body
PF: predicated region fallthrough
CT: control target
= control target key end

     0   :  { %s34_s0 = inlined_call_operand.vmem [shape: f32[256], index: 0, kind: input, shape index: {}]   ;;  %s35_s1 = inlined_call_operand.vmem [shape: f32[256], index: 1, kind: input, shape index: {}]   ;;  %s36_s2 = inlined_call_operand.vmem [shape: f32[256], index: 2, kind: output, shape index: {}]  }
   0x1   :  { %v3_v0 = vld [vmem:[%s34_s0] sm:$0x3] }
   0x2   :  { %v4_v1 = vld [vmem:[%s35_s1] sm:$0x3] }
   0x3   :  { %v7_v2 = vsub.f32 %v3_v0, %v4_v1 }
   0x5   :  { %9 = vst [vmem:[%s36_s2] sm:$0x3] %v7_v2 }

// kernel: _sam_forward_impl.1
= control target key start
LH: loop header
LB: loop body
LE: loop exit
PB: predicated region body
PF: predicated region fallthrough
CT: control target
= control target key end

     0   :  { %s7486_s6 = smov 1   ;;  %s7487_s10 = smov 2   ;;  %s8664_s0 = inlined_call_operand.smem [shape: u32[36], index: -1, kind: input, shape index: {}] }
   0x1   :  { %s7532_s5 = sld [smem:[%s8664_s0]]   ;;  %s7488_s14 = smov 3  }
   0x2   :  { %s7537_s9 = sld [smem:[%s8664_s0 + %s7486_s6]]   ;;  %s7489_s18 = smov 4  }
   0x3   :  { %s7542_s13 = sld [smem:[%s8664_s0 + %s7487_s10]]   ;;  %s7490_s22 = smov 5  }
   0x4   :  { %s7547_s17 = sld [smem:[%s8664_s0 + %s7488_s14]]   ;;  %s7491_s26 = smov 6  }
   0x5   :  { %s7552_s21 = sld [smem:[%s8664_s0 + %s7489_s18]]   ;;  %s7492_s30 = smov 7  }
   0x6   :  { %s7557_s25 = sld [smem:[%s8664_s0 + %s7490_s22]]   ;;  %s7493_s4 = smov 8  }
   0x7   :  { %s7562_s29 = sld [smem:[%s8664_s0 + %s7491_s26]]   ;;  %s7494_s10 = smov 9  }
   0x8   :  { %s7567_s3 = sld [smem:[%s8664_s0 + %s7492_s30]]   ;;  %s7495_s15 = smov 10  }
   0x9   :  { %s7572_s8 = sld [smem:[%s8664_s0 + %s7493_s4]]   ;;  %s7496_s20 = smov 11  }
   0xa   :  { %s7577_s14 = sld [smem:[%s8664_s0 + %s7494_s10]]   ;;  %s7497_s26 = smov 12  }
   0xb   :  { %s7582_s19 = sld [smem:[%s8664_s0 + %s7495_s15]]   ;;  %s7498_s1 = smov 13  }
   0xc   :  { %s7587_s24 = sld [smem:[%s8664_s0 + %s7496_s20]]   ;;  %s7499_s7 = smov 14  }
   0xd   :  { %s7592_s30 = sld [smem:[%s8664_s0 + %s7497_s26]]   ;;  %s7500_s15 = smov 15  }
   0xe   :  { %s7597_s6 = sld [smem:[%s8664_s0 + %s7498_s1]]   ;;  %s7501_s22 = smov 16  }
   0xf   :  { %s7602_s12 = sld [smem:[%s8664_s0 + %s7499_s7]]   ;;  %s7502_s28 = smov 17  }
  0x10   :  { %s7607_s20 = sld [smem:[%s8664_s0 + %s7500_s15]]   ;;  %s7503_s7 = smov 18  }
  0x11   :  { %s7612_s27 = sld [smem:[%s8664_s0 + %s7501_s22]]   ;;  %s7504_s15 = smov 19  }
  0x12   :  { %s7617_s4 = sld [smem:[%s8664_s0 + %s7502_s28]]   ;;  %s7505_s22 = smov 20  }
  0x13   :  { %s7506_s28 = smov 21  }
  0x14   :  { %8672 = sst [smem:[#allocation4_spill]] %s7597_s6 }
  0x15   :  { %s7622_s6 = sld [smem:[%s8664_s0 + %s7503_s7]]   ;;  %s7507_s7 = smov 22  }
  0x16   :  { %8673 = sst [smem:[#allocation5_spill]] %s7607_s20 }
  0x17   :  { %8674 = sst [smem:[#allocation6_spill]] %s7612_s27 }
  0x18   :  { %8675 = sst [smem:[#allocation7_spill]] %s7617_s4 }
  0x19   :  { %s7627_s20 = sld [smem:[%s8664_s0 + %s7504_s15]]   ;;  %s7508_s15 = smov 23  }
  0x1a   :  { %s7632_s27 = sld [smem:[%s8664_s0 + %s7505_s22]]   ;;  %s7509_s22 = smov 24  }
  0x1b   :  { %8676 = sst [smem:[#allocation8_spill]] %s7622_s6 }
  0x1c   :  { %s7637_s4 = sld [smem:[%s8664_s0 + %s7506_s28]]   ;;  %s7510_s28 = smov 25  }
  0x1d   :  { %s7642_s6 = sld [smem:[%s8664_s0 + %s7507_s7]]   ;;  %s7511_s7 = smov 26  }
  0x1f   :  { %8677 = sst [smem:[#allocation9_spill]] %s7627_s20 }
  0x20   :  { %8678 = sst [smem:[#allocation10_spill]] %s7632_s27 }
  0x21   :  { %s7647_s20 = sld [smem:[%s8664_s0 + %s7508_s15]]   ;;  %s7512_s15 = smov 27  }
  0x22   :  { %8679 = sst [smem:[#allocation11_spill]] %s7637_s4 }
  0x23   :  { %8680 = sst [smem:[#allocation12_spill]] %s7642_s6 }
  0x24   :  { %s7652_s27 = sld [smem:[%s8664_s0 + %s7509_s22]]   ;;  %s7513_s22 = smov 28  }
  0x25   :  { %s7657_s4 = sld [smem:[%s8664_s0 + %s7510_s28]]   ;;  %s7514_s28 = smov 29  }
  0x26   :  { %s7662_s6 = sld [smem:[%s8664_s0 + %s7511_s7]]   ;;  %s7515_s7 = smov 30  }
  0x27   :  { %8681 = sst [smem:[#allocation13_spill]] %s7647_s20 }
  0x28   :  { %s7667_s20 = sld [smem:[%s8664_s0 + %s7512_s15]]   ;;  %s7516_s15 = smov 31  }
  0x2a   :  { %8682 = sst [smem:[#allocation14_spill]] %s7652_s27 }
  0x2b   :  { %8683 = sst [smem:[#allocation15_spill]] %s7657_s4 }
  0x2c   :  { %8684 = sst [smem:[#allocation16_spill]] %s7662_s6 }
  0x2d   :  { %s7672_s27 = sld [smem:[%s8664_s0 + %s7513_s22]]   ;;  %s7517_s22 = smov 32  }
  0x2e   :  { %8685 = sst [smem:[#allocation17_spill]] %s7667_s20 }
  0x2f   :  { %s7677_s4 = sld [smem:[%s8664_s0 + %s7514_s28]]   ;;  %s7518_s28 = smov 33  }
  0x30   :  { %s7682_s6 = sld [smem:[%s8664_s0 + %s7515_s7]]   ;;  %s7519_s7 = smov 34  }
  0x31   :  { %s7687_s20 = sld [smem:[%s8664_s0 + %s7516_s15]]   ;;  %s7520_s15 = smov 35  }
  0x33   :  { %8686 = sst [smem:[#allocation18_spill]] %s7672_s27 }
  0x34   :  { %s7692_s27 = sld [smem:[%s8664_s0 + %s7517_s22]]   ;;  %s7709_s22 = smov 0  }
  0x35   :  { %8687 = sst [smem:[#allocation19_spill]] %s7677_s4 }
  0x36   :  { %8688 = sst [smem:[#allocation20_spill]] %s7682_s6 }
  0x37   :  { %8689 = sst [smem:[#allocation21_spill]] %s7687_s20 }
  0x38   :  { %s7697_s4 = sld [smem:[%s8664_s0 + %s7518_s28]]  }
  0x39   :  { %s7702_s6 = sld [smem:[%s8664_s0 + %s7519_s7]]  }
  0x3a   :  { %s7707_s20 = sld [smem:[%s8664_s0 + %s7520_s15]]  }
  0x3b LB: > { %s6140_s23 = sadd.s32 4294967295, %s7484_s22   ;;  %p6144_p0 = scmp.ge.s32.totalorder %s7484_s22, 1  ;;  %s7484_s22 = sphi %s7709_s22, %s81_s22  }
  0x3c   : > { %p973_p1 = scmp.lt.s32.totalorder %s7484_s22, 3 }
  0x3e   : > { %p974_p2 = pnand %p6144_p0, %p973_p1 }
  0x3f   : > { %p1061_p3 = scmp.lt.s32.totalorder (!%p974_p2), %s6140_s23, 1  ;;  %s8690_s28 = sld [smem:[#allocation6_spill]] (!%p974_p2) }
  0x40   : > { %977 = sbr.rel (%p974_p2) target bundleno = 5457 (0x1551), region = 160  ;;  %s8691_s1 = sld [smem:[#allocation4_spill]] (!%p974_p2) }
  0x41   : > { %s8692_s2 = sld [smem:[#allocation5_spill]] (!%p974_p2) }
  0x42   : > { %s8693_s7 = sld [smem:[#allocation7_spill]] (!%p974_p2) }
  0x43   : > { %s8694_s10 = sld [smem:[#allocation11_spill]] (!%p974_p2) }
  0x44   : > { %s8695_s11 = sld [smem:[#allocation13_spill]] (!%p974_p2) }
  0x45   : > { %v6946_v0 = vld [vmem:[%s7542_s13 + $0x74] ss:$8 sps:$4 sm:$0xff]   ;;  %v6948_v1 = vld [vmem:[%s7542_s13 + $0x70] ss:$8 sps:$4 sm:$0xff]   ;;  %v6949_v2 = vld [vmem:[%s7542_s13 + $0x64] ss:$8 sps:$4 sm:$0xff]   ;;  %v1104_v30 = vlaneseq }
  0x46   : > { %1238 = vmatprep.subr.bf16.mxu0 %v6946_v0  ;;  %v6951_v3 = vld [vmem:[%s7542_s13 + $0x60] ss:$8 sps:$4 sm:$0xff]   ;;  %v6952_v4 = vld [vmem:[%s7542_s13 + $0x54] ss:$8 sps:$4 sm:$0xff]   ;;  %s8709_s23 = smov (!%p1061_p3, %s6140_s23), 1  ;;  %vm1234_vm0 = vcmask 523264  }
  0x47   : > { %1239 = vmatpush1.bf16.msra.mxu0 %v6948_v1  ;;  %v6954_v5 = vld [vmem:[%s7542_s13 + $0x50] ss:$8 sps:$4 sm:$0xff]   ;;  %v6955_v6 = vld [vmem:[%s7542_s13 + $0x44] ss:$8 sps:$4 sm:$0xff]   ;;  %s6636_s0 = sshll.u32 %s8709_s23, 5  ;;  %v7751_v31 = vshrl.u32 %v1104_v30, 7 }
  0x48   : > { %1240 = vmatprep.subr.bf16.mxu0 %v6949_v2  ;;  %v6957_v7 = vld [vmem:[%s7542_s13 + $0x40] ss:$8 sps:$4 sm:$0xff]   ;;  %v6958_v8 = vld [vmem:[%s7542_s13 + $0x34] ss:$8 sps:$4 sm:$0xff]   ;;  %s7730_s26 = scalar_lea.vmem %s7532_s5, %s6636_s0  ;;  %v6960_v9 = vld [vmem:[%s7542_s13 + $0x30] ss:$8 sps:$4 sm:$0xff]  }
  0x49   : > { %v6961_v10 = vld [vmem:[%s7542_s13 + $0x24] ss:$8 sps:$4 sm:$0xff]   ;;  %v1075_v12 = vld [vmem:[%s7730_s26 + $0x18] sm:$0xff]  ;;  %v6963_v13 = vld [vmem:[%s7542_s13 + $0x20] ss:$8 sps:$4 sm:$0xff]   ;;  %v7754_v32 = vsub.s32 0, %v7751_v31 }
  0x4a   : > { %v1073_v11 = vld [vmem:[%s7730_s26 + $0x8] sm:$0xff]  ;;  %v6964_v15 = vld [vmem:[%s7542_s13 + $0x14] ss:$8 sps:$4 sm:$0xff]   ;;  %v6966_v16 = vld [vmem:[%s7542_s13 + $0x10] ss:$8 sps:$4 sm:$0xff]   ;;  %v7758_v34 = vsub.s32 1, %v7751_v31 }
  0x4b   : > { %1241 = vmatpush1.bf16.msra.mxu0 %v6951_v3  ;;  %v1101_v14 = vpack.c.bf16 %v1075_v12, %v1073_v11  ;;  %v6967_v17 = vld [vmem:[%s7542_s13 + $0x4] ss:$8 sps:$4 sm:$0xff]   ;;  %v6969_v18 = vld [vmem:[%s7542_s13] ss:$8 sps:$4 sm:$0xff]   ;;  %v6970_v19 = vld [vmem:[%s7542_s13 + $0xb4] ss:$8 sps:$4 sm:$0xff]  }
  0x4c   : > { %1242 = vmatprep.subr.bf16.mxu0 %v6952_v4  ;;  %v6972_v20 = vld [vmem:[%s7542_s13 + $0xb0] ss:$8 sps:$4 sm:$0xff]   ;;  %v6973_v21 = vld [vmem:[%s7542_s13 + $0xa4] ss:$8 sps:$4 sm:$0xff]   ;;  %v6975_v22 = vld [vmem:[%s7542_s13 + $0xa0] ss:$8 sps:$4 sm:$0xff]  }
  0x4d   : > { %6173 = vmatprep.mubr.msk.bf16.mxu0 %vm1234_vm0, %v1101_v14  ;;  %v6976_v23 = vld [vmem:[%s7542_s13 + $0x94] ss:$8 sps:$4 sm:$0xff]   ;;  %v6978_v24 = vld [vmem:[%s7542_s13 + $0x90] ss:$8 sps:$4 sm:$0xff]   ;;  %v6979_v25 = vld [vmem:[%s7542_s13 + $0x84] ss:$8 sps:$4 sm:$0xff]  }
  0x4e   : > { %v6981_v26 = vld [vmem:[%s7542_s13 + $0x80] ss:$8 sps:$4 sm:$0xff]   ;;  %v1074_v28 = vld [vmem:[%s7730_s26 + $0x10] sm:$0xff]  ;;  %v1284_v49 = vld [vmem:[%s7537_s9 + $0x18] sm:$0xff]  ;;  %vm7522_vm1 = vmmov 0   ;;  %vm2138_vm2 = vcmask 130048  }
  0x4f   : > { %1243 = vmatpush1.bf16.msra.mxu0 %v6954_v5  ;;  %v1072_v27 = vld [vmem:[%s7730_s26] sm:$0xff]  ;;  %v1282_v41 = vld [vmem:[%s7537_s9 + $0x8] sm:$0xff]  ;;  %v1283_v47 = vld [vmem:[%s7537_s9 + $0x10] sm:$0xff]  ;;  %s8696_s15 = sld [smem:[#allocation10_spill]]  ;;  %vm4309_vm3 = vcmask 126976  }
  0x50   : > { %1244 = vmatprep.subr.bf16.mxu0 %v6955_v6  ;;  %v1100_v29 = vpack.c.bf16 %v1074_v28, %v1072_v27  ;;  %v1102_v33 = vld [vmem:[%s7547_s17] sm:$0x3]  ;;  %v6982_v55 = vld [vmem:[%s7562_s29 + $0x154] ss:$24 sps:$4 sm:$0xff]   ;;  %v6984_v56 = vld [vmem:[%s7562_s29 + $0x150] ss:$24 sps:$4 sm:$0xff]  }
  0x51   : > { %v1107_v35 = vrot.slane %v1102_v33, %v7754_v32  ;;  %v1111_v36 = vrot.slane %v1102_v33, %v7758_v34  ;;  %v1281_v39 = vld [vmem:[%s7537_s9] sm:$0xff]  ;;  %v6985_v57 = vld [vmem:[%s7562_s29 + $0x158] ss:$24 sps:$4 sm:$0xff]   ;;  %v6987_v58 = vld [vmem:[%s7562_s29 + $0x15c] ss:$24 sps:$4 sm:$0xff]   ;;  %1964 = vmatprep.subr.bf16.mxu1 %v6982_v55  ;;  %s8697_s16 = sld [smem:[#allocation15_spill]] }
  0x52   : > { %v6988_v59 = vld [vmem:[%s7562_s29 + $0x124] ss:$24 sps:$4 sm:$0xff]   ;;  %1965 = vmatpush1.bf16.msra.mxu1 %v6984_v56  ;;  %v6990_v61 = vld [vmem:[%s7562_s29 + $0x120] ss:$24 sps:$4 sm:$0xff]   ;;  %v6994_v63 = vld [vmem:[%s7562_s29 + $0xf4] ss:$24 sps:$4 sm:$0xff]  }
  0x53   : > { %1245 = vmatpush1.bf16.msra.mxu0 %v6957_v7  ;;  %v6993_v60 = vld [vmem:[%s7562_s29 + $0x12c] ss:$24 sps:$4 sm:$0xff]   ;;  %1966 = vmatprep.subr.bf16.mxu1 %v6988_v59  ;;  %v6991_v62 = vld [vmem:[%s7562_s29 + $0x128] ss:$24 sps:$4 sm:$0xff]   ;;  %v6999_v0 = vld [vmem:[%s7562_s29 + $0xfc] ss:$24 sps:$4 sm:$0xff]  }
  0x54   : > { %1246 = vmatprep.subr.bf16.mxu0 %v6958_v8  ;;  %v6996_v1 = vld [vmem:[%s7562_s29 + $0xf0] ss:$24 sps:$4 sm:$0xff]   ;;  %v7000_v3 = vld [vmem:[%s7562_s29 + $0xc4] ss:$24 sps:$4 sm:$0xff]   ;;  %v7002_v5 = vld [vmem:[%s7562_s29 + $0xc0] ss:$24 sps:$4 sm:$0xff]  }
  0x55   : > { %v6997_v2 = vld [vmem:[%s7562_s29 + $0xf8] ss:$24 sps:$4 sm:$0xff]   ;;  %v7005_v4 = vld [vmem:[%s7562_s29 + $0xcc] ss:$24 sps:$4 sm:$0xff]   ;;  %v7003_v6 = vld [vmem:[%s7562_s29 + $0xc8] ss:$24 sps:$4 sm:$0xff]  }
  0x56   : > { %1967 = vmatpush1.bf16.msra.mxu1 %v6990_v61  ;;  %v7006_v7 = vld [vmem:[%s7562_s29 + $0x94] ss:$24 sps:$4 sm:$0xff]   ;;  %v7012_v11 = vld [vmem:[%s7562_s29 + $0x64] ss:$24 sps:$4 sm:$0xff]   ;;  %v7015_v14 = vld [vmem:[%s7562_s29 + $0x68] ss:$24 sps:$4 sm:$0xff]  }
  0x57   : > { %1247 = vmatpush1.bf16.msra.mxu0 %v6960_v9  ;;  %1968 = vmatprep.subr.bf16.mxu1 %v6994_v63  ;;  %v7011_v8 = vld [vmem:[%s7562_s29 + $0x9c] ss:$24 sps:$4 sm:$0xff]   ;;  %v7008_v9 = vld [vmem:[%s7562_s29 + $0x90] ss:$24 sps:$4 sm:$0xff]   ;;  %v7017_v12 = vld [vmem:[%s7562_s29 + $0x6c] ss:$24 sps:$4 sm:$0xff]  }
  0x58   : > { %1248 = vmatprep.subr.bf16.mxu0 %v6961_v10  ;;  %v7009_v10 = vld [vmem:[%s7562_s29 + $0x98] ss:$24 sps:$4 sm:$0xff]   ;;  %v7048_v56 = vld [vmem:[%s7562_s29 + $0x244] ss:$24 sps:$4 sm:$0xff]   ;;  %s8698_s18 = sld [smem:[#allocation8_spill]] }
  0x59   : > { %v7045_v55 = vld [vmem:[%s7562_s29 + $0x278] ss:$24 sps:$4 sm:$0xff]   ;;  %v7053_v59 = vld [vmem:[%s7562_s29 + $0x24c] ss:$24 sps:$4 sm:$0xff]   ;;  %v7059_v61 = vld [vmem:[%s7562_s29 + $0x21c] ss:$24 sps:$4 sm:$0xff]  }
  0x5a   : > { %1969 = vmatpush1.bf16.msra.mxu1 %v6996_v1  ;;  %v7057_v63 = vld [vmem:[%s7562_s29 + $0x218] ss:$24 sps:$4 sm:$0xff]   ;;  %v7065_v1 = vld [vmem:[%s7562_s29 + $0x1ec] ss:$24 sps:$4 sm:$0xff]   ;;  %s8699_s0 = sld [smem:[#allocation9_spill]] }
  0x5b   : > { %1249 = vmatpush1.bf16.msra.mxu0 %v6963_v13  ;;  %1970 = vmatprep.subr.bf16.mxu1 %v7000_v3  ;;  %v7014_v13 = vld [vmem:[%s7562_s29 + $0x60] ss:$24 sps:$4 sm:$0xff]   ;;  %s8700_s26 = sld [smem:[#allocation14_spill]] }
  0x5c   : > { %1250 = vmatprep.subr.bf16.mxu0 %v6964_v15  ;;  %v7018_v15 = vld [vmem:[%s7562_s29 + $0x34] ss:$24 sps:$4 sm:$0xff]   ;;  %v7063_v3 = vld [vmem:[%s7562_s29 + $0x1e8] ss:$24 sps:$4 sm:$0xff]  }
  0x5e   : > { %1971 = vmatpush1.bf16.msra.mxu1 %v7002_v5  ;;  %v7071_v5 = vld [vmem:[%s7562_s29 + $0x1bc] ss:$24 sps:$4 sm:$0xff]  }
  0x5f   : > { %1251 = vmatpush1.bf16.msra.mxu0 %v6966_v16  ;;  %1972 = vmatprep.subr.bf16.mxu1 %v7006_v7  ;;  %v7023_v16 = vld [vmem:[%s7562_s29 + $0x3c] ss:$24 sps:$4 sm:$0xff]   ;;  %v7069_v7 = vld [vmem:[%s7562_s29 + $0x1b8] ss:$24 sps:$4 sm:$0xff]  }
  0x60   : > { %1252 = vmatprep.subr.bf16.mxu0 %v6967_v17  ;;  %v7020_v17 = vld [vmem:[%s7562_s29 + $0x30] ss:$24 sps:$4 sm:$0xff]  }
  0x62   : > { %1973 = vmatpush1.bf16.msra.mxu1 %v7008_v9  ;;  %v7077_v9 = vld [vmem:[%s7562_s29 + $0x18c] ss:$24 sps:$4 sm:$0xff]  }
  0x63   : > { %1253 = vmatpush1.bf16.msra.mxu0 %v6969_v18  ;;  %1974 = vmatprep.subr.bf16.mxu1 %v7012_v11  ;;  %v7021_v18 = vld [vmem:[%s7562_s29 + $0x38] ss:$24 sps:$4 sm:$0xff]   ;;  %v7075_v11 = vld [vmem:[%s7562_s29 + $0x188] ss:$24 sps:$4 sm:$0xff]  }
  0x64   : > { %1262 = vmatprep.subr.bf16.mxu0 %v6970_v19  ;;  %v7024_v19 = vld [vmem:[%s7562_s29 + $0x4] ss:$24 sps:$4 sm:$0xff]  }
  0x66   : > { %1975 = vmatpush1.bf16.msra.mxu1 %v7014_v13 }
  0x67   : > { %1263 = vmatpush2.bf16.msra.mxu0 %v6972_v20  ;;  %1976 = vmatprep.subr.bf16.mxu1 %v7018_v15  ;;  %v7029_v20 = vld [vmem:[%s7562_s29 + $0xc] ss:$24 sps:$4 sm:$0xff]  }
  0x68   : > { %1264 = vmatprep.subr.bf16.mxu0 %v6973_v21  ;;  %v7026_v21 = vld [vmem:[%s7562_s29] ss:$24 sps:$4 sm:$0xff]  }
  0x6a   : > { %1977 = vmatpush1.bf16.msra.mxu1 %v7020_v17 }
  0x6b   : > { %1265 = vmatpush2.bf16.msra.mxu0 %v6975_v22  ;;  %1978 = vmatprep.subr.bf16.mxu1 %v7024_v19  ;;  %v7027_v22 = vld [vmem:[%s7562_s29 + $0x8] ss:$24 sps:$4 sm:$0xff]  }
  0x6c   : > { %1266 = vmatprep.subr.bf16.mxu0 %v6976_v23  ;;  %v7030_v23 = vld [vmem:[%s7562_s29 + $0x2d4] ss:$24 sps:$4 sm:$0xff]   ;;  %v1289_v19 = vld [vmem:[%s7552_s21] sm:$0x3] }
  0x6e   : > { %1979 = vmatpush1.bf16.msra.mxu1 %v7026_v21  ;;  %v1290_v21 = vld [vmem:[%s7557_s25] sm:$0x3] }
  0x6f   : > { %1267 = vmatpush2.bf16.msra.mxu0 %v6978_v24  ;;  %v7035_v24 = vld [vmem:[%s7562_s29 + $0x2dc] ss:$24 sps:$4 sm:$0xff]   ;;  %1980 = vmatprep.subr.bf16.mxu1 %v7030_v23  ;;  %v1332_v23 = vrot.slane %v1289_v19, %v7758_v34 }
  0x70   : > { %1268 = vmatprep.subr.bf16.mxu0 %v6979_v25  ;;  %v7032_v25 = vld [vmem:[%s7562_s29 + $0x2d0] ss:$24 sps:$4 sm:$0xff]  }
  0x72   : > { %1981 = vmatpush2.bf16.msra.mxu1 %v7032_v25  ;;  %v1328_v25 = vrot.slane %v1289_v19, %v7754_v32 }
  0x73   : > { %1269 = vmatpush2.bf16.msra.mxu0 %v6981_v26  ;;  %v7033_v26 = vld [vmem:[%s7562_s29 + $0x2d8] ss:$24 sps:$4 sm:$0xff]  }
  0x74   : > { %2007 = vmatprep.subr.bf16.mxu0 %v6987_v58  ;;  %v7051_v58 = vld [vmem:[%s7562_s29 + $0x248] ss:$24 sps:$4 sm:$0xff]  }
  0x76   : > { %1271 = vmatmul.mubr.bf16.vlgmr.msra.gmra.mxu0 %v1100_v29 }
  0x77   : > { %2008 = vmatpush1.bf16.msra.mxu0 %v6985_v57  ;;  %v7050_v57 = vld [vmem:[%s7562_s29 + $0x240] ss:$24 sps:$4 sm:$0xff]  }
  0x78   : > { %2009 = vmatprep.subr.bf16.mxu0 %v6993_v60  ;;  %v7054_v60 = vld [vmem:[%s7562_s29 + $0x214] ss:$24 sps:$4 sm:$0xff]  }
  0x7b   : > { %2010 = vmatpush1.bf16.msra.mxu0 %v6991_v62  ;;  %v7056_v62 = vld [vmem:[%s7562_s29 + $0x210] ss:$24 sps:$4 sm:$0xff]  }
  0x7c   : > { %2011 = vmatprep.subr.bf16.mxu0 %v6999_v0  ;;  %v7060_v0 = vld [vmem:[%s7562_s29 + $0x1e4] ss:$24 sps:$4 sm:$0xff]  }
  0x7f   : > { %2012 = vmatpush1.bf16.msra.mxu0 %v6997_v2  ;;  %v7062_v2 = vld [vmem:[%s7562_s29 + $0x1e0] ss:$24 sps:$4 sm:$0xff]  }
  0x80   : > { %2013 = vmatprep.subr.bf16.mxu0 %v7005_v4  ;;  %v7066_v4 = vld [vmem:[%s7562_s29 + $0x1b4] ss:$24 sps:$4 sm:$0xff]  }
  0x83   : > { %2014 = vmatpush1.bf16.msra.mxu0 %v7003_v6  ;;  %v7068_v6 = vld [vmem:[%s7562_s29 + $0x1b0] ss:$24 sps:$4 sm:$0xff]  }
  0x84   : > { %2015 = vmatprep.subr.bf16.mxu0 %v7011_v8  ;;  %v7072_v8 = vld [vmem:[%s7562_s29 + $0x184] ss:$24 sps:$4 sm:$0xff]  }
  0x87   : > { %2016 = vmatpush1.bf16.msra.mxu0 %v7009_v10  ;;  %v7074_v10 = vld [vmem:[%s7562_s29 + $0x180] ss:$24 sps:$4 sm:$0xff]  }
  0x88   : > { %2017 = vmatprep.subr.bf16.mxu0 %v7017_v12  ;;  %v7080_v12 = vld [vmem:[%s7562_s29 + $0x164] ss:$24 sps:$4 sm:$0xff]  }
  0x8b   : > { %2018 = vmatpush1.bf16.msra.mxu0 %v7015_v14 }
  0x8c   : > { %2019 = vmatprep.subr.bf16.mxu0 %v7023_v16 }
  0x8f   : > { %2020 = vmatpush1.bf16.msra.mxu0 %v7021_v18 }
  0x90   : > { %2021 = vmatprep.subr.bf16.mxu0 %v7029_v20 }
  0x93   : > { %2022 = vmatpush1.bf16.msra.mxu0 %v7027_v22 }
  0x94   : > { %2023 = vmatprep.subr.bf16.mxu0 %v7035_v24 }
  0x97   : > { %2024 = vmatpush2.bf16.msra.mxu0 %v7033_v26 }
 0x136   : > { %v1272_v37 = vpop.f32.mrf.mxu0 }
 0x137   : > { %v1273_v38 = vadd.f32 %v1272_v37, %v1107_v35 }
 0x138   : > { %v1274_v40 = vpop.f32.mrf.mxu0 }
 0x139   : > { %v1275_v42 = vadd.f32 %v1274_v40, %v1111_v36  ;;  %v7764_v44 = vadd.f32 %v1281_v39, %v1273_v38 }
 0x13a   : > { %v1276_v43 = vpop.f32.mrf.mxu0 }
 0x13b   : > { %v7766_v45 = vadd.f32 %v1282_v41, %v1275_v42  ;;  %v1277_v46 = vadd.f32 %v1276_v43, %v1107_v35 }
 0x13c   : > { %v1278_v48 = vpop.f32.mrf.mxu0 }
 0x13d   : > { %v1279_v50 = vadd.f32 %v1278_v48, %v1111_v36  ;;  %v1291_v51 = vadd.f32 %v7766_v45, %v7764_v44  ;;  %v7772_v52 = vadd.f32 %v1283_v47, %v1277_v46  ;;  %v7036_v46 = vld [vmem:[%s7562_s29 + $0x2a4] ss:$24 sps:$4 sm:$0xff]   ;;  %v7038_v47 = vld [vmem:[%s7562_s29 + $0x2a0] ss:$24 sps:$4 sm:$0xff]  }
 0x13e   : > { %v7041_v48 = vld [vmem:[%s7562_s29 + $0x2ac] ss:$24 sps:$4 sm:$0xff]   ;;  %1982 = vmatprep.subr.bf16.mxu1 %v7036_v46 }
 0x13f   : > { %v7774_v53 = vadd.f32 %v1284_v49, %v1279_v50  ;;  %1292 = vadd.xlane.f32.xlu0 %v1291_v51  ;;  %v7039_v49 = vld [vmem:[%s7562_s29 + $0x2a8] ss:$24 sps:$4 sm:$0xff]   ;;  %1983 = vmatpush2.bf16.msra.mxu1 %v7038_v47  ;;  %v7042_v50 = vld [vmem:[%s7562_s29 + $0x274] ss:$24 sps:$4 sm:$0xff]  }
 0x140   : > { %2025 = vmatprep.subr.bf16.mxu0 %v7041_v48  ;;  %v7044_v51 = vld [vmem:[%s7562_s29 + $0x270] ss:$24 sps:$4 sm:$0xff]   ;;  %1984 = vmatprep.subr.bf16.mxu1 %v7042_v50  ;;  %v7078_v47 = vld [vmem:[%s7562_s29 + $0x160] ss:$24 sps:$4 sm:$0xff]  }
 0x141   : > { %v1294_v54 = vadd.f32 %v7774_v53, %v7772_v52  ;;  %2026 = vmatpush2.bf16.msra.mxu0 %v7039_v49  ;;  %v7086_v49 = vld [vmem:[%s7562_s29 + $0x104] ss:$24 sps:$4 sm:$0xff]   ;;  %v7084_v50 = vld [vmem:[%s7562_s29 + $0x100] ss:$24 sps:$4 sm:$0xff]  }
 0x143   : > { %1295 = vadd.xlane.f32.xlu0 %v1294_v54  ;;  %v7047_v54 = vld [vmem:[%s7562_s29 + $0x27c] ss:$24 sps:$4 sm:$0xff]   ;;  %1985 = vmatpush2.bf16.msra.mxu1 %v7044_v51 }
 0x144   : > { %2027 = vmatprep.subr.bf16.mxu0 %v7047_v54  ;;  %1986 = vmatprep.subr.bf16.mxu1 %v7048_v56  ;;  %v7089_v51 = vld [vmem:[%s7562_s29 + $0xd4] ss:$24 sps:$4 sm:$0xff]   ;;  %v7087_v54 = vld [vmem:[%s7562_s29 + $0xd0] ss:$24 sps:$4 sm:$0xff]   ;;  %v7090_v56 = vld [vmem:[%s7562_s29 + $0xa0] ss:$24 sps:$4 sm:$0xff]  }
 0x145   : > { %2028 = vmatpush2.bf16.msra.mxu0 %v7045_v55  ;;  %v7092_v55 = vld [vmem:[%s7562_s29 + $0xa4] ss:$24 sps:$4 sm:$0xff]  }
 0x146   : > { %2029 = vmatprep.subr.bf16.mxu0 %v7053_v59  ;;  %v7098_v59 = vld [vmem:[%s7562_s29 + $0x44] ss:$24 sps:$4 sm:$0xff]  }
 0x147   : > { %1987 = vmatpush2.bf16.msra.mxu1 %v7050_v57  ;;  %v7095_v57 = vld [vmem:[%s7562_s29 + $0x74] ss:$24 sps:$4 sm:$0xff]  }
 0x148   : > { %1988 = vmatprep.subr.bf16.mxu1 %v7054_v60  ;;  %v7096_v60 = vld [vmem:[%s7562_s29 + $0x40] ss:$24 sps:$4 sm:$0xff]  }
 0x149   : > { %2030 = vmatpush2.bf16.msra.mxu0 %v7051_v58  ;;  %v7093_v58 = vld [vmem:[%s7562_s29 + $0x70] ss:$24 sps:$4 sm:$0xff]  }
 0x14a   : > { %2031 = vmatprep.subr.bf16.mxu0 %v7059_v61  ;;  %v7101_v61 = vld [vmem:[%s7562_s29 + $0x14] ss:$24 sps:$4 sm:$0xff]  }
 0x14b   : > { %1989 = vmatpush2.bf16.msra.mxu1 %v7056_v62  ;;  %v7099_v62 = vld [vmem:[%s7562_s29 + $0x10] ss:$24 sps:$4 sm:$0xff]  }
 0x14c   : > { %1990 = vmatprep.subr.bf16.mxu1 %v7060_v0  ;;  %v7102_v0 = vld [vmem:[%s7562_s29 + $0x2e0] ss:$24 sps:$4 sm:$0xff]  }
 0x14d   : > { %2032 = vmatpush2.bf16.msra.mxu0 %v7057_v63  ;;  %v7104_v63 = vld [vmem:[%s7562_s29 + $0x2e4] ss:$24 sps:$4 sm:$0xff]  }
 0x14e   : > { %2033 = vmatprep.subr.bf16.mxu0 %v7065_v1  ;;  %v7107_v1 = vld [vmem:[%s7562_s29 + $0x2b4] ss:$24 sps:$4 sm:$0xff]  }
 0x14f   : > { %1991 = vmatpush2.bf16.msra.mxu1 %v7062_v2  ;;  %v7105_v2 = vld [vmem:[%s7562_s29 + $0x2b0] ss:$24 sps:$4 sm:$0xff]  }
 0x150   : > { %1992 = vmatprep.subr.bf16.mxu1 %v7066_v4  ;;  %v7108_v4 = vld [vmem:[%s7562_s29 + $0x280] ss:$24 sps:$4 sm:$0xff]  }
 0x151   : > { %2034 = vmatpush2.bf16.msra.mxu0 %v7063_v3  ;;  %v7110_v3 = vld [vmem:[%s7562_s29 + $0x284] ss:$24 sps:$4 sm:$0xff]  }
 0x152   : > { %2035 = vmatprep.subr.bf16.mxu0 %v7071_v5  ;;  %v7113_v5 = vld [vmem:[%s7562_s29 + $0x254] ss:$24 sps:$4 sm:$0xff]  }
 0x153   : > { %1993 = vmatpush2.bf16.msra.mxu1 %v7068_v6  ;;  %v7111_v6 = vld [vmem:[%s7562_s29 + $0x250] ss:$24 sps:$4 sm:$0xff]  }
 0x154   : > { %1994 = vmatprep.subr.bf16.mxu1 %v7072_v8  ;;  %v7114_v8 = vld [vmem:[%s7562_s29 + $0x220] ss:$24 sps:$4 sm:$0xff]  }
 0x155   : > { %2036 = vmatpush2.bf16.msra.mxu0 %v7069_v7  ;;  %v7116_v7 = vld [vmem:[%s7562_s29 + $0x224] ss:$24 sps:$4 sm:$0xff]  }
 0x156   : > { %2037 = vmatprep.subr.bf16.mxu0 %v7077_v9  ;;  %v7119_v9 = vld [vmem:[%s7562_s29 + $0x1f4] ss:$24 sps:$4 sm:$0xff]  }
 0x157   : > { %1995 = vmatpush2.bf16.msra.mxu1 %v7074_v10  ;;  %v7117_v10 = vld [vmem:[%s7562_s29 + $0x1f0] ss:$24 sps:$4 sm:$0xff]  }
 0x158   : > { %2050 = vmatprep.subr.bf16.mxu1 %v7080_v12  ;;  %v7120_v12 = vld [vmem:[%s7562_s29 + $0x1c0] ss:$24 sps:$4 sm:$0xff]  }
 0x159   : > { %2038 = vmatpush2.bf16.msra.mxu0 %v7075_v11  ;;  %v7122_v11 = vld [vmem:[%s7562_s29 + $0x1c4] ss:$24 sps:$4 sm:$0xff]  }
 0x1c8   : > { %v1293_v27 = vpop.xlane.xlu0 %1292 }
 0x1c9   : > { %v1298_v28 = vmul.f32 0.00390625, %v1293_v27  ;;  %v1347_v27 = vrot.slane %v1290_v21, %v7758_v34 }
 0x1cb   : > { %v7815_v29 = vsub.f32 %v7764_v44, %v1298_v28  ;;  %v7818_v30 = vsub.f32 %v7766_v45, %v1298_v28  ;;  %v1343_v28 = vrot.slane %v1290_v21, %v7754_v32 }
 0x1cc   : > { %v1296_v33 = vpop.xlane.xlu0 %1295 }
 0x1cd   : > { %v1299_v35 = vmul.f32 0.00390625, %v1296_v33  ;;  %v1304_v36 = vmul.f32 %v7815_v29, %v7815_v29  ;;  %v1305_v37 = vmul.f32 %v7818_v30, %v7818_v30 }
 0x1cf   : > { %v7825_v38 = vsub.f32 %v7772_v52, %v1299_v35  ;;  %v7828_v39 = vsub.f32 %v7774_v53, %v1299_v35  ;;  %v1308_v40 = vadd.f32 %v1305_v37, %v1304_v36 }
 0x1d1   : > { %1309 = vadd.xlane.f32.xlu1 %v1308_v40  ;;  %v1306_v41 = vmul.f32 %v7825_v38, %v7825_v38  ;;  %v1307_v42 = vmul.f32 %v7828_v39, %v7828_v39 }
 0x1d3   : > { %v1311_v43 = vadd.f32 %v1307_v42, %v1306_v41 }
 0x1d5   : > { %1312 = vadd.xlane.f32.xlu1 %v1311_v43 }
 0x25a   : > { %v1310_v13 = vpop.xlane.xlu1 %1309 }
 0x25b   : > { %v1314_v14 = vmul.f32 0.00390625, %v1310_v13  ;;  %v7125_v13 = vld [vmem:[%s7562_s29 + $0x194] ss:$24 sps:$4 sm:$0xff]  }
 0x25d   : > { %v1316_v15 = vadd.f32 1e-06, %v1314_v14  ;;  %v7123_v14 = vld [vmem:[%s7562_s29 + $0x190] ss:$24 sps:$4 sm:$0xff]  }
 0x25e   : > { %v1313_v16 = vpop.xlane.xlu1 %1312 }
 0x25f   : > { %7430 = vrsqrt.f32 %v1316_v15  ;;  %v1315_v17 = vmul.f32 0.00390625, %v1313_v16  ;;  %v7521_v15 = vmov 0.0   ;;  %v7913_v16 = vsub.s32 2, %v7751_v31 }
 0x260   : > { %6744 = vmatprep.subr.bf16.mxu0 %v7521_v15 }
 0x261   : > { %v1317_v18 = vadd.f32 1e-06, %v1315_v17  ;;  %v7916_v17 = vld [vmem:[%s7567_s3] sm:$0x3f] }
 0x263   : > { %7432 = vrsqrt.f32 %v1317_v18 }
 0x26c   : > { %v7431_v20 = vpop.eup %7430 }
 0x26d   : > { %v1321_v22 = vmul.f32 %v7431_v20, %v7818_v30  ;;  %v1320_v24 = vmul.f32 %v7431_v20, %v7815_v29  ;;  %v1465_v20 = vrot.slane %v7916_v17, %v7913_v16 }
 0x26f   : > { %v1336_v35 = vmul.f32 %v1332_v23, %v1321_v22  ;;  %v1335_v37 = vmul.f32 %v1328_v25, %v1320_v24 }
 0x270   : > { %v7433_v26 = vpop.eup %7432 }
 0x271   : > { %v1323_v33 = vmul.f32 %v7433_v26, %v7828_v39  ;;  %v1322_v36 = vmul.f32 %v7433_v26, %v7825_v38  ;;  %v1351_v41 = vadd.f32 %v1347_v27, %v1336_v35  ;;  %v1350_v42 = vadd.f32 %v1343_v28, %v1335_v37  ;;  %v7083_v39 = vld [vmem:[%s7562_s29 + $0x134] ss:$24 sps:$4 sm:$0xff]   ;;  %v7081_v38 = vld [vmem:[%s7562_s29 + $0x130] ss:$24 sps:$4 sm:$0xff]  }
 0x272   : > { %v1457_v37 = vrot.slane %v7916_v17, %v7754_v32 }
 0x273   : > { %v1338_v30 = vmul.f32 %v1332_v23, %v1323_v33  ;;  %v1337_v40 = vmul.f32 %v1328_v25, %v1322_v36  ;;  %v1461_v23 = vrot.slane %v7916_v17, %v7758_v34 }
 0x275   : > { %v1353_v29 = vadd.f32 %v1347_v27, %v1338_v30  ;;  %v1352_v43 = vadd.f32 %v1343_v28, %v1337_v40 }
 0x277   : > { %v1451_v46 = vpack.c.bf16 %v1353_v29, %v1351_v41  ;;  %v7874_v48 = vpack.c.bf16 %v1352_v43, %v1350_v42  ;;  %v7936_v42 = vsub.s32 4, %v7751_v31 }
 0x279   : > { %1996 = vmatprep.mubr.bf16.mxu1 %v1451_v46  ;;  %2039 = vmatprep.mubr.bf16.mxu0 %v1451_v46 }
 0x27a   : > { %1997 = vmatmul.mubr.bf16.vlgmr.msra.gmra.mxu1 %v7874_v48  ;;  %2040 = vmatmul.mubr.bf16.vlgmr.msra.gmra.mxu0 %v7874_v48 }
 0x27b   : > { %2051 = vmatpush1.bf16.msra.mxu1 %v7078_v47  ;;  %2082 = vmatprep.mubr.bf16.mxu1 %v1451_v46  ;;  %v1473_v46 = vrot.slane %v7916_v17, %v7936_v42 }
 0x27c   : > { %2052 = vmatprep.subr.bf16.mxu1 %v7083_v39  ;;  %6746 = vmatprep.mubr.msk.bf16.mxu0 %vm7522_vm1, %v7521_v15 }
 0x27f   : > { %2053 = vmatpush1.bf16.msra.mxu1 %v7081_v38 }
 0x280   : > { %2054 = vmatprep.subr.bf16.mxu1 %v7086_v49 }
 0x283   : > { %2055 = vmatpush1.bf16.msra.mxu1 %v7084_v50 }
 0x284   : > { %2056 = vmatprep.subr.bf16.mxu1 %v7089_v51 }
 0x287   : > { %2057 = vmatpush1.bf16.msra.mxu1 %v7087_v54 }
 0x288   : > { %2058 = vmatprep.subr.bf16.mxu1 %v7092_v55 }
 0x28b   : > { %2059 = vmatpush1.bf16.msra.mxu1 %v7090_v56 }
 0x28c   : > { %2060 = vmatprep.subr.bf16.mxu1 %v7095_v57 }
 0x28f   : > { %2061 = vmatpush1.bf16.msra.mxu1 %v7093_v58 }
 0x290   : > { %2062 = vmatprep.subr.bf16.mxu1 %v7098_v59 }
 0x293   : > { %2063 = vmatpush1.bf16.msra.mxu1 %v7096_v60 }
 0x294   : > { %2064 = vmatprep.subr.bf16.mxu1 %v7101_v61 }
 0x297   : > { %2065 = vmatpush1.bf16.msra.mxu1 %v7099_v62 }
 0x298   : > { %2066 = vmatprep.subr.bf16.mxu1 %v7104_v63 }
 0x29b   : > { %2067 = vmatpush2.bf16.msra.mxu1 %v7102_v0 }
 0x29c   : > { %2068 = vmatprep.subr.bf16.mxu1 %v7107_v1 }
 0x29f   : > { %2069 = vmatpush2.bf16.msra.mxu1 %v7105_v2 }
 0x2a0   : > { %2070 = vmatprep.subr.bf16.mxu1 %v7110_v3 }
 0x2a3   : > { %2071 = vmatpush2.bf16.msra.mxu1 %v7108_v4 }
 0x2a4   : > { %2072 = vmatprep.subr.bf16.mxu1 %v7113_v5 }
 0x2a7   : > { %2073 = vmatpush2.bf16.msra.mxu1 %v7111_v6 }
 0x2a8   : > { %2074 = vmatprep.subr.bf16.mxu1 %v7116_v7 }
 0x2ab   : > { %2075 = vmatpush2.bf16.msra.mxu1 %v7114_v8 }
 0x2ac   : > { %2076 = vmatprep.subr.bf16.mxu1 %v7119_v9  ;;  %v7946_v9 = vsub.s32 3, %v7751_v31 }
 0x2af   : > { %2077 = vmatpush2.bf16.msra.mxu1 %v7117_v10 }
 0x2b0   : > { %2078 = vmatprep.subr.bf16.mxu1 %v7122_v11  ;;  %v1469_v11 = vrot.slane %v7916_v17, %v7946_v9 }
 0x2b3   : > { %2079 = vmatpush2.bf16.msra.mxu1 %v7120_v12 }
 0x2b4   : > { %2080 = vmatprep.subr.bf16.mxu1 %v7125_v13 }
 0x2b7   : > { %2081 = vmatpush2.bf16.msra.mxu1 %v7123_v14 }
 0x2ba   : > { %2083 = vmatmul.mubr.bf16.vlgmr.msra.gmra.mxu1 %v7874_v48 }
 0x33a   : > { %v1998_v18 = vpop.f32.mrf.mxu1  ;;  %v2041_v19 = vpop.f32.mrf.mxu0 }
 0x33b   : > { %v2042_v26 = vadd.f32 %v2041_v19, %v1465_v20  ;;  %v1999_v41 = vadd.f32 %v1998_v18, %v1457_v37 }
 0x33c   : > { %v2000_v21 = vpop.f32.mrf.mxu1  ;;  %v7920_v22 = vpop.f32.mrf.mxu0 }
 0x33d   : > { %v7924_v33 = vadd.f32 %v2000_v21, %v1461_v23  ;;  %v2044_v19 = vadd.f32 %v7920_v22, %v1469_v11 }
 0x33e   : > { %v2002_v24 = vpop.f32.mrf.mxu1  ;;  %v2045_v25 = vpop.f32.mrf.mxu0 }
 0x33f   : > { %v2046_v27 = vadd.f32 %v2045_v25, %v1465_v20  ;;  %v2003_v40 = vadd.f32 %v2002_v24, %v1457_v37  ;;  %v7952_v20 = vsub.s32 5, %v7751_v31 }
 0x340   : > { %v2004_v28 = vpop.f32.mrf.mxu1  ;;  %v2047_v50 = vpop.f32.mrf.mxu0 }
 0x341   : > { %v2094_v35 = vpack.c.bf16 %v2046_v27, %v2042_v26  ;;  %v7926_v36 = vadd.f32 %v2004_v28, %v1461_v23  ;;  %v2093_v29 = vpack.c.bf16 %v2003_v40, %v1999_v41  ;;  %v2048_v13 = vadd.f32 %v2047_v50, %v1469_v11  ;;  %v7138_v11 = vld [vmem:[%s7572_s8 + $0x30] ss:$8 sps:$4 sm:$0xff]  }
 0x342   : > { %v1477_v25 = vrot.slane %v7916_v17, %v7952_v20 }
 0x343   : > { %v2209_v30 = vpack.c.bf16 %v7926_v36, %v7924_v33  ;;  %6745 = vmatpush3.bf16.xpose.msra.mxu0 %v2094_v35  ;;  %v2210_v23 = vpack.c.bf16 %v2048_v13, %v2044_v19  ;;  %v7141_v13 = vld [vmem:[%s7572_s8 + $0x20] ss:$8 sps:$4 sm:$0xff]   ;;  %v7149_v19 = vld [vmem:[%s7572_s8 + $0x4] ss:$8 sps:$4 sm:$0xff]  }
 0x344   : > { %6750 = vmatprep.subr.bf16.mxu0 %v7521_v15 }
 0x34a   : > { %6747 = vmatmul.mubr.bf16.vlgmr.msra.gmra.mxu0 %v2093_v29 }
 0x34b   : > { %6752 = vmatprep.mubr.msk.bf16.mxu0 %vm7522_vm1, %v7521_v15 }
 0x37a   : > { %v2084_v43 = vpop.f32.mrf.mxu1 }
 0x37b   : > { %v2085_v39 = vadd.f32 %v2084_v43, %v1473_v46 }
 0x37c   : > { %v2086_v47 = vpop.f32.mrf.mxu1 }
 0x37d   : > { %v2087_v27 = vadd.f32 %v2086_v47, %v1477_v25 }
 0x37e   : > { %v2088_v48 = vpop.f32.mrf.mxu1 }
 0x37f   : > { %v2089_v38 = vadd.f32 %v2088_v48, %v1473_v46 }
 0x380   : > { %v2090_v24 = vpop.f32.mrf.mxu1 }
 0x381   : > { %v2162_v49 = vpack.c.bf16 %v2089_v38, %v2085_v39  ;;  %v2091_v26 = vadd.f32 %v2090_v24, %v1477_v25  ;;  %v7150_v24 = vld [vmem:[%s7572_s8 + $0xf0] ss:$8 sps:$4 sm:$0xff]   ;;  %v7155_v25 = vld [vmem:[%s7572_s8 + $0xe4] ss:$8 sps:$4 sm:$0xff]  }
 0x383   : > { %6751 = vmatpush3.bf16.msra.mxu0 %v2162_v49  ;;  %v2277_v22 = vpack.c.bf16 %v2091_v26, %v2087_v27  ;;  %v7153_v26 = vld [vmem:[%s7572_s8 + $0xe0] ss:$8 sps:$4 sm:$0xff]   ;;  %v7158_v27 = vld [vmem:[%s7572_s8 + $0xd4] ss:$8 sps:$4 sm:$0xff]  }
 0x384   : > { %6756 = vmatprep.subr.bf16.mxu0 %v7521_v15 }
 0x40a   : > { %v2129_v51 = vpop.f32.mrf.mxu0 }
 0x40b   : > { %v2136_v54 = vmul.f32 0.088388346, %v2129_v51 }
 0x40c   : > { %v6748_v55 = vpop.f32.mrf.mxu0 }
 0x40d   : > { %v2139_v56 = vsel %vm2138_vm2, %v2136_v54, -inf }
 0x40e   : > { %2140 = vmax.xlane.f32.xlu0 %v2139_v56  ;;  %v2132_v57 = vpop.f32.mrf.mxu0 }
 0x40f   : > { %v2137_v58 = vmul.f32 0.088388346, %v2132_v57 }
 0x410   : > { %v6749_v59 = vpop.f32.mrf.mxu0 }
 0x411   : > { %v2142_v60 = vsel %vm2138_vm2, %v2137_v58, -inf }
 0x412   : > { %2143 = vmax.xlane.f32.xlu1 %v2142_v60 }
 0x497   : > { %v2141_v61 = vpop.xlane.xlu0 %2140 }
 0x498   : > { %v2145_v62 = vsub.f32 %v2136_v54, %v2141_v61 }
 0x49a   : > { %v2147_v63 = vmul.f32 1.442695, %v2145_v62 }
 0x49b   : > { %v2144_v0 = vpop.xlane.xlu1 %2143 }
 0x49c   : > { %7434 = vpow2.f32 %v2147_v63  ;;  %v2146_v1 = vsub.f32 %v2137_v58, %v2144_v0  ;;  %v7128_v58 = vld [vmem:[%s7572_s8 + $0x74] ss:$8 sps:$4 sm:$0xff]  }
 0x49e   : > { %v2149_v2 = vmul.f32 1.442695, %v2146_v1  ;;  %v7126_v1 = vld [vmem:[%s7572_s8 + $0x70] ss:$8 sps:$4 sm:$0xff]  }
 0x4a0   : > { %7436 = vpow2.f32 %v2149_v2 }
 0x4a9   : > { %v7435_v3 = vpop.eup %7434 }
 0x4aa   : > { %v2151_v4 = vsel %vm2138_vm2, %v7435_v3, 0.0 }
 0x4ab   : > { %2152 = vadd.xlane.f32.xlu0 %v2151_v4  ;;  %v7129_v4 = vld [vmem:[%s7572_s8 + $0x60] ss:$8 sps:$4 sm:$0xff]  }
 0x4ad   : > { %v7437_v5 = vpop.eup %7436 }
 0x4ae   : > { %v2154_v6 = vsel %vm2138_vm2, %v7437_v5, 0.0 }
 0x4af   : > { %2155 = vadd.xlane.f32.xlu1 %v2154_v6  ;;  %v7132_v6 = vld [vmem:[%s7572_s8 + $0x50] ss:$8 sps:$4 sm:$0xff]  }
 0x534   : > { %v2153_v7 = vpop.xlane.xlu0 %2152 }
 0x535   : > { %7438 = vrcp.f32 %v2153_v7  ;;  %v7137_v7 = vld [vmem:[%s7572_s8 + $0x44] ss:$8 sps:$4 sm:$0xff]  }
 0x538   : > { %v2156_v8 = vpop.xlane.xlu1 %2155 }
 0x539   : > { %7440 = vrcp.f32 %v2156_v8  ;;  %v7135_v8 = vld [vmem:[%s7572_s8 + $0x40] ss:$8 sps:$4 sm:$0xff]  }
 0x542   : > { %v7439_v10 = vpop.eup %7438 }
 0x543   : > { %v2159_v14 = vmul.f32 %v7439_v10, %v7435_v3  ;;  %v7131_v3 = vld [vmem:[%s7572_s8 + $0x64] ss:$8 sps:$4 sm:$0xff]   ;;  %v7140_v10 = vld [vmem:[%s7572_s8 + $0x34] ss:$8 sps:$4 sm:$0xff]  }
 0x546   : > { %v7441_v12 = vpop.eup %7440 }
 0x547   : > { %v2160_v18 = vmul.f32 %v7441_v12, %v7437_v5  ;;  %v7134_v5 = vld [vmem:[%s7572_s8 + $0x54] ss:$8 sps:$4 sm:$0xff]   ;;  %v7143_v12 = vld [vmem:[%s7572_s8 + $0x24] ss:$8 sps:$4 sm:$0xff]  }
 0x549   : > { %v2161_v21 = vpack.c.bf16 %v2160_v18, %v2159_v14  ;;  %v7146_v14 = vld [vmem:[%s7572_s8 + $0x14] ss:$8 sps:$4 sm:$0xff]   ;;  %v7144_v18 = vld [vmem:[%s7572_s8 + $0x10] ss:$8 sps:$4 sm:$0xff]  }
 0x54b   : > { %6753 = vmatmul.mubr.msk.bf16.vlgmr.msra.gmra.mxu0 %vm2138_vm2, %v2161_v21  ;;  %v7147_v21 = vld [vmem:[%s7572_s8] ss:$8 sps:$4 sm:$0xff]  }
 0x54c   : > { %6757 = vmatpush3.bf16.xpose.msra.mxu0 %v2210_v23  ;;  %6758 = vmatprep.mubr.msk.bf16.mxu0 %vm7522_vm1, %v7521_v15  ;;  %v7152_v23 = vld [vmem:[%s7572_s8 + $0xf4] ss:$8 sps:$4 sm:$0xff]  }
 0x54d   : > { %6762 = vmatprep.subr.bf16.mxu0 %v7521_v15 }
 0x553   : > { %6759 = vmatmul.mubr.bf16.vlgmr.msra.gmra.mxu0 %v2209_v30 }
 0x554   : > { %6763 = vmatpush3.bf16.msra.mxu0 %v2277_v22  ;;  %6764 = vmatprep.mubr.msk.bf16.mxu0 %vm7522_vm1, %v7521_v15  ;;  %v7156_v22 = vld [vmem:[%s7572_s8 + $0xd0] ss:$8 sps:$4 sm:$0xff]  }
 0x555   : > { %2522 = vmatprep.subr.bf16.mxu0 %v7128_v58 }
 0x60b   : > { %v7965_v28 = vpop.f32.mrf.mxu0 }
 0x60d   : > { %v6754_v17 = vpop.f32.mrf.mxu0 }
 0x60e   : > { %v7161_v17 = vld [vmem:[%s7572_s8 + $0xc4] ss:$8 sps:$4 sm:$0xff]  }
 0x60f   : > { %v7967_v35 = vpop.f32.mrf.mxu0 }
 0x610   : > { %v2360_v37 = vpack.c.bf16 %v7967_v35, %v7965_v28 }
 0x611   : > { %v6755_v40 = vpop.f32.mrf.mxu0 }
 0x612   : > { %v7159_v40 = vld [vmem:[%s7572_s8 + $0xc0] ss:$8 sps:$4 sm:$0xff]  }
 0x613   : > { %v2245_v41 = vpop.f32.mrf.mxu0 }
 0x614   : > { %v2252_v29 = vmul.f32 0.088388346, %v2245_v41  ;;  %v7164_v41 = vld [vmem:[%s7572_s8 + $0xb4] ss:$8 sps:$4 sm:$0xff]  }
 0x615   : > { %v6760_v43 = vpop.f32.mrf.mxu0 }
 0x616   : > { %v2254_v46 = vsel %vm2138_vm2, %v2252_v29, -inf  ;;  %v7167_v43 = vld [vmem:[%s7572_s8 + $0xa4] ss:$8 sps:$4 sm:$0xff]  }
 0x617   : > { %2255 = vmax.xlane.f32.xlu0 %v2254_v46  ;;  %v2248_v33 = vpop.f32.mrf.mxu0  ;;  %v7165_v46 = vld [vmem:[%s7572_s8 + $0xa0] ss:$8 sps:$4 sm:$0xff]  }
 0x618   : > { %v2253_v36 = vmul.f32 0.088388346, %v2248_v33  ;;  %v7170_v33 = vld [vmem:[%s7572_s8 + $0x94] ss:$8 sps:$4 sm:$0xff]  }
 0x619   : > { %v6761_v30 = vpop.f32.mrf.mxu0 }
 0x61a   : > { %v2257_v47 = vsel %vm2138_vm2, %v2253_v36, -inf  ;;  %v7173_v30 = vld [vmem:[%s7572_s8 + $0x84] ss:$8 sps:$4 sm:$0xff]  }
 0x61b   : > { %2258 = vmax.xlane.f32.xlu1 %v2257_v47  ;;  %v7171_v47 = vld [vmem:[%s7572_s8 + $0x80] ss:$8 sps:$4 sm:$0xff]  }
 0x6a0   : > { %v2256_v48 = vpop.xlane.xlu0 %2255 }
 0x6a1   : > { %v2260_v39 = vsub.f32 %v2252_v29, %v2256_v48  ;;  %v7162_v29 = vld [vmem:[%s7572_s8 + $0xb0] ss:$8 sps:$4 sm:$0xff]  }
 0x6a3   : > { %v2262_v38 = vmul.f32 1.442695, %v2260_v39 }
 0x6a4   : > { %v2259_v49 = vpop.xlane.xlu1 %2258 }
 0x6a5   : > { %7442 = vpow2.f32 %v2262_v38  ;;  %v2261_v50 = vsub.f32 %v2253_v36, %v2259_v49  ;;  %v7168_v36 = vld [vmem:[%s7572_s8 + $0x90] ss:$8 sps:$4 sm:$0xff]  }
 0x6a7   : > { %v2264_v51 = vmul.f32 1.442695, %v2261_v50 }
 0x6a9   : > { %7444 = vpow2.f32 %v2264_v51  ;;  %v2569_v51 = vld [vmem:[%s7577_s14] sm:$0x3] }
 0x6b2   : > { %v7443_v54 = vpop.eup %7442 }
 0x6b3   : > { %v2266_v55 = vsel %vm2138_vm2, %v7443_v54, 0.0 }
 0x6b4   : > { %2267 = vadd.xlane.f32.xlu0 %v2266_v55 }
 0x6b6   : > { %v7445_v56 = vpop.eup %7444 }
 0x6b7   : > { %v2269_v57 = vsel %vm2138_vm2, %v7445_v56, 0.0 }
 0x6b8   : > { %2270 = vadd.xlane.f32.xlu1 %v2269_v57  ;;  %v2578_v57 = vrot.slane %v2569_v51, %v7758_v34 }
 0x73d   : > { %v2268_v59 = vpop.xlane.xlu0 %2267 }
 0x73e   : > { %7446 = vrcp.f32 %v2268_v59 }
 0x741   : > { %v2271_v60 = vpop.xlane.xlu1 %2270 }
 0x742   : > { %7448 = vrcp.f32 %v2271_v60 }
 0x74b   : > { %v7447_v61 = vpop.eup %7446 }
 0x74c   : > { %v2274_v63 = vmul.f32 %v7447_v61, %v7443_v54 }
 0x74f   : > { %v7449_v62 = vpop.eup %7448 }
 0x750   : > { %v2275_v0 = vmul.f32 %v7449_v62, %v7445_v56  ;;  %v2574_v56 = vrot.slane %v2569_v51, %v7754_v32 }
 0x752   : > { %v2276_v2 = vpack.c.bf16 %v2275_v0, %v2274_v63 }
 0x754   : > { %6765 = vmatmul.mubr.msk.bf16.vlgmr.msra.gmra.mxu0 %vm2138_vm2, %v2276_v2  ;;  %v7179_v2 = vld [vmem:[%s7592_s30 + $0xec] ss:$16 sps:$4 sm:$0xff]  }
 0x755   : > { %2523 = vmatpush1.bf16.msra.mxu0 %v7126_v1  ;;  %v7176_v1 = vld [vmem:[%s7592_s30 + $0xe4] ss:$16 sps:$4 sm:$0xff]  }
 0x756   : > { %2524 = vmatprep.subr.bf16.mxu0 %v7131_v3  ;;  %v7182_v3 = vld [vmem:[%s7592_s30 + $0xc4] ss:$16 sps:$4 sm:$0xff]   ;;  %3057 = vmatprep.subr.bf16.mxu1 %v7176_v1  ;;  %v7231_v1 = vld [vmem:[%s7592_s30 + $0x1c8] ss:$16 sps:$4 sm:$0xff]  }
 0x759   : > { %2525 = vmatpush1.bf16.msra.mxu0 %v7129_v4  ;;  %v7185_v4 = vld [vmem:[%s7592_s30 + $0xcc] ss:$16 sps:$4 sm:$0xff]  }
 0x75a   : > { %2526 = vmatprep.subr.bf16.mxu0 %v7134_v5  ;;  %v7180_v5 = vld [vmem:[%s7592_s30 + $0xc0] ss:$16 sps:$4 sm:$0xff]  }
 0x75d   : > { %2527 = vmatpush1.bf16.msra.mxu0 %v7132_v6  ;;  %v7183_v6 = vld [vmem:[%s7592_s30 + $0xc8] ss:$16 sps:$4 sm:$0xff]  }
 0x75e   : > { %2528 = vmatprep.subr.bf16.mxu0 %v7137_v7  ;;  %v7188_v7 = vld [vmem:[%s7592_s30 + $0xa4] ss:$16 sps:$4 sm:$0xff]  }
 0x761   : > { %2529 = vmatpush1.bf16.msra.mxu0 %v7135_v8  ;;  %v7191_v8 = vld [vmem:[%s7592_s30 + $0xac] ss:$16 sps:$4 sm:$0xff]  }
 0x762   : > { %2530 = vmatprep.subr.bf16.mxu0 %v7140_v10  ;;  %v7186_v10 = vld [vmem:[%s7592_s30 + $0xa0] ss:$16 sps:$4 sm:$0xff]  }
 0x765   : > { %2531 = vmatpush1.bf16.msra.mxu0 %v7138_v11  ;;  %v7189_v11 = vld [vmem:[%s7592_s30 + $0xa8] ss:$16 sps:$4 sm:$0xff]  }
 0x766   : > { %2532 = vmatprep.subr.bf16.mxu0 %v7143_v12  ;;  %v7194_v12 = vld [vmem:[%s7592_s30 + $0x84] ss:$16 sps:$4 sm:$0xff]  }
 0x769   : > { %2533 = vmatpush1.bf16.msra.mxu0 %v7141_v13  ;;  %v7197_v13 = vld [vmem:[%s7592_s30 + $0x8c] ss:$16 sps:$4 sm:$0xff]  }
 0x76a   : > { %2534 = vmatprep.subr.bf16.mxu0 %v7146_v14  ;;  %v7192_v14 = vld [vmem:[%s7592_s30 + $0x80] ss:$16 sps:$4 sm:$0xff]  }
 0x76d   : > { %2535 = vmatpush1.bf16.msra.mxu0 %v7144_v18  ;;  %v7195_v18 = vld [vmem:[%s7592_s30 + $0x88] ss:$16 sps:$4 sm:$0xff]  }
 0x76e   : > { %2536 = vmatprep.subr.bf16.mxu0 %v7149_v19  ;;  %v7200_v19 = vld [vmem:[%s7592_s30 + $0x64] ss:$16 sps:$4 sm:$0xff]  }
 0x771   : > { %2537 = vmatpush1.bf16.msra.mxu0 %v7147_v21  ;;  %v7203_v21 = vld [vmem:[%s7592_s30 + $0x6c] ss:$16 sps:$4 sm:$0xff]  }
 0x772   : > { %2538 = vmatprep.subr.bf16.mxu0 %v7152_v23  ;;  %v7198_v23 = vld [vmem:[%s7592_s30 + $0x60] ss:$16 sps:$4 sm:$0xff]  }
 0x775   : > { %2539 = vmatpush2.bf16.msra.mxu0 %v7150_v24  ;;  %v7201_v24 = vld [vmem:[%s7592_s30 + $0x68] ss:$16 sps:$4 sm:$0xff]  }
 0x776   : > { %2540 = vmatprep.subr.bf16.mxu0 %v7155_v25  ;;  %v7206_v25 = vld [vmem:[%s7592_s30 + $0x44] ss:$16 sps:$4 sm:$0xff]  }
 0x779   : > { %2541 = vmatpush2.bf16.msra.mxu0 %v7153_v26  ;;  %v7209_v26 = vld [vmem:[%s7592_s30 + $0x4c] ss:$16 sps:$4 sm:$0xff]  }
 0x77a   : > { %2542 = vmatprep.subr.bf16.mxu0 %v7158_v27  ;;  %v7204_v27 = vld [vmem:[%s7592_s30 + $0x40] ss:$16 sps:$4 sm:$0xff]  }
 0x77d   : > { %2543 = vmatpush2.bf16.msra.mxu0 %v7156_v22  ;;  %v7207_v22 = vld [vmem:[%s7592_s30 + $0x48] ss:$16 sps:$4 sm:$0xff]  }
 0x77e   : > { %2544 = vmatprep.subr.bf16.mxu0 %v7161_v17  ;;  %v7212_v17 = vld [vmem:[%s7592_s30 + $0x24] ss:$16 sps:$4 sm:$0xff]  }
 0x781   : > { %2545 = vmatpush2.bf16.msra.mxu0 %v7159_v40  ;;  %v7215_v40 = vld [vmem:[%s7592_s30 + $0x2c] ss:$16 sps:$4 sm:$0xff]  }
 0x782   : > { %2546 = vmatprep.subr.bf16.mxu0 %v7164_v41  ;;  %v7210_v41 = vld [vmem:[%s7592_s30 + $0x20] ss:$16 sps:$4 sm:$0xff]  }
 0x785   : > { %2547 = vmatpush2.bf16.msra.mxu0 %v7162_v29  ;;  %v7213_v29 = vld [vmem:[%s7592_s30 + $0x28] ss:$16 sps:$4 sm:$0xff]  }
 0x786   : > { %2548 = vmatprep.subr.bf16.mxu0 %v7167_v43  ;;  %v7218_v43 = vld [vmem:[%s7592_s30 + $0x4] ss:$16 sps:$4 sm:$0xff]  }
 0x789   : > { %2549 = vmatpush2.bf16.msra.mxu0 %v7165_v46  ;;  %v7221_v46 = vld [vmem:[%s7592_s30 + $0xc] ss:$16 sps:$4 sm:$0xff]  }
 0x78a   : > { %2550 = vmatprep.subr.bf16.mxu0 %v7170_v33  ;;  %v7216_v33 = vld [vmem:[%s7592_s30] ss:$16 sps:$4 sm:$0xff]  }
 0x78d   : > { %2551 = vmatpush2.bf16.msra.mxu0 %v7168_v36  ;;  %v7219_v36 = vld [vmem:[%s7592_s30 + $0x8] ss:$16 sps:$4 sm:$0xff]  }
 0x78e   : > { %2552 = vmatprep.subr.bf16.mxu0 %v7173_v30  ;;  %v7224_v30 = vld [vmem:[%s7592_s30 + $0x1e4] ss:$16 sps:$4 sm:$0xff]  }
 0x791   : > { %2553 = vmatpush2.bf16.msra.mxu0 %v7171_v47  ;;  %v7227_v47 = vld [vmem:[%s7592_s30 + $0x1ec] ss:$16 sps:$4 sm:$0xff]  }
 0x792   : > { %3100 = vmatprep.subr.bf16.mxu0 %v7179_v2  ;;  %v7239_v2 = vld [vmem:[%s7592_s30 + $0x1ac] ss:$16 sps:$4 sm:$0xff]  }
 0x814   : > { %v2315_v48 = vpop.f32.mrf.mxu0 }
 0x816   : > { %v6766_v39 = vpop.f32.mrf.mxu0 }
 0x817   : > { %v7225_v39 = vld [vmem:[%s7592_s30 + $0x1e8] ss:$16 sps:$4 sm:$0xff]  }
 0x818   : > { %v2318_v38 = vpop.f32.mrf.mxu0 }
 0x819   : > { %v2361_v49 = vpack.c.bf16 %v2318_v38, %v2315_v48  ;;  %v7222_v48 = vld [vmem:[%s7592_s30 + $0x1e0] ss:$16 sps:$4 sm:$0xff]  }
 0x81a   : > { %v6767_v50 = vpop.f32.mrf.mxu0 }
 0x81b   : > { %2554 = vmatprep.mubr.bf16.mxu0 %v2361_v49 }
 0x81c   : > { %2555 = vmatmul.mubr.bf16.vlgmr.msra.gmra.mxu0 %v2360_v37 }
 0x8dc   : > { %v2556_v54 = vpop.f32.mrf.mxu0 }
 0x8dd   : > { %v2565_v55 = vadd.f32 %v2556_v54, %v7764_v44 }
 0x8de   : > { %v2558_v58 = vpop.f32.mrf.mxu0 }
 0x8df   : > { %v2566_v59 = vadd.f32 %v2558_v58, %v7766_v45  ;;  %v8016_v61 = vadd.f32 %v2574_v56, %v2565_v55 }
 0x8e0   : > { %v2560_v60 = vpop.f32.mrf.mxu0 }
 0x8e1   : > { %v8018_v28 = vadd.f32 %v2578_v57, %v2566_v59  ;;  %v2567_v44 = vadd.f32 %v2560_v60, %v7772_v52  ;;  %v7174_v52 = vld [vmem:[%s7592_s30 + $0xe0] ss:$16 sps:$4 sm:$0xff]  }
 0x8e2   : > { %v2562_v35 = vpop.f32.mrf.mxu0  ;;  %3058 = vmatpush1.bf16.msra.mxu1 %v7174_v52  ;;  %v7228_v52 = vld [vmem:[%s7592_s30 + $0x1c0] ss:$16 sps:$4 sm:$0xff]  }
 0x8e3   : > { %v2568_v37 = vadd.f32 %v2562_v35, %v7774_v53  ;;  %v2587_v62 = vadd.f32 %v8018_v28, %v8016_v61  ;;  %v8024_v63 = vadd.f32 %v2574_v56, %v2567_v44  ;;  %v7177_v53 = vld [vmem:[%s7592_s30 + $0xe8] ss:$16 sps:$4 sm:$0xff]   ;;  %3059 = vmatprep.subr.bf16.mxu1 %v7182_v3  ;;  %v7234_v3 = vld [vmem:[%s7592_s30 + $0x1a0] ss:$16 sps:$4 sm:$0xff]  }
 0x8e4   : > { %3101 = vmatpush1.bf16.msra.mxu0 %v7177_v53  ;;  %v7236_v53 = vld [vmem:[%s7592_s30 + $0x1a4] ss:$16 sps:$4 sm:$0xff]  }
 0x8e5   : > { %v8026_v45 = vadd.f32 %v2578_v57, %v2568_v37  ;;  %2588 = vadd.xlane.f32.xlu0 %v2587_v62  ;;  %3102 = vmatprep.subr.bf16.mxu0 %v7185_v4  ;;  %v7230_v62 = vld [vmem:[%s7592_s30 + $0x1c4] ss:$16 sps:$4 sm:$0xff]   ;;  %v7237_v4 = vld [vmem:[%s7592_s30 + $0x1a8] ss:$16 sps:$4 sm:$0xff]  }
 0x8e6   : > { %3060 = vmatpush1.bf16.msra.mxu1 %v7180_v5  ;;  %v7242_v5 = vld [vmem:[%s7592_s30 + $0x184] ss:$16 sps:$4 sm:$0xff]  }
 0x8e7   : > { %v2590_v0 = vadd.f32 %v8026_v45, %v8024_v63  ;;  %3061 = vmatprep.subr.bf16.mxu1 %v7188_v7  ;;  %v7243_v7 = vld [vmem:[%s7592_s30 + $0x188] ss:$16 sps:$4 sm:$0xff]  }
 0x8e8   : > { %3103 = vmatpush1.bf16.msra.mxu0 %v7183_v6  ;;  %v7240_v6 = vld [vmem:[%s7592_s30 + $0x180] ss:$16 sps:$4 sm:$0xff]  }
 0x8e9   : > { %2591 = vadd.xlane.f32.xlu1 %v2590_v0  ;;  %3104 = vmatprep.subr.bf16.mxu0 %v7191_v8  ;;  %v7233_v0 = vld [vmem:[%s7592_s30 + $0x1cc] ss:$16 sps:$4 sm:$0xff]  }
 0x8ea   : > { %3062 = vmatpush1.bf16.msra.mxu1 %v7186_v10  ;;  %v7245_v8 = vld [vmem:[%s7592_s30 + $0x18c] ss:$16 sps:$4 sm:$0xff]   ;;  %v7248_v10 = vld [vmem:[%s7592_s30 + $0x164] ss:$16 sps:$4 sm:$0xff]  }
 0x8eb   : > { %3063 = vmatprep.subr.bf16.mxu1 %v7194_v12  ;;  %v7246_v12 = vld [vmem:[%s7592_s30 + $0x160] ss:$16 sps:$4 sm:$0xff]  }
 0x8ec   : > { %3105 = vmatpush1.bf16.msra.mxu0 %v7189_v11  ;;  %v7251_v11 = vld [vmem:[%s7592_s30 + $0x16c] ss:$16 sps:$4 sm:$0xff]  }
 0x8ed   : > { %3106 = vmatprep.subr.bf16.mxu0 %v7197_v13  ;;  %v7249_v13 = vld [vmem:[%s7592_s30 + $0x168] ss:$16 sps:$4 sm:$0xff]  }
 0x8ee   : > { %3064 = vmatpush1.bf16.msra.mxu1 %v7192_v14  ;;  %v7254_v14 = vld [vmem:[%s7592_s30 + $0x144] ss:$16 sps:$4 sm:$0xff]  }
 0x8ef   : > { %3065 = vmatprep.subr.bf16.mxu1 %v7200_v19  ;;  %v7252_v19 = vld [vmem:[%s7592_s30 + $0x140] ss:$16 sps:$4 sm:$0xff]  }
 0x8f0   : > { %3107 = vmatpush1.bf16.msra.mxu0 %v7195_v18  ;;  %v7257_v18 = vld [vmem:[%s7592_s30 + $0x14c] ss:$16 sps:$4 sm:$0xff]  }
 0x8f1   : > { %3108 = vmatprep.subr.bf16.mxu0 %v7203_v21  ;;  %v7255_v21 = vld [vmem:[%s7592_s30 + $0x148] ss:$16 sps:$4 sm:$0xff]  }
 0x8f2   : > { %3066 = vmatpush1.bf16.msra.mxu1 %v7198_v23  ;;  %v7260_v23 = vld [vmem:[%s7592_s30 + $0x124] ss:$16 sps:$4 sm:$0xff]  }
 0x8f3   : > { %3067 = vmatprep.subr.bf16.mxu1 %v7206_v25  ;;  %v7258_v25 = vld [vmem:[%s7592_s30 + $0x120] ss:$16 sps:$4 sm:$0xff]  }
 0x8f4   : > { %3109 = vmatpush1.bf16.msra.mxu0 %v7201_v24  ;;  %v7263_v24 = vld [vmem:[%s7592_s30 + $0x12c] ss:$16 sps:$4 sm:$0xff]  }
 0x8f5   : > { %3110 = vmatprep.subr.bf16.mxu0 %v7209_v26  ;;  %v7261_v26 = vld [vmem:[%s7592_s30 + $0x128] ss:$16 sps:$4 sm:$0xff]  }
 0x8f6   : > { %3068 = vmatpush1.bf16.msra.mxu1 %v7204_v27  ;;  %v7266_v27 = vld [vmem:[%s7592_s30 + $0x104] ss:$16 sps:$4 sm:$0xff]  }
 0x8f7   : > { %3069 = vmatprep.subr.bf16.mxu1 %v7212_v17  ;;  %v7264_v17 = vld [vmem:[%s7592_s30 + $0x100] ss:$16 sps:$4 sm:$0xff]  }
 0x8f8   : > { %3111 = vmatpush1.bf16.msra.mxu0 %v7207_v22  ;;  %v7269_v22 = vld [vmem:[%s7592_s30 + $0x10c] ss:$16 sps:$4 sm:$0xff]  }
 0x8f9   : > { %3112 = vmatprep.subr.bf16.mxu0 %v7215_v40  ;;  %v7267_v40 = vld [vmem:[%s7592_s30 + $0x108] ss:$16 sps:$4 sm:$0xff]  }
 0x8fa   : > { %3070 = vmatpush1.bf16.msra.mxu1 %v7210_v41  ;;  %v7272_v41 = vld [vmem:[%s7602_s12 + $0x74] ss:$8 sps:$4 sm:$0xff]  }
 0x8fb   : > { %3071 = vmatprep.subr.bf16.mxu1 %v7218_v43 }
 0x8fc   : > { %3113 = vmatpush1.bf16.msra.mxu0 %v7213_v29  ;;  %v7275_v29 = vld [vmem:[%s7602_s12 + $0x174] ss:$8 sps:$4 sm:$0xff]  }
 0x8fd   : > { %3114 = vmatprep.subr.bf16.mxu0 %v7221_v46 }
 0x8fe   : > { %3072 = vmatpush1.bf16.msra.mxu1 %v7216_v33 }
 0x8ff   : > { %3073 = vmatprep.subr.bf16.mxu1 %v7224_v30 }
 0x900   : > { %3115 = vmatpush1.bf16.msra.mxu0 %v7219_v36 }
 0x901   : > { %3116 = vmatprep.subr.bf16.mxu0 %v7227_v47 }
 0x902   : > { %3074 = vmatpush2.bf16.msra.mxu1 %v7222_v48  ;;  %v2585_v48 = vld [vmem:[%s7582_s19] sm:$0x3] }
 0x903   : > { %3075 = vmatprep.subr.bf16.mxu1 %v7230_v62 }
 0x904   : > { %3117 = vmatpush2.bf16.msra.mxu0 %v7225_v39 }
 0x905   : > { %3118 = vmatprep.subr.bf16.mxu0 %v7233_v0 }
 0x906   : > { %3076 = vmatpush2.bf16.msra.mxu1 %v7228_v52 }
 0x907   : > { %3077 = vmatprep.subr.bf16.mxu1 %v7236_v53 }
 0x908   : > { %3119 = vmatpush2.bf16.msra.mxu0 %v7231_v1 }
 0x909   : > { %3120 = vmatprep.subr.bf16.mxu0 %v7239_v2 }
 0x90a   : > { %3078 = vmatpush2.bf16.msra.mxu1 %v7234_v3 }
 0x90b   : > { %3079 = vmatprep.subr.bf16.mxu1 %v7242_v5  ;;  %v7270_v5 = vld [vmem:[%s7602_s12 + $0x70] ss:$8 sps:$4 sm:$0xff]  }
 0x90c   : > { %3121 = vmatpush2.bf16.msra.mxu0 %v7237_v4 }
 0x90d   : > { %3122 = vmatprep.subr.bf16.mxu0 %v7245_v8  ;;  %v7279_v8 = vld [vmem:[%s7602_s12 + $0x160] ss:$8 sps:$4 sm:$0xff]  }
 0x90e   : > { %3080 = vmatpush2.bf16.msra.mxu1 %v7240_v6  ;;  %v7273_v6 = vld [vmem:[%s7602_s12 + $0x170] ss:$8 sps:$4 sm:$0xff]  }
 0x90f   : > { %3081 = vmatprep.subr.bf16.mxu1 %v7248_v10  ;;  %v7284_v10 = vld [vmem:[%s7602_s12 + $0x54] ss:$8 sps:$4 sm:$0xff]  }
 0x910   : > { %3123 = vmatpush2.bf16.msra.mxu0 %v7243_v7  ;;  %v7278_v7 = vld [vmem:[%s7602_s12 + $0x64] ss:$8 sps:$4 sm:$0xff]  }
 0x911   : > { %3124 = vmatprep.subr.bf16.mxu0 %v7251_v11  ;;  %v7287_v11 = vld [vmem:[%s7602_s12 + $0x154] ss:$8 sps:$4 sm:$0xff]  }
 0x912   : > { %3082 = vmatpush2.bf16.msra.mxu1 %v7246_v12  ;;  %v7282_v12 = vld [vmem:[%s7602_s12 + $0x50] ss:$8 sps:$4 sm:$0xff]  }
 0x913   : > { %3083 = vmatprep.subr.bf16.mxu1 %v7254_v14  ;;  %v7290_v14 = vld [vmem:[%s7602_s12 + $0x44] ss:$8 sps:$4 sm:$0xff]  }
 0x914   : > { %3125 = vmatpush2.bf16.msra.mxu0 %v7249_v13  ;;  %v7285_v13 = vld [vmem:[%s7602_s12 + $0x150] ss:$8 sps:$4 sm:$0xff]  }
 0x915   : > { %3126 = vmatprep.subr.bf16.mxu0 %v7257_v18  ;;  %v7293_v18 = vld [vmem:[%s7602_s12 + $0x144] ss:$8 sps:$4 sm:$0xff]  }
 0x916   : > { %3084 = vmatpush2.bf16.msra.mxu1 %v7252_v19  ;;  %v7288_v19 = vld [vmem:[%s7602_s12 + $0x40] ss:$8 sps:$4 sm:$0xff]  }
 0x917   : > { %3085 = vmatprep.subr.bf16.mxu1 %v7260_v23  ;;  %v7296_v23 = vld [vmem:[%s7602_s12 + $0x34] ss:$8 sps:$4 sm:$0xff]  }
 0x918   : > { %3127 = vmatpush2.bf16.msra.mxu0 %v7255_v21  ;;  %v7291_v21 = vld [vmem:[%s7602_s12 + $0x140] ss:$8 sps:$4 sm:$0xff]  }
 0x919   : > { %3128 = vmatprep.subr.bf16.mxu0 %v7263_v24  ;;  %v7299_v24 = vld [vmem:[%s7602_s12 + $0x134] ss:$8 sps:$4 sm:$0xff]  }
 0x91a   : > { %3086 = vmatpush2.bf16.msra.mxu1 %v7258_v25  ;;  %v7294_v25 = vld [vmem:[%s7602_s12 + $0x30] ss:$8 sps:$4 sm:$0xff]  }
 0x91b   : > { %3087 = vmatprep.subr.bf16.mxu1 %v7266_v27  ;;  %v7302_v27 = vld [vmem:[%s7602_s12 + $0x24] ss:$8 sps:$4 sm:$0xff]  }
 0x91c   : > { %3129 = vmatpush2.bf16.msra.mxu0 %v7261_v26  ;;  %v7297_v26 = vld [vmem:[%s7602_s12 + $0x130] ss:$8 sps:$4 sm:$0xff]  }
 0x91d   : > { %3130 = vmatprep.subr.bf16.mxu0 %v7269_v22  ;;  %v7305_v22 = vld [vmem:[%s7602_s12 + $0x124] ss:$8 sps:$4 sm:$0xff]  }
 0x91e   : > { %3088 = vmatpush2.bf16.msra.mxu1 %v7264_v17  ;;  %v7300_v17 = vld [vmem:[%s7602_s12 + $0x20] ss:$8 sps:$4 sm:$0xff]  }
 0x91f   : > { %3603 = vmatprep.subr.bf16.mxu1 %v7272_v41  ;;  %v7308_v41 = vld [vmem:[%s7602_s12 + $0x14] ss:$8 sps:$4 sm:$0xff]  }
 0x920   : > { %3131 = vmatpush2.bf16.msra.mxu0 %v7267_v40  ;;  %v7303_v40 = vld [vmem:[%s7602_s12 + $0x120] ss:$8 sps:$4 sm:$0xff]  }
 0x921   : > { %3646 = vmatprep.subr.bf16.mxu0 %v7275_v29  ;;  %v7311_v29 = vld [vmem:[%s7602_s12 + $0x114] ss:$8 sps:$4 sm:$0xff]  }
 0x96e   : > { %v2589_v38 = vpop.xlane.xlu0 %2588 }
 0x96f   : > { %v2593_v49 = vmul.f32 0.00390625, %v2589_v38  ;;  %v2586_v38 = vld [vmem:[%s7587_s24] sm:$0x3] }
 0x971   : > { %v8067_v50 = vsub.f32 %v8016_v61, %v2593_v49  ;;  %v8070_v51 = vsub.f32 %v8018_v28, %v2593_v49 }
 0x972   : > { %v2592_v54 = vpop.xlane.xlu1 %2591 }
 0x973   : > { %v2594_v55 = vmul.f32 0.00390625, %v2592_v54  ;;  %v2599_v56 = vmul.f32 %v8067_v50, %v8067_v50  ;;  %v2600_v57 = vmul.f32 %v8070_v51, %v8070_v51  ;;  %v2623_v54 = vrot.slane %v2585_v48, %v7754_v32 }
 0x975   : > { %v8077_v58 = vsub.f32 %v8024_v63, %v2594_v55  ;;  %v8080_v59 = vsub.f32 %v8026_v45, %v2594_v55  ;;  %v2603_v60 = vadd.f32 %v2600_v57, %v2599_v56  ;;  %v2627_v55 = vrot.slane %v2585_v48, %v7758_v34  ;;  %v7320_v48 = vld [vmem:[%s7602_s12 + $0xf4] ss:$8 sps:$4 sm:$0xff]  }
 0x977   : > { %2604 = vadd.xlane.f32.xlu0 %v2603_v60  ;;  %v2601_v44 = vmul.f32 %v8077_v58, %v8077_v58  ;;  %v2602_v35 = vmul.f32 %v8080_v59, %v8080_v59  ;;  %v2638_v60 = vrot.slane %v2586_v38, %v7754_v32 }
 0x979   : > { %v2606_v37 = vadd.f32 %v2602_v35, %v2601_v44  ;;  %v2642_v44 = vrot.slane %v2586_v38, %v7758_v34  ;;  %v7318_v38 = vld [vmem:[%s7602_s12 + $0xf0] ss:$8 sps:$4 sm:$0xff]  }
 0x97b   : > { %2607 = vadd.xlane.f32.xlu1 %v2606_v37 }
 0xa00   : > { %v2605_v43 = vpop.xlane.xlu0 %2604 }
 0xa01   : > { %v2609_v46 = vmul.f32 0.00390625, %v2605_v43  ;;  %v7306_v43 = vld [vmem:[%s7602_s12 + $0x10] ss:$8 sps:$4 sm:$0xff]  }
 0xa03   : > { %v2611_v33 = vadd.f32 1e-06, %v2609_v46  ;;  %v7309_v46 = vld [vmem:[%s7602_s12 + $0x110] ss:$8 sps:$4 sm:$0xff]  }
 0xa04   : > { %v2608_v36 = vpop.xlane.xlu1 %2607 }
 0xa05   : > { %7450 = vrsqrt.f32 %v2611_v33  ;;  %v2610_v30 = vmul.f32 0.00390625, %v2608_v36  ;;  %v7314_v33 = vld [vmem:[%s7602_s12 + $0x4] ss:$8 sps:$4 sm:$0xff]  }
 0xa06   : > { %v7317_v36 = vld [vmem:[%s7602_s12 + $0x104] ss:$8 sps:$4 sm:$0xff]  }
 0xa07   : > { %v2612_v47 = vadd.f32 1e-06, %v2610_v30  ;;  %v7312_v30 = vld [vmem:[%s7602_s12] ss:$8 sps:$4 sm:$0xff]  }
 0xa09   : > { %7452 = vrsqrt.f32 %v2612_v47  ;;  %v7315_v47 = vld [vmem:[%s7602_s12 + $0x100] ss:$8 sps:$4 sm:$0xff]  }
 0xa12   : > { %v7451_v39 = vpop.eup %7450 }
 0xa13   : > { %v2616_v49 = vmul.f32 %v7451_v39, %v8070_v51  ;;  %v2615_v56 = vmul.f32 %v7451_v39, %v8067_v50  ;;  %v7323_v39 = vld [vmem:[%s7602_s12 + $0x1f4] ss:$8 sps:$4 sm:$0xff]  }
 0xa15   : > { %v2631_v37 = vmul.f32 %v2627_v55, %v2616_v49  ;;  %v2630_v62 = vmul.f32 %v2623_v54, %v2615_v56  ;;  %v7321_v49 = vld [vmem:[%s7602_s12 + $0x1f0] ss:$8 sps:$4 sm:$0xff]   ;;  %v7324_v56 = vld [vmem:[%s7602_s12 + $0xe0] ss:$8 sps:$4 sm:$0xff]  }
 0xa16   : > { %v7453_v57 = vpop.eup %7452 }
 0xa17   : > { %v2618_v35 = vmul.f32 %v7453_v57, %v8080_v59  ;;  %v2617_v51 = vmul.f32 %v7453_v57, %v8077_v58  ;;  %v2646_v1 = vadd.f32 %v2642_v44, %v2631_v37  ;;  %v2645_v53 = vadd.f32 %v2638_v60, %v2630_v62  ;;  %v7281_v59 = vld [vmem:[%s7602_s12 + $0x164] ss:$8 sps:$4 sm:$0xff]   ;;  %v7276_v58 = vld [vmem:[%s7602_s12 + $0x60] ss:$8 sps:$4 sm:$0xff]   ;;  %v7333_v37 = vld [vmem:[%s7602_s12 + $0x1d0] ss:$8 sps:$4 sm:$0xff]  }
 0xa18   : > { %v7327_v57 = vld [vmem:[%s7602_s12 + $0x1e0] ss:$8 sps:$4 sm:$0xff]   ;;  %v7341_v62 = vld [vmem:[%s7602_s12 + $0x1c4] ss:$8 sps:$4 sm:$0xff]  }
 0xa19   : > { %v2633_v0 = vmul.f32 %v2627_v55, %v2618_v35  ;;  %v2632_v52 = vmul.f32 %v2623_v54, %v2617_v51  ;;  %v7326_v54 = vld [vmem:[%s7602_s12 + $0xe4] ss:$8 sps:$4 sm:$0xff]   ;;  %v7330_v35 = vld [vmem:[%s7602_s12 + $0xd0] ss:$8 sps:$4 sm:$0xff]  }
 0xa1a   : > { %v7329_v55 = vld [vmem:[%s7602_s12 + $0x1e4] ss:$8 sps:$4 sm:$0xff]  }
 0xa1b   : > { %v2648_v50 = vadd.f32 %v2642_v44, %v2633_v0  ;;  %v2647_v2 = vadd.f32 %v2638_v60, %v2632_v52  ;;  %v7332_v60 = vld [vmem:[%s7602_s12 + $0xd4] ss:$8 sps:$4 sm:$0xff]   ;;  %v7338_v51 = vld [vmem:[%s7602_s12 + $0xc4] ss:$8 sps:$4 sm:$0xff]   ;;  %v7336_v0 = vld [vmem:[%s7602_s12 + $0xc0] ss:$8 sps:$4 sm:$0xff]  }
 0xa1c   : > { %v7335_v44 = vld [vmem:[%s7602_s12 + $0x1d4] ss:$8 sps:$4 sm:$0xff]   ;;  %v7339_v52 = vld [vmem:[%s7602_s12 + $0x1c0] ss:$8 sps:$4 sm:$0xff]  }
 0xa1d   : > { %v2714_v3 = vpack.c.bf16 %v2648_v50, %v2646_v1  ;;  %v2713_v4 = vpack.c.bf16 %v2647_v2, %v2645_v53  ;;  %v7344_v1 = vld [vmem:[%s7602_s12 + $0xb4] ss:$8 sps:$4 sm:$0xff]   ;;  %v7342_v53 = vld [vmem:[%s7602_s12 + $0xb0] ss:$8 sps:$4 sm:$0xff]  }
 0xa1e   : > { %v7347_v50 = vld [vmem:[%s7602_s12 + $0x1b4] ss:$8 sps:$4 sm:$0xff]   ;;  %v7345_v2 = vld [vmem:[%s7602_s12 + $0x1b0] ss:$8 sps:$4 sm:$0xff]  }
 0xa1f   : > { %3089 = vmatprep.mubr.bf16.mxu1 %v2714_v3  ;;  %3132 = vmatprep.mubr.bf16.mxu0 %v2714_v3  ;;  %v7350_v3 = vld [vmem:[%s7602_s12 + $0xa4] ss:$8 sps:$4 sm:$0xff]  }
 0xa20   : > { %3090 = vmatmul.mubr.bf16.vlgmr.msra.gmra.mxu1 %v2713_v4  ;;  %3133 = vmatmul.mubr.bf16.vlgmr.msra.gmra.mxu0 %v2713_v4  ;;  %v7353_v4 = vld [vmem:[%s7602_s12 + $0x1a4] ss:$8 sps:$4 sm:$0xff]  }
 0xa21   : > { %3604 = vmatpush1.bf16.msra.mxu1 %v7270_v5  ;;  %3647 = vmatpush1.bf16.msra.mxu0 %v7273_v6  ;;  %v7348_v5 = vld [vmem:[%s7602_s12 + $0xa0] ss:$8 sps:$4 sm:$0xff]  }
 0xa22   : > { %3605 = vmatprep.subr.bf16.mxu1 %v7278_v7  ;;  %3648 = vmatprep.subr.bf16.mxu0 %v7281_v59  ;;  %v7351_v6 = vld [vmem:[%s7602_s12 + $0x1a0] ss:$8 sps:$4 sm:$0xff]   ;;  %v7356_v7 = vld [vmem:[%s7602_s12 + $0x94] ss:$8 sps:$4 sm:$0xff]  }
 0xa23   : > { %v7359_v59 = vld [vmem:[%s7602_s12 + $0x194] ss:$8 sps:$4 sm:$0xff]  }
 0xa25   : > { %3606 = vmatpush1.bf16.msra.mxu1 %v7276_v58  ;;  %3649 = vmatpush1.bf16.msra.mxu0 %v7279_v8  ;;  %v7354_v58 = vld [vmem:[%s7602_s12 + $0x90] ss:$8 sps:$4 sm:$0xff]  }
 0xa26   : > { %3607 = vmatprep.subr.bf16.mxu1 %v7284_v10  ;;  %3650 = vmatprep.subr.bf16.mxu0 %v7287_v11  ;;  %v7357_v8 = vld [vmem:[%s7602_s12 + $0x190] ss:$8 sps:$4 sm:$0xff]   ;;  %v7360_v10 = vld [vmem:[%s7602_s12 + $0x80] ss:$8 sps:$4 sm:$0xff]   ;;  %v7362_v11 = vld [vmem:[%s7602_s12 + $0x84] ss:$8 sps:$4 sm:$0xff]  }
 0xa29   : > { %3608 = vmatpush1.bf16.msra.mxu1 %v7282_v12  ;;  %3651 = vmatpush1.bf16.msra.mxu0 %v7285_v13  ;;  %v7363_v12 = vld [vmem:[%s7602_s12 + $0x180] ss:$8 sps:$4 sm:$0xff]   ;;  %v7365_v13 = vld [vmem:[%s7602_s12 + $0x184] ss:$8 sps:$4 sm:$0xff]  }
 0xa2a   : > { %3609 = vmatprep.subr.bf16.mxu1 %v7290_v14  ;;  %3652 = vmatprep.subr.bf16.mxu0 %v7293_v18  ;;  %v7366_v14 = vld [vmem:[%s8690_s28 + $0x78] sm:$0xff]   ;;  %v2715_v18 = vld [vmem:[%s8691_s1] sm:$0xf]  ;;  %s8701_s1 = sld [smem:[#allocation12_spill]] }
 0xa2d   : > { %3610 = vmatpush1.bf16.msra.mxu1 %v7288_v19  ;;  %3653 = vmatpush1.bf16.msra.mxu0 %v7291_v21  ;;  %v2720_v19 = vrot.slane %v2715_v18, %v7754_v32  ;;  %v2728_v21 = vrot.slane %v2715_v18, %v7913_v16 }
 0xa2e   : > { %3611 = vmatprep.subr.bf16.mxu1 %v7296_v23  ;;  %3654 = vmatprep.subr.bf16.mxu0 %v7299_v24  ;;  %v2724_v23 = vrot.slane %v2715_v18, %v7758_v34  ;;  %v2732_v24 = vrot.slane %v2715_v18, %v7946_v9 }
 0xa31   : > { %3612 = vmatpush1.bf16.msra.mxu1 %v7294_v25  ;;  %3655 = vmatpush1.bf16.msra.mxu0 %v7297_v26 }
 0xa32   : > { %3613 = vmatprep.subr.bf16.mxu1 %v7302_v27  ;;  %3656 = vmatprep.subr.bf16.mxu0 %v7305_v22 }
 0xa35   : > { %3614 = vmatpush1.bf16.msra.mxu1 %v7300_v17  ;;  %3657 = vmatpush1.bf16.msra.mxu0 %v7303_v40 }
 0xa36   : > { %3615 = vmatprep.subr.bf16.mxu1 %v7308_v41  ;;  %3658 = vmatprep.subr.bf16.mxu0 %v7311_v29 }
 0xa39   : > { %3616 = vmatpush1.bf16.msra.mxu1 %v7306_v43  ;;  %3659 = vmatpush1.bf16.msra.mxu0 %v7309_v46 }
 0xa3a   : > { %3617 = vmatprep.subr.bf16.mxu1 %v7314_v33  ;;  %3660 = vmatprep.subr.bf16.mxu0 %v7317_v36 }
 0xa3d   : > { %3618 = vmatpush1.bf16.msra.mxu1 %v7312_v30  ;;  %3661 = vmatpush1.bf16.msra.mxu0 %v7315_v47 }
 0xa3e   : > { %3619 = vmatprep.subr.bf16.mxu1 %v7320_v48  ;;  %3662 = vmatprep.subr.bf16.mxu0 %v7323_v39 }
 0xa41   : > { %3620 = vmatpush2.bf16.msra.mxu1 %v7318_v38  ;;  %3663 = vmatpush2.bf16.msra.mxu0 %v7321_v49 }
 0xa42   : > { %3621 = vmatprep.subr.bf16.mxu1 %v7326_v54  ;;  %3664 = vmatprep.subr.bf16.mxu0 %v7329_v55 }
 0xa45   : > { %3622 = vmatpush2.bf16.msra.mxu1 %v7324_v56  ;;  %3665 = vmatpush2.bf16.msra.mxu0 %v7327_v57 }
 0xa46   : > { %3623 = vmatprep.subr.bf16.mxu1 %v7332_v60  ;;  %3666 = vmatprep.subr.bf16.mxu0 %v7335_v44 }
 0xa49   : > { %3624 = vmatpush2.bf16.msra.mxu1 %v7330_v35  ;;  %3667 = vmatpush2.bf16.msra.mxu0 %v7333_v37 }
 0xa4a   : > { %3625 = vmatprep.subr.bf16.mxu1 %v7338_v51  ;;  %3668 = vmatprep.subr.bf16.mxu0 %v7341_v62 }
 0xa4d   : > { %3626 = vmatpush2.bf16.msra.mxu1 %v7336_v0  ;;  %3669 = vmatpush2.bf16.msra.mxu0 %v7339_v52 }
 0xa4e   : > { %3627 = vmatprep.subr.bf16.mxu1 %v7344_v1  ;;  %3670 = vmatprep.subr.bf16.mxu0 %v7347_v50 }
 0xa51   : > { %3628 = vmatpush2.bf16.msra.mxu1 %v7342_v53  ;;  %3671 = vmatpush2.bf16.msra.mxu0 %v7345_v2 }
 0xa52   : > { %3629 = vmatprep.subr.bf16.mxu1 %v7350_v3  ;;  %3672 = vmatprep.subr.bf16.mxu0 %v7353_v4 }
 0xa55   : > { %3630 = vmatpush2.bf16.msra.mxu1 %v7348_v5  ;;  %3673 = vmatpush2.bf16.msra.mxu0 %v7351_v6 }
 0xa56   : > { %3631 = vmatprep.subr.bf16.mxu1 %v7356_v7  ;;  %3674 = vmatprep.subr.bf16.mxu0 %v7359_v59 }
 0xa59   : > { %3632 = vmatpush2.bf16.msra.mxu1 %v7354_v58  ;;  %3675 = vmatpush2.bf16.msra.mxu0 %v7357_v8 }
 0xa5a   : > { %3633 = vmatprep.subr.bf16.mxu1 %v7362_v11  ;;  %3676 = vmatprep.subr.bf16.mxu0 %v7365_v13 }
 0xa5d   : > { %3634 = vmatpush2.bf16.msra.mxu1 %v7360_v10  ;;  %3677 = vmatpush2.bf16.msra.mxu0 %v7363_v12 }
 0xa5e   : > { %6788 = vmatprep.subr.bf16.mxu0 %v7521_v15  ;;  %6646 = vmatprep.subr.bf16.mxu1 %v7366_v14 }
 0xae0   : > { %v3091_v25 = vpop.f32.mrf.mxu1  ;;  %v3134_v26 = vpop.f32.mrf.mxu0 }
 0xae1   : > { %v8195_v27 = vadd.f32 %v3091_v25, %v2720_v19  ;;  %v8197_v22 = vadd.f32 %v3134_v26, %v2728_v21 }
 0xae2   : > { %v3093_v17 = vpop.f32.mrf.mxu1  ;;  %v3136_v40 = vpop.f32.mrf.mxu0 }
 0xae3   : > { %v3143_v41 = vmul.f32 %v8195_v27, %v8195_v27  ;;  %v3145_v29 = vmul.f32 %v8197_v22, %v8197_v22  ;;  %v8203_v43 = vadd.f32 %v3093_v17, %v2724_v23  ;;  %v8205_v46 = vadd.f32 %v3136_v40, %v2732_v24 }
 0xae4   : > { %v3095_v33 = vpop.f32.mrf.mxu1  ;;  %v3138_v36 = vpop.f32.mrf.mxu0 }
 0xae5   : > { %v3151_v30 = vmul.f32 %v3143_v41, %v8195_v27  ;;  %v3153_v47 = vmul.f32 %v3145_v29, %v8197_v22  ;;  %v3144_v48 = vmul.f32 %v8203_v43, %v8203_v43  ;;  %v3146_v39 = vmul.f32 %v8205_v46, %v8205_v46 }
 0xae6   : > { %v8213_v38 = vadd.f32 %v3095_v33, %v2720_v19  ;;  %v8215_v49 = vadd.f32 %v3138_v36, %v2728_v21  ;;  %v3097_v54 = vpop.f32.mrf.mxu1  ;;  %v3140_v55 = vpop.f32.mrf.mxu0 }
 0xae7   : > { %v3159_v56 = vmul.f32 0.044715, %v3151_v30  ;;  %v3161_v57 = vmul.f32 0.044715, %v3153_v47  ;;  %v3152_v60 = vmul.f32 %v3144_v48, %v8203_v43  ;;  %v3154_v44 = vmul.f32 %v3146_v39, %v8205_v46 }
 0xae8   : > { %v3147_v35 = vmul.f32 %v8213_v38, %v8213_v38  ;;  %v3149_v37 = vmul.f32 %v8215_v49, %v8215_v49  ;;  %v8223_v51 = vadd.f32 %v3097_v54, %v2724_v23  ;;  %v8225_v62 = vadd.f32 %v3140_v55, %v2732_v24 }
 0xae9   : > { %v3167_v0 = vadd.f32 %v3159_v56, %v8195_v27  ;;  %v3169_v52 = vadd.f32 %v3161_v57, %v8197_v22  ;;  %v3160_v1 = vmul.f32 0.044715, %v3152_v60  ;;  %v3162_v50 = vmul.f32 0.044715, %v3154_v44 }
 0xaea   : > { %v3155_v53 = vmul.f32 %v3147_v35, %v8213_v38  ;;  %v3157_v2 = vmul.f32 %v3149_v37, %v8215_v49  ;;  %v3148_v3 = vmul.f32 %v8223_v51, %v8223_v51  ;;  %v3150_v4 = vmul.f32 %v8225_v62, %v8225_v62 }
 0xaeb   : > { %v3175_v5 = vmul.f32 0.7978846, %v3167_v0  ;;  %v3177_v6 = vmul.f32 0.7978846, %v3169_v52  ;;  %v3168_v7 = vadd.f32 %v3160_v1, %v8203_v43  ;;  %v3170_v59 = vadd.f32 %v3162_v50, %v8205_v46 }
 0xaec   : > { %v3163_v58 = vmul.f32 0.044715, %v3155_v53  ;;  %v3165_v8 = vmul.f32 0.044715, %v3157_v2  ;;  %v3156_v10 = vmul.f32 %v3148_v3, %v8223_v51  ;;  %v3158_v11 = vmul.f32 %v3150_v4, %v8225_v62 }
 0xaed   : > { %7454 = vtanh.f32 %v3175_v5  ;;  %v3176_v12 = vmul.f32 0.7978846, %v3168_v7  ;;  %v3178_v13 = vmul.f32 0.7978846, %v3170_v59 }
 0xaee   : > { %7456 = vtanh.f32 %v3177_v6  ;;  %v3171_v14 = vadd.f32 %v3163_v58, %v8213_v38  ;;  %v3173_v18 = vadd.f32 %v3165_v8, %v8215_v49  ;;  %v3164_v19 = vmul.f32 0.044715, %v3156_v10 }
 0xaef   : > { %7458 = vtanh.f32 %v3176_v12  ;;  %v3166_v21 = vmul.f32 0.044715, %v3158_v11 }
 0xaf0   : > { %7460 = vtanh.f32 %v3178_v13  ;;  %v3179_v23 = vmul.f32 0.7978846, %v3171_v14  ;;  %v3181_v24 = vmul.f32 0.7978846, %v3173_v18  ;;  %v3172_v25 = vadd.f32 %v3164_v19, %v8223_v51  ;;  %v7368_v14 = vld [vmem:[%s8690_s28 + $0x70] sm:$0xff]   ;;  %v7374_v18 = vld [vmem:[%s8690_s28 + $0x58] sm:$0xff]  }
 0xaf1   : > { %v3174_v26 = vadd.f32 %v3166_v21, %v8225_v62  ;;  %v7375_v19 = vld [vmem:[%s8690_s28 + $0x18] sm:$0xff]   ;;  %v7376_v21 = vld [vmem:[%s8690_s28 + $0x50] sm:$0xff]  }
 0xaf2   : > { %7462 = vtanh.f32 %v3179_v23  ;;  %v3180_v17 = vmul.f32 0.7978846, %v3172_v25  ;;  %v7377_v23 = vld [vmem:[%s8690_s28 + $0x10] sm:$0xff]   ;;  %v7379_v25 = vld [vmem:[%s8690_s28 + $0x8] sm:$0xff]  }
 0xaf3   : > { %7464 = vtanh.f32 %v3181_v24  ;;  %v3182_v40 = vmul.f32 0.7978846, %v3174_v26  ;;  %v7378_v24 = vld [vmem:[%s8690_s28 + $0x48] sm:$0xff]   ;;  %v7380_v26 = vld [vmem:[%s8690_s28 + $0x40] sm:$0xff]  }
 0xaf4   : > { %7466 = vtanh.f32 %v3180_v17  ;;  %v7381_v17 = vld [vmem:[%s8690_s28] sm:$0xff]  }
 0xaf5   : > { %7468 = vtanh.f32 %v3182_v40 }
 0xafa   : > { %v7455_v41 = vpop.eup %7454 }
 0xafb   : > { %v7457_v29 = vpop.eup %7456  ;;  %v3191_v48 = vadd.f32 1.0, %v7455_v41 }
 0xafc   : > { %v7459_v33 = vpop.eup %7458  ;;  %v3193_v55 = vadd.f32 1.0, %v7457_v29 }
 0xafd   : > { %v7461_v36 = vpop.eup %7460  ;;  %v3192_v30 = vadd.f32 1.0, %v7459_v33  ;;  %v3199_v52 = vmul.f32 0.5, %v3191_v48 }
 0xafe   : > { %v3194_v39 = vadd.f32 1.0, %v7461_v36  ;;  %v3201_v2 = vmul.f32 0.5, %v3193_v55 }
 0xaff   : > { %v7463_v47 = vpop.eup %7462  ;;  %v3200_v0 = vmul.f32 0.5, %v3192_v30  ;;  %v3207_v58 = vmul.f32 %v3199_v52, %v8195_v27  ;;  %v7369_v27 = vld [vmem:[%s8690_s28 + $0x30] sm:$0xff]  }
 0xb00   : > { %v7465_v54 = vpop.eup %7464  ;;  %v3195_v56 = vadd.f32 1.0, %v7463_v47  ;;  %v3202_v53 = vmul.f32 0.5, %v3194_v39  ;;  %v3209_v11 = vmul.f32 %v3201_v2, %v8197_v22  ;;  %v7370_v22 = vld [vmem:[%s8690_s28 + $0x68] sm:$0xff]   ;;  %v3693_v39 = vld [vmem:[%s8692_s2] sm:$0x3]  ;;  %s8702_s2 = sld [smem:[#allocation16_spill]] }
 0xb01   : > { %v7467_v57 = vpop.eup %7466  ;;  %v3197_v60 = vadd.f32 1.0, %v7465_v54  ;;  %v3208_v7 = vmul.f32 %v3200_v0, %v8203_v43  ;;  %v3698_v0 = vrot.slane %v3693_v39, %v7754_v32 }
 0xb02   : > { %v7469_v44 = vpop.eup %7468  ;;  %v3203_v35 = vmul.f32 0.5, %v3195_v56  ;;  %v3196_v37 = vadd.f32 1.0, %v7467_v57  ;;  %v3210_v8 = vmul.f32 %v3202_v53, %v8205_v46  ;;  %v7371_v46 = vld [vmem:[%s8690_s28 + $0x28] sm:$0xff]  }
 0xb03   : > { %v3205_v1 = vmul.f32 0.5, %v3197_v60  ;;  %v3198_v50 = vadd.f32 1.0, %v7469_v44  ;;  %v3702_v60 = vrot.slane %v3693_v39, %v7758_v34  ;;  %v7402_v39 = vld [vmem:[%s8695_s11 + $0x8] sm:$0xff]  }
 0xb04   : > { %v3204_v3 = vmul.f32 0.5, %v3196_v37  ;;  %v3211_v4 = vmul.f32 %v3203_v35, %v8213_v38  ;;  %v7367_v38 = vld [vmem:[%s8690_s28 + $0x38] sm:$0xff]  }
 0xb05   : > { %v3206_v5 = vmul.f32 0.5, %v3198_v50  ;;  %v3213_v6 = vmul.f32 %v3205_v1, %v8215_v49 }
 0xb06   : > { %v3212_v59 = vmul.f32 %v3204_v3, %v8223_v51  ;;  %v3279_v49 = vpack.c.bf16 %v3211_v4, %v3207_v58  ;;  %v7372_v51 = vld [vmem:[%s8690_s28 + $0x60] sm:$0xff]  }
 0xb07   : > { %v3214_v10 = vmul.f32 %v3206_v5, %v8225_v62  ;;  %v3281_v43 = vpack.c.bf16 %v3213_v6, %v3209_v11  ;;  %v7373_v62 = vld [vmem:[%s8690_s28 + $0x20] sm:$0xff]   ;;  %v7390_v11 = vld [vmem:[%s8695_s11 + $0x38] sm:$0xff]  }
 0xb08   : > { %v3280_v12 = vpack.c.bf16 %v3212_v59, %v3208_v7 }
 0xb09   : > { %v3282_v13 = vpack.c.bf16 %v3214_v10, %v3210_v8  ;;  %v7382_v8 = vld [vmem:[%s8694_s10 + $0x38] sm:$0xff]   ;;  %v7383_v10 = vld [vmem:[%s8694_s10 + $0x30] sm:$0xff]  }
 0xb0a   : > { %3635 = vmatprep.mubr.bf16.mxu1 %v3280_v12  ;;  %v7384_v12 = vld [vmem:[%s8694_s10 + $0x28] sm:$0xff]  }
 0xb0b   : > { %3678 = vmatprep.mubr.bf16.mxu0 %v3282_v13  ;;  %3636 = vmatmul.mubr.bf16.vlgmr.msra.gmra.mxu1 %v3279_v49  ;;  %v7386_v13 = vld [vmem:[%s8694_s10 + $0x18] sm:$0xff]   ;;  %v7387_v49 = vld [vmem:[%s8694_s10 + $0x10] sm:$0xff]  }
 0xb0c   : > { %3679 = vmatmul.mubr.bf16.vlgmr.msra.gmra.mxu0 %v3281_v43  ;;  %6647 = vmatpush3.bf16.msra.mxu1 %v7367_v38  ;;  %v7385_v38 = vld [vmem:[%s8694_s10 + $0x20] sm:$0xff]  }
 0xb0d   : > { %6648 = vmatprep.subr.bf16.mxu1 %v7368_v14  ;;  %6804 = vmatprep.mubr.msk.bf16.mxu0 %vm7522_vm1, %v7521_v15  ;;  %v7388_v14 = vld [vmem:[%s8694_s10 + $0x8] sm:$0xff]   ;;  %v7389_v43 = vld [vmem:[%s8694_s10] sm:$0xff]  }
 0xb0e   : > { %6789 = vmatpush3.bf16.msra.mxu0 %v7390_v11 }
 0xb0f   : > { %6790 = vmatprep.subr.bf16.mxu0 %v7521_v15 }
 0xb10   : > { %6649 = vmatpush3.bf16.msra.mxu1 %v7369_v27  ;;  %v8296_v27 = vld [vmem:[%s8696_s15] sm:$0x1f]  ;;  %s8704_s15 = sld [smem:[#allocation19_spill]] }
 0xb11   : > { %6650 = vmatprep.subr.bf16.mxu1 %v7370_v22  ;;  %v3945_v22 = vpack.c.bf16 %v8296_v27, %v8296_v27 }
 0xb14   : > { %6651 = vmatpush3.bf16.msra.mxu1 %v7371_v46  ;;  %v7391_v46 = vld [vmem:[%s8697_s16 + $0x38] sm:$0xff]  }
 0xb15   : > { %6652 = vmatprep.subr.bf16.mxu1 %v7372_v51 }
 0xb18   : > { %6653 = vmatpush3.bf16.msra.mxu1 %v7373_v62 }
 0xb19   : > { %6654 = vmatprep.subr.bf16.mxu1 %v7374_v18 }
 0xb1c   : > { %6655 = vmatpush3.bf16.msra.mxu1 %v7375_v19 }
 0xb1d   : > { %6656 = vmatprep.subr.bf16.mxu1 %v7376_v21 }
 0xb20   : > { %6657 = vmatpush3.bf16.msra.mxu1 %v7377_v23 }
 0xb21   : > { %6658 = vmatprep.subr.bf16.mxu1 %v7378_v24 }
 0xb24   : > { %6659 = vmatpush3.bf16.msra.mxu1 %v7379_v25 }
 0xb25   : > { %6660 = vmatprep.subr.bf16.mxu1 %v7380_v26  ;;  %v7392_v26 = vld [vmem:[%s8695_s11 + $0x30] sm:$0xff]  }
 0xb26   : > { %6791 = vmatpush3.bf16.msra.mxu0 %v7392_v26 }
 0xb27   : > { %6792 = vmatprep.subr.bf16.mxu0 %v7521_v15 }
 0xb28   : > { %6661 = vmatpush3.bf16.msra.mxu1 %v7381_v17  ;;  %v7393_v17 = vld [vmem:[%s8697_s16 + $0x30] sm:$0xff]  }
 0xb29   : > { %6768 = vmatprep.subr.bf16.mxu1 %v7521_v15 }
 0xbcb   : > { %v3637_v40 = vpop.f32.mrf.mxu1 }
 0xbcc   : > { %v3680_v41 = vpop.f32.mrf.mxu0 }
 0xbcd   : > { %v3639_v29 = vpop.f32.mrf.mxu1  ;;  %v3681_v47 = vadd.f32 %v3680_v41, %v3637_v40  ;;  %v7394_v40 = vld [vmem:[%s8695_s11 + $0x28] sm:$0xff]  }
 0xbce   : > { %v3682_v33 = vpop.f32.mrf.mxu0  ;;  %v7395_v41 = vld [vmem:[%s8697_s16 + $0x28] sm:$0xff]   ;;  %6793 = vmatpush3.bf16.msra.mxu0 %v7394_v40 }
 0xbcf   : > { %v3683_v36 = vadd.f32 %v3682_v33, %v3639_v29  ;;  %v3641_v30 = vpop.f32.mrf.mxu1  ;;  %v3689_v37 = vadd.f32 %v3681_v47, %v8016_v61  ;;  %6794 = vmatprep.subr.bf16.mxu0 %v7521_v15  ;;  %v7396_v29 = vld [vmem:[%s8695_s11 + $0x20] sm:$0xff]   ;;  %v7400_v47 = vld [vmem:[%s8695_s11 + $0x10] sm:$0xff]  }
 0xbd0   : > { %v3684_v48 = vpop.f32.mrf.mxu0  ;;  %v7397_v33 = vld [vmem:[%s8697_s16 + $0x20] sm:$0xff]  }
 0xbd1   : > { %v3685_v54 = vadd.f32 %v3684_v48, %v3641_v30  ;;  %v3643_v55 = vpop.f32.mrf.mxu1  ;;  %v3690_v57 = vadd.f32 %v3683_v36, %v8018_v28  ;;  %v3705_v2 = vadd.f32 %v3698_v0, %v3689_v37  ;;  %v7398_v36 = vld [vmem:[%s8695_s11 + $0x18] sm:$0xff]   ;;  %v7401_v48 = vld [vmem:[%s8697_s16 + $0x10] sm:$0xff]  }
 0xbd2   : > { %v3686_v56 = vpop.f32.mrf.mxu0  ;;  %6795 = vmatpush3.bf16.msra.mxu0 %v7396_v29  ;;  %v7399_v30 = vld [vmem:[%s8697_s16 + $0x18] sm:$0xff]  }
 0xbd3   : > { %v3691_v44 = vadd.f32 %v3685_v54, %v8024_v63  ;;  %v3687_v35 = vadd.f32 %v3686_v56, %v3643_v55  ;;  %v3706_v50 = vadd.f32 %v3702_v60, %v3690_v57  ;;  %v6432_v63 = vld [vmem:[%s8693_s7] ss:$0 sm:$0xff]  ;;  %6796 = vmatprep.subr.bf16.mxu0 %v7521_v15  ;;  %v7403_v54 = vld [vmem:[%s8697_s16 + $0x8] sm:$0xff]   ;;  %s8703_s7 = sld [smem:[#allocation17_spill]] }
 0xbd4   : > { %v7404_v55 = vld [vmem:[%s8695_s11] sm:$0xff]  }
 0xbd5   : > { %v3692_v52 = vadd.f32 %v3687_v35, %v8026_v45  ;;  %v3707_v1 = vadd.f32 %v3698_v0, %v3691_v44  ;;  %v7405_v56 = vld [vmem:[%s8697_s16] sm:$0xff]  }
 0xbd6   : > { %6797 = vmatpush3.bf16.msra.mxu0 %v7398_v36 }
 0xbd7   : > { %v3708_v53 = vadd.f32 %v3702_v60, %v3692_v52  ;;  %v3741_v4 = vpack.c.bf16 %v3707_v1, %v3705_v2  ;;  %6798 = vmatprep.subr.bf16.mxu0 %v7521_v15 }
 0xbd9   : > { %v3742_v3 = vpack.c.bf16 %v3708_v53, %v3706_v50 }
 0xbda   : > { %6799 = vmatpush3.bf16.msra.mxu0 %v7400_v47 }
 0xbdb   : > { %3878 = vmatprep.mubr.bf16.mxu1 %v3742_v3  ;;  %6800 = vmatprep.subr.bf16.mxu0 %v7521_v15 }
 0xbdc   : > { %3879 = vmatmul.mubr.bf16.vlgmr.msra.gmra.mxu1 %v3741_v4  ;;  %v6449_v4 = vld [vmem:[%s8698_s18] ss:$0 sm:$0xff]  ;;  %s8705_s18 = sld [smem:[#allocation18_spill]] }
 0xbdd   : > { %6784 = vmatprep.mubr.msk.bf16.mxu1 %vm7522_vm1, %v7521_v15  ;;  %6769 = vmatpush3.bf16.msra.mxu1 %v7382_v8 }
 0xbde   : > { %6770 = vmatprep.subr.bf16.mxu1 %v7521_v15  ;;  %6801 = vmatpush3.bf16.msra.mxu0 %v7402_v39 }
 0xbdf   : > { %6802 = vmatprep.subr.bf16.mxu0 %v7521_v15 }
 0xbe1   : > { %6771 = vmatpush3.bf16.msra.mxu1 %v7383_v10  ;;  %v6460_v10 = vld [vmem:[%s8700_s26] ss:$0 sm:$0xff]  ;;  %s8707_s26 = sld [smem:[#allocation20_spill]] }
 0xbe2   : > { %6772 = vmatprep.subr.bf16.mxu1 %v7521_v15  ;;  %6803 = vmatpush3.bf16.msra.mxu0 %v7404_v55 }
 0xbe3   : > { %6828 = vmatprep.subr.bf16.mxu0 %v7521_v15 }
 0xbe5   : > { %6773 = vmatpush3.bf16.msra.mxu1 %v7384_v12 }
 0xbe6   : > { %6774 = vmatprep.subr.bf16.mxu1 %v7521_v15 }
 0xbe9   : > { %6775 = vmatpush3.bf16.msra.mxu1 %v7385_v38 }
 0xbea   : > { %6776 = vmatprep.subr.bf16.mxu1 %v7521_v15 }
 0xbed   : > { %6777 = vmatpush3.bf16.msra.mxu1 %v7386_v13 }
 0xbee   : > { %6778 = vmatprep.subr.bf16.mxu1 %v7521_v15 }
 0xbf1   : > { %6779 = vmatpush3.bf16.msra.mxu1 %v7387_v49  ;;  %v6451_v49 = vld [vmem:[%s8701_s1] ss:$0 sm:$0xff]  ;;  %s6637_s1 = sshll.u32 %s8709_s23, 3 }
 0xbf2   : > { %6780 = vmatprep.subr.bf16.mxu1 %v7521_v15 }
 0xbf5   : > { %6781 = vmatpush3.bf16.msra.mxu1 %v7388_v14 }
 0xbf6   : > { %6782 = vmatprep.subr.bf16.mxu1 %v7521_v15 }
 0xbf9   : > { %6783 = vmatpush3.bf16.msra.mxu1 %v7389_v43 }
 0xbfa   : > { %6808 = vmatprep.subr.bf16.mxu1 %v7521_v15 }
 0xbfc   : > { %6785 = vmatmul.mubr.bf16.vlgmr.msra.gmra.mxu1 %v3945_v22 }
 0xbfd   : > { %6809 = vmatpush3.bf16.msra.mxu1 %v7391_v46  ;;  %6824 = vmatprep.mubr.msk.bf16.mxu1 %vm7522_vm1, %v7521_v15 }
 0xbfe   : > { %6810 = vmatprep.subr.bf16.mxu1 %v7521_v15 }
 0xc01   : > { %6811 = vmatpush3.bf16.msra.mxu1 %v7393_v17 }
 0xc02   : > { %6812 = vmatprep.subr.bf16.mxu1 %v7521_v15 }
 0xc05   : > { %6813 = vmatpush3.bf16.msra.mxu1 %v7395_v41 }
 0xc06   : > { %6814 = vmatprep.subr.bf16.mxu1 %v7521_v15 }
 0xc09   : > { %6815 = vmatpush3.bf16.msra.mxu1 %v7397_v33 }
 0xc0a   : > { %6816 = vmatprep.subr.bf16.mxu1 %v7521_v15 }
 0xc0d   : > { %6817 = vmatpush3.bf16.msra.mxu1 %v7399_v30 }
 0xc0e   : > { %6818 = vmatprep.subr.bf16.mxu1 %v7521_v15 }
 0xc11   : > { %6819 = vmatpush3.bf16.msra.mxu1 %v7401_v48 }
 0xc12   : > { %6820 = vmatprep.subr.bf16.mxu1 %v7521_v15 }
 0xc15   : > { %6821 = vmatpush3.bf16.msra.mxu1 %v7403_v54 }
 0xc16   : > { %6822 = vmatprep.subr.bf16.mxu1 %v7521_v15 }
 0xc19   : > { %6823 = vmatpush3.bf16.msra.mxu1 %v7405_v56  ;;  %v7406_v56 = vld [vmem:[%s8703_s7 + $0x38] sm:$0xff]  }
 0xc1a   : > { %6860 = vmatprep.subr.bf16.mxu1 %v7521_v15 }
 0xc9c   : > { %v6662_v28 = vpop.f32.mrf.mxu1 }
 0xc9e   : > { %v6663_v61 = vpop.f32.mrf.mxu1 }
 0xc9f   : > { %v6664_v5 = vadd.f32 %v6663_v61, %v6662_v28 }
 0xca0   : > { %v6665_v45 = vpop.f32.mrf.mxu1 }
 0xca1   : > { %v3881_v6 = vadd.f32 %v6664_v5, %v6432_v63  ;;  %v6450_v5 = vld [vmem:[%s8699_s0] ss:$0 sm:$0xff]  ;;  %s8706_s0 = sld [smem:[#allocation21_spill]] }
 0xca2   : > { %v6666_v7 = vpop.f32.mrf.mxu1 }
 0xca3   : > { %v6667_v59 = vadd.f32 %v6666_v7, %v6665_v45  ;;  %3889 = vadd.xlane.f32.xlu0 %v3881_v6 }
 0xca5   : > { %v3884_v58 = vadd.f32 %v6667_v59, %v6432_v63 }
 0xca7   : > { %3891 = vadd.xlane.f32.xlu1 %v3884_v58 }
 0xcbc   : > { %v4035_v57 = vpop.f32.mrf.mxu1 }
 0xcbe   : > { %v6786_v60 = vpop.f32.mrf.mxu1 }
 0xcbf   : > { %v7407_v60 = vld [vmem:[%s8703_s7 + $0x30] sm:$0xff]  }
 0xcc0   : > { %v4038_v44 = vpop.f32.mrf.mxu1 }
 0xcc1   : > { %v7408_v44 = vld [vmem:[%s8703_s7 + $0x28] sm:$0xff]  }
 0xcc2   : > { %v6787_v35 = vpop.f32.mrf.mxu1 }
 0xcc3   : > { %v7409_v35 = vld [vmem:[%s8703_s7 + $0x20] sm:$0xff]  }
 0xd2c   : > { %v3890_v51 = vpop.xlane.xlu0 %3889 }
 0xd2d   : > { %v3894_v62 = vmul.f32 0.0078125, %v3890_v51 }
 0xd2f   : > { %v8306_v18 = vsub.f32 %v3881_v6, %v3894_v62  ;;  %v4036_v62 = vadd.f32 %v6451_v49, %v4035_v57 }
 0xd30   : > { %v3892_v19 = vpop.xlane.xlu1 %3891 }
 0xd31   : > { %v3895_v21 = vmul.f32 0.0078125, %v3892_v19  ;;  %v3898_v23 = vmul.f32 %v8306_v18, %v8306_v18 }
 0xd33   : > { %v8310_v24 = vsub.f32 %v3884_v58, %v3895_v21  ;;  %3900 = vadd.xlane.f32.xlu0 %v3898_v23  ;;  %v4266_v21 = vpack.c.bf16 %v4036_v62, %v4036_v62 }
 0xd35   : > { %v3899_v25 = vmul.f32 %v8310_v24, %v8310_v24 }
 0xd37   : > { %3902 = vadd.xlane.f32.xlu1 %v3899_v25 }
 0xdbc   : > { %v3901_v37 = vpop.xlane.xlu0 %3900 }
 0xdbd   : > { %v3904_v0 = vmul.f32 0.0078125, %v3901_v37  ;;  %v7410_v37 = vld [vmem:[%s8703_s7 + $0x18] sm:$0xff]  }
 0xdbf   : > { %v3906_v52 = vadd.f32 1e-06, %v3904_v0  ;;  %v7411_v0 = vld [vmem:[%s8703_s7 + $0x10] sm:$0xff]  }
 0xdc0   : > { %v3903_v1 = vpop.xlane.xlu1 %3902 }
 0xdc1   : > { %7470 = vrsqrt.f32 %v3906_v52  ;;  %v3905_v50 = vmul.f32 0.0078125, %v3903_v1  ;;  %v7412_v52 = vld [vmem:[%s8703_s7 + $0x8] sm:$0xff]   ;;  %v7413_v1 = vld [vmem:[%s8703_s7] sm:$0xff]  }
 0xdc3   : > { %v3907_v53 = vadd.f32 1e-06, %v3905_v50  ;;  %v7414_v50 = vld [vmem:[%s8704_s15 + $0x38] sm:$0xff]  }
 0xdc5   : > { %7472 = vrsqrt.f32 %v3907_v53  ;;  %v7415_v53 = vld [vmem:[%s8704_s15 + $0x30] sm:$0xff]  }
 0xdce   : > { %v7471_v2 = vpop.eup %7470 }
 0xdcf   : > { %v3910_v3 = vmul.f32 %v7471_v2, %v8306_v18  ;;  %v6469_v18 = vld [vmem:[%s8702_s2] ss:$0 sm:$0xff]  ;;  %v7416_v2 = vld [vmem:[%s8704_s15 + $0x28] sm:$0xff]   ;;  %s1070_s2 = scalar_lea.vmem %s7707_s20, %s6637_s1 }
 0xdd1   : > { %v3918_v61 = vmul.f32 %v6449_v4, %v3910_v3  ;;  %v7417_v3 = vld [vmem:[%s8704_s15 + $0x20] sm:$0xff]  }
 0xdd2   : > { %v7473_v28 = vpop.eup %7472 }
 0xdd3   : > { %v3911_v63 = vmul.f32 %v7473_v28, %v8310_v24  ;;  %v3926_v6 = vadd.f32 %v6450_v5, %v3918_v61 }
 0xdd5   : > { %v3919_v45 = vmul.f32 %v6449_v4, %v3911_v63  ;;  %v7418_v4 = vld [vmem:[%s8704_s15 + $0x18] sm:$0xff]  }
 0xdd7   : > { %v3927_v7 = vadd.f32 %v6450_v5, %v3919_v45 }
 0xdd9   : > { %v8346_v59 = vpack.c.bf16 %v3927_v7, %v3926_v6  ;;  %v7419_v6 = vld [vmem:[%s8704_s15 + $0x10] sm:$0xff]   ;;  %v7420_v7 = vld [vmem:[%s8704_s15 + $0x8] sm:$0xff]  }
 0xddb   : > { %6805 = vmatmul.mubr.bf16.vlgmr.msra.gmra.mxu0 %v8346_v59  ;;  %6825 = vmatmul.mubr.bf16.vlgmr.msra.gmra.mxu1 %v8346_v59 }
 0xddc   : > { %6830 = vmatprep.mubr.msk.bf16.mxu0 %vm7522_vm1, %v7521_v15  ;;  %6876 = vmatprep.mubr.msk.bf16.mxu1 %vm7522_vm1, %v7521_v15 }
 0xddd   : > { %6861 = vmatpush3.bf16.msra.mxu1 %v7414_v50  ;;  %v4736_v50 = vld [vmem:[%s7697_s4 + $0xc0] sm:$0xff] }
 0xdde   : > { %6862 = vmatprep.subr.bf16.mxu1 %v7521_v15 }
 0xde1   : > { %6863 = vmatpush3.bf16.msra.mxu1 %v7415_v53 }
 0xde2   : > { %6864 = vmatprep.subr.bf16.mxu1 %v7521_v15 }
 0xde5   : > { %6865 = vmatpush3.bf16.msra.mxu1 %v7416_v2 }
 0xde6   : > { %6866 = vmatprep.subr.bf16.mxu1 %v7521_v15 }
 0xde9   : > { %6867 = vmatpush3.bf16.msra.mxu1 %v7417_v3  ;;  %v7427_v3 = vld [vmem:[%s8706_s0 + $0x10] sm:$0xff]  }
 0xdea   : > { %6868 = vmatprep.subr.bf16.mxu1 %v7521_v15 }
 0xded   : > { %6869 = vmatpush3.bf16.msra.mxu1 %v7418_v4  ;;  %v4712_v4 = vld [vmem:[%s7697_s4] sm:$0xff] }
 0xdee   : > { %6870 = vmatprep.subr.bf16.mxu1 %v7521_v15 }
 0xdf1   : > { %6871 = vmatpush3.bf16.msra.mxu1 %v7419_v6  ;;  %v4834_v6 = vld [vmem:[%s7697_s4 + $0x3d0] sm:$0xff] }
 0xdf2   : > { %6872 = vmatprep.subr.bf16.mxu1 %v7521_v15 }
 0xdf5   : > { %6873 = vmatpush3.bf16.msra.mxu1 %v7420_v7 }
 0xdf6   : > { %6874 = vmatprep.subr.bf16.mxu1 %v7521_v15 }
 0xe9b   : > { %v4147_v58 = vpop.f32.mrf.mxu0  ;;  %v4259_v8 = vpop.f32.mrf.mxu1 }
 0xe9c   : > { %v4148_v14 = vadd.f32 %v6460_v10, %v4147_v58  ;;  %v4260_v23 = vadd.f32 %v6469_v18, %v4259_v8  ;;  %v7421_v58 = vld [vmem:[%s8704_s15] sm:$0xff]  }
 0xe9d   : > { %v6806_v11 = vpop.f32.mrf.mxu0  ;;  %v6826_v12 = vpop.f32.mrf.mxu1  ;;  %6875 = vmatpush3.bf16.msra.mxu1 %v7421_v58  ;;  %v4824_v8 = vld [vmem:[%s7697_s4 + $0x380] sm:$0xff] }
 0xe9f   : > { %v4150_v38 = vpop.f32.mrf.mxu0  ;;  %v4262_v13 = vpop.f32.mrf.mxu1 }
 0xea0   : > { %v4151_v43 = vadd.f32 %v6460_v10, %v4150_v38  ;;  %v4263_v19 = vadd.f32 %v6469_v18, %v4262_v13  ;;  %v4832_v10 = vld [vmem:[%s7697_s4 + $0x3c0] sm:$0xff] }
 0xea1   : > { %v6807_v22 = vpop.f32.mrf.mxu0  ;;  %v6827_v46 = vpop.f32.mrf.mxu1  ;;  %v6619_v11 = vcombine.high %v4824_v8, %v4832_v10  ;;  %v6618_v12 = vcombine.low %v4824_v8, %v4832_v10  ;;  %v6479_v38 = vld [vmem:[%s8705_s18] ss:$0 sm:$0xff]  ;;  %v4810_v8 = vld [vmem:[%s7697_s4 + $0x310] sm:$0xff] }
 0xea2   : > { %v4267_v51 = vpack.c.bf16 %v4151_v43, %v4148_v14  ;;  %v4322_v24 = vpack.c.bf16 %v4263_v19, %v4260_v23  ;;  %v4808_v18 = vld [vmem:[%s7697_s4 + $0x300] sm:$0xff]  ;;  %v4818_v10 = vld [vmem:[%s7697_s4 + $0x350] sm:$0xff] }
 0xea3   : > { %5564 = vmatprep.subr.bf16.mxu1 %v6619_v11  ;;  %v4816_v19 = vld [vmem:[%s7697_s4 + $0x340] sm:$0xff] }
 0xea4   : > { %6829 = vmatpush3.bf16.xpose.msra.mxu0 %v4267_v51 }
 0xea5   : > { %6834 = vmatprep.subr.bf16.mxu0 %v7521_v15 }
 0xeab   : > { %6831 = vmatmul.mubr.bf16.vlgmr.msra.gmra.mxu0 %v4266_v21 }
 0xeac   : > { %6835 = vmatpush3.bf16.msra.mxu0 %v4322_v24  ;;  %6836 = vmatprep.mubr.msk.bf16.mxu0 %vm7522_vm1, %v7521_v15 }
 0xead   : > { %6840 = vmatprep.subr.bf16.mxu0 %v7521_v15 }
 0xf6b   : > { %v4302_v25 = vpop.f32.mrf.mxu0 }
 0xf6c   : > { %v4308_v26 = vmul.f32 0.088388346, %v4302_v25  ;;  %v6603_v25 = vcombine.high %v4808_v18, %v4816_v19 }
 0xf6d   : > { %v6832_v17 = vpop.f32.mrf.mxu0 }
 0xf6e   : > { %v4310_v40 = vsel %vm4309_vm3, %v4308_v26, -inf  ;;  %v4800_v17 = vld [vmem:[%s7697_s4 + $0x2c0] sm:$0xff] }
 0xf6f   : > { %4311 = vmax.xlane.f32.xlu0 %v4310_v40  ;;  %v4305_v41 = vpop.f32.mrf.mxu0  ;;  %v7422_v40 = vld [vmem:[%s8706_s0 + $0x38] sm:$0xff]  }
 0xf70   : > { %v7523_v41 = vmov 0  }
 0xf71   : > { %v6833_v29 = vpop.f32.mrf.mxu0 }
 0xff8   : > { %v4312_v33 = vpop.xlane.xlu0 %4311 }
 0xff9   : > { %v4313_v36 = vsub.f32 %v4308_v26, %v4312_v33  ;;  %v4792_v26 = vld [vmem:[%s7697_s4 + $0x280] sm:$0xff]  ;;  %v7423_v33 = vld [vmem:[%s8706_s0 + $0x30] sm:$0xff]  }
 0xffa   : > { %v6587_v29 = vcombine.high %v4792_v26, %v4800_v17 }
 0xffb   : > { %v4314_v30 = vmul.f32 1.442695, %v4313_v36  ;;  %v4776_v36 = vld [vmem:[%s7697_s4 + $0x200] sm:$0xff] }
 0xffd   : > { %7474 = vpow2.f32 %v4314_v30  ;;  %v4784_v30 = vld [vmem:[%s7697_s4 + $0x240] sm:$0xff] }
0x100a   : > { %v7475_v47 = vpop.eup %7474 }
0x100b   : > { %v4316_v48 = vsel %vm4309_vm3, %v7475_v47, 0.0 }
0x100c   : > { %4317 = vadd.xlane.f32.xlu1 %v4316_v48  ;;  %v6571_v48 = vcombine.high %v4776_v36, %v4784_v30 }
0x1095   : > { %v4318_v39 = vpop.xlane.xlu1 %4317 }
0x1096   : > { %7476 = vrcp.f32 %v4318_v39  ;;  %v7424_v39 = vld [vmem:[%s8706_s0 + $0x28] sm:$0xff]  }
0x10a3   : > { %v7477_v54 = vpop.eup %7476 }
0x10a4   : > { %v4320_v55 = vmul.f32 %v7477_v54, %v7475_v47  ;;  %v6586_v47 = vcombine.low %v4792_v26, %v4800_v17  ;;  %v4760_v54 = vld [vmem:[%s7697_s4 + $0x180] sm:$0xff]  ;;  %v4730_v26 = vld [vmem:[%s7697_s4 + $0x90] sm:$0xff] }
0x10a5   : > { %v4738_v17 = vld [vmem:[%s7697_s4 + $0xd0] sm:$0xff] }
0x10a6   : > { %v4321_v57 = vpack.c.bf16 %v4320_v55, %v4320_v55  ;;  %v4768_v55 = vld [vmem:[%s7697_s4 + $0x1c0] sm:$0xff] }
0x10a8   : > { %6837 = vmatmul.mubr.msk.bf16.vlgmr.msra.gmra.mxu0 %vm2138_vm2, %v4321_v57  ;;  %v6555_v57 = vcombine.high %v4760_v54, %v4768_v55 }
0x10a9   : > { %6841 = vmatpush3.bf16.msra.mxu0 %v7406_v56  ;;  %6856 = vmatprep.mubr.msk.bf16.mxu0 %vm7522_vm1, %v7521_v15  ;;  %v6570_v56 = vcombine.low %v4776_v36, %v4784_v30  ;;  %v6526_v36 = vcombine.low %v4730_v26, %v4738_v17 }
0x10aa   : > { %6842 = vmatprep.subr.bf16.mxu0 %v7521_v15 }
0x10ad   : > { %6843 = vmatpush3.bf16.msra.mxu0 %v7407_v60  ;;  %v7425_v60 = vld [vmem:[%s8706_s0 + $0x20] sm:$0xff]  }
0x10ae   : > { %6844 = vmatprep.subr.bf16.mxu0 %v7521_v15 }
0x10b1   : > { %6845 = vmatpush3.bf16.msra.mxu0 %v7408_v44  ;;  %v4744_v44 = vld [vmem:[%s7697_s4 + $0x100] sm:$0xff] }
0x10b2   : > { %6846 = vmatprep.subr.bf16.mxu0 %v7521_v15 }
0x10b5   : > { %6847 = vmatpush3.bf16.msra.mxu0 %v7409_v35  ;;  %v4752_v35 = vld [vmem:[%s7697_s4 + $0x140] sm:$0xff] }
0x10b6   : > { %6848 = vmatprep.subr.bf16.mxu0 %v7521_v15  ;;  %v6538_v53 = vcombine.low %v4744_v44, %v4752_v35 }
0x10b9   : > { %6849 = vmatpush3.bf16.msra.mxu0 %v7410_v37  ;;  %v6554_v37 = vcombine.low %v4760_v54, %v4768_v55  ;;  %v4812_v55 = vld [vmem:[%s7697_s4 + $0x320] sm:$0xff] }
0x10ba   : > { %6850 = vmatprep.subr.bf16.mxu0 %v7521_v15 }
0x10bd   : > { %6851 = vmatpush3.bf16.msra.mxu0 %v7411_v0  ;;  %v6539_v0 = vcombine.high %v4744_v44, %v4752_v35  ;;  %v4796_v44 = vld [vmem:[%s7697_s4 + $0x2a0] sm:$0xff] }
0x10be   : > { %6852 = vmatprep.subr.bf16.mxu0 %v7521_v15  ;;  %v4804_v35 = vld [vmem:[%s7697_s4 + $0x2e0] sm:$0xff] }
0x10c1   : > { %6853 = vmatpush3.bf16.msra.mxu0 %v7412_v52  ;;  %v7426_v52 = vld [vmem:[%s8706_s0 + $0x18] sm:$0xff]  }
0x10c2   : > { %6854 = vmatprep.subr.bf16.mxu0 %v7521_v15 }
0x10c5   : > { %6855 = vmatpush3.bf16.msra.mxu0 %v7413_v1  ;;  %v4728_v1 = vld [vmem:[%s7697_s4 + $0x80] sm:$0xff] }
0x10c6   : > { %6880 = vmatprep.subr.bf16.mxu0 %v7521_v15  ;;  %v6523_v2 = vcombine.high %v4728_v1, %v4736_v50 }
0x1168   : > { %v4360_v28 = vpop.f32.mrf.mxu0 }
0x1169   : > { %v4382_v61 = vpack.c.bf16 %v4360_v28, %v4360_v28  ;;  %v4720_v28 = vld [vmem:[%s7697_s4 + $0x40] sm:$0xff] }
0x116a   : > { %v6838_v63 = vpop.f32.mrf.mxu0  ;;  %v6506_v7 = vcombine.low %v4712_v4, %v4720_v28 }
0x116b   : > { %6857 = vmatmul.mubr.bf16.vlgmr.msra.gmra.mxu0 %v4382_v61  ;;  %v6522_v61 = vcombine.low %v4728_v1, %v4736_v50  ;;  %v6507_v63 = vcombine.high %v4712_v4, %v4720_v28  ;;  %v4780_v1 = vld [vmem:[%s7697_s4 + $0x220] sm:$0xff] }
0x116c   : > { %v4363_v5 = vpop.f32.mrf.mxu0  ;;  %6896 = vmatprep.mubr.msk.bf16.mxu0 %vm7522_vm1, %v7521_v15  ;;  %6881 = vmatpush3.bf16.msra.mxu0 %v7422_v40  ;;  %v4788_v50 = vld [vmem:[%s7697_s4 + $0x260] sm:$0xff] }
0x116d   : > { %6882 = vmatprep.subr.bf16.mxu0 %v7521_v15  ;;  %v7428_v5 = vld [vmem:[%s8706_s0 + $0x8] sm:$0xff]   ;;  %v6579_v28 = vcombine.high %v4780_v1, %v4788_v50 }
0x116e   : > { %v6839_v45 = vpop.f32.mrf.mxu0 }
0x116f   : > { %v4826_v45 = vld [vmem:[%s7697_s4 + $0x390] sm:$0xff] }
0x1170   : > { %6883 = vmatpush3.bf16.msra.mxu0 %v7423_v33  ;;  %v6623_v58 = vcombine.high %v4826_v45, %v4834_v6  ;;  %v6622_v11 = vcombine.low %v4826_v45, %v4834_v6  ;;  %v4722_v33 = vld [vmem:[%s7697_s4 + $0x50] sm:$0xff]  ;;  %v6578_v45 = vcombine.low %v4780_v1, %v4788_v50 }
0x1171   : > { %6884 = vmatprep.subr.bf16.mxu0 %v7521_v15 }
0x1174   : > { %6885 = vmatpush3.bf16.msra.mxu0 %v7424_v39 }
0x1175   : > { %6886 = vmatprep.subr.bf16.mxu0 %v7521_v15 }
0x1178   : > { %6887 = vmatpush3.bf16.msra.mxu0 %v7425_v60 }
0x1179   : > { %6888 = vmatprep.subr.bf16.mxu0 %v7521_v15 }
0x117c   : > { %6889 = vmatpush3.bf16.msra.mxu0 %v7426_v52  ;;  %v7429_v52 = vld [vmem:[%s8706_s0] sm:$0xff]  }
0x117d   : > { %6890 = vmatprep.subr.bf16.mxu0 %v7521_v15 }
0x1180   : > { %6891 = vmatpush3.bf16.msra.mxu0 %v7427_v3  ;;  %v6594_v3 = vcombine.low %v4796_v44, %v4804_v35 }
0x1181   : > { %6892 = vmatprep.subr.bf16.mxu0 %v7521_v15 }
0x1184   : > { %6893 = vmatpush3.bf16.msra.mxu0 %v7428_v5  ;;  %v4772_v5 = vld [vmem:[%s7697_s4 + $0x1e0] sm:$0xff] }
0x1185   : > { %6894 = vmatprep.subr.bf16.mxu0 %v7521_v15  ;;  %v4786_v15 = vld [vmem:[%s7697_s4 + $0x250] sm:$0xff] }
0x1188   : > { %6895 = vmatpush3.bf16.msra.mxu0 %v7429_v52 }
0x122b   : > { %v4472_v13 = vpop.f32.mrf.mxu0 }
0x122c   : > { %v4473_v49 = vadd.f32 %v6479_v38, %v4472_v13  ;;  %v4794_v38 = vld [vmem:[%s7697_s4 + $0x290] sm:$0xff] }
0x122d   : > { %v6858_v14 = vpop.f32.mrf.mxu0  ;;  %v4802_v13 = vld [vmem:[%s7697_s4 + $0x2d0] sm:$0xff] }
0x122e   : > { %v4478_v43 = vadd.f32 %v4473_v49, %v8296_v27  ;;  %v6602_v27 = vcombine.low %v4808_v18, %v4816_v19  ;;  %v6606_v49 = vcombine.low %v4810_v8, %v4818_v10  ;;  %v6591_v14 = vcombine.high %v4794_v38, %v4802_v13 }
0x122f   : > { %v4475_v22 = vpop.f32.mrf.mxu0 }
0x1230   : > { %v4495_v46 = vpack.c.bf16 %v4478_v43, %v4478_v43  ;;  %v4778_v43 = vld [vmem:[%s7697_s4 + $0x210] sm:$0xff]  ;;  %v6590_v22 = vcombine.low %v4794_v38, %v4802_v13 }
0x1231   : > { %v6859_v51 = vpop.f32.mrf.mxu0  ;;  %v6574_v18 = vcombine.low %v4778_v43, %v4786_v15 }
0x1232   : > { %v4506_v62 = vshll.u32 %v4495_v46, 16  ;;  %v4504_v21 = vshrl.u32 %v4495_v46, 16  ;;  %v6575_v46 = vcombine.high %v4778_v43, %v4786_v15  ;;  %v4762_v51 = vld [vmem:[%s7697_s4 + $0x190] sm:$0xff] }
0x1234   : > { %v4508_v23 = vrot.slane %v4506_v62, 1  ;;  %v4770_v62 = vld [vmem:[%s7697_s4 + $0x1d0] sm:$0xff] }
0x1235   : > { %v6559_v19 = vcombine.high %v4762_v51, %v4770_v62 }
0x1236   : > { %v4509_v24 = vor.u32 %v4508_v23, %v4504_v21  ;;  %v4746_v21 = vld [vmem:[%s7697_s4 + $0x110] sm:$0xff] }
0x1237   : > { %v4754_v23 = vld [vmem:[%s7697_s4 + $0x150] sm:$0xff] }
0x1238   : > { %6877 = vmatmul.mubr.bf16.vlgmr.msra.gmra.mxu1 %v4509_v24  ;;  %v6558_v24 = vcombine.low %v4762_v51, %v4770_v62  ;;  %v6542_v40 = vcombine.low %v4746_v21, %v4754_v23 }
0x1239   : > { %5565 = vmatpush1.bf16.msra.mxu1 %v6618_v12  ;;  %5596 = vmatprep.mubr.bf16.mxu1 %v7523_v41  ;;  %v6607_v12 = vcombine.high %v4810_v8, %v4818_v10 }
0x123a   : > { %5566 = vmatprep.subr.bf16.mxu1 %v6603_v25  ;;  %v6543_v25 = vcombine.high %v4746_v21, %v4754_v23 }
0x123d   : > { %5567 = vmatpush1.bf16.msra.mxu1 %v6602_v27  ;;  %v6527_v27 = vcombine.high %v4730_v26, %v4738_v17 }
0x123e   : > { %5568 = vmatprep.subr.bf16.mxu1 %v6587_v29  ;;  %v4714_v29 = vld [vmem:[%s7697_s4 + $0x10] sm:$0xff] }
0x123f   : > { %v6511_v30 = vcombine.high %v4714_v29, %v4722_v33  ;;  %v6510_v39 = vcombine.low %v4714_v29, %v4722_v33 }
0x1241   : > { %5569 = vmatpush1.bf16.msra.mxu1 %v6586_v47  ;;  %v4828_v47 = vld [vmem:[%s7697_s4 + $0x3a0] sm:$0xff] }
0x1242   : > { %5570 = vmatprep.subr.bf16.mxu1 %v6571_v48  ;;  %v4836_v48 = vld [vmem:[%s7697_s4 + $0x3e0] sm:$0xff] }
0x1243   : > { %v6627_v54 = vcombine.high %v4828_v47, %v4836_v48 }
0x1245   : > { %5571 = vmatpush1.bf16.msra.mxu1 %v6570_v56  ;;  %v4820_v56 = vld [vmem:[%s7697_s4 + $0x360] sm:$0xff] }
0x1246   : > { %5572 = vmatprep.subr.bf16.mxu1 %v6555_v57  ;;  %v6626_v57 = vcombine.low %v4828_v47, %v4836_v48  ;;  %v6611_v60 = vcombine.high %v4812_v55, %v4820_v56 }
0x1249   : > { %5573 = vmatpush1.bf16.msra.mxu1 %v6554_v37  ;;  %v6610_v37 = vcombine.low %v4812_v55, %v4820_v56 }
0x124a   : > { %5574 = vmatprep.subr.bf16.mxu1 %v6539_v0  ;;  %v6595_v0 = vcombine.high %v4796_v44, %v4804_v35 }
0x124d   : > { %5575 = vmatpush1.bf16.msra.mxu1 %v6538_v53  ;;  %v8460_v53 = vld [vmem:[%s7697_s4 + $0x388] sm:$0xff] }
0x124e   : > { %5576 = vmatprep.subr.bf16.mxu1 %v6523_v2  ;;  %v8463_v2 = vld [vmem:[%s7697_s4 + $0x3c8] sm:$0xff] }
0x124f   : > { %v6621_v4 = vcombine.high %v8460_v53, %v8463_v2 }
0x1251   : > { %5577 = vmatpush1.bf16.msra.mxu1 %v6522_v61  ;;  %v6620_v61 = vcombine.low %v8460_v53, %v8463_v2  ;;  %5607 = vmatprep.subr.bf16.mxu0 %v6621_v4 }
0x1252   : > { %5578 = vmatprep.subr.bf16.mxu1 %v6507_v63  ;;  %v4764_v63 = vld [vmem:[%s7697_s4 + $0x1a0] sm:$0xff] }
0x1253   : > { %v6563_v6 = vcombine.high %v4764_v63, %v4772_v5  ;;  %v6562_v8 = vcombine.low %v4764_v63, %v4772_v5  ;;  %v4809_v5 = vld [vmem:[%s7697_s4 + $0x308] sm:$0xff] }
0x1255   : > { %5579 = vmatpush1.bf16.msra.mxu1 %v6506_v7  ;;  %v4748_v7 = vld [vmem:[%s7697_s4 + $0x120] sm:$0xff] }
0x1256   : > { %5650 = vmatprep.subr.bf16.mxu1 %v6623_v58  ;;  %v4756_v58 = vld [vmem:[%s7697_s4 + $0x160] sm:$0xff] }
0x1257   : > { %v6547_v10 = vcombine.high %v4748_v7, %v4756_v58  ;;  %v6546_v38 = vcombine.low %v4748_v7, %v4756_v58 }
0x1258   : > { %5597 = vmatmul.mubr.bf16.vlgmr.msra.gmra.mxu1 %v8346_v59 }
0x1259   : > { %5651 = vmatpush1.bf16.msra.mxu1 %v6622_v11  ;;  %5682 = vmatprep.mubr.bf16.mxu1 %v7523_v41  ;;  %v4732_v11 = vld [vmem:[%s7697_s4 + $0xa0] sm:$0xff] }
0x125a   : > { %5652 = vmatprep.subr.bf16.mxu1 %v6607_v12  ;;  %v4740_v12 = vld [vmem:[%s7697_s4 + $0xe0] sm:$0xff] }
0x125b   : > { %v6531_v13 = vcombine.high %v4732_v11, %v4740_v12  ;;  %v6530_v43 = vcombine.low %v4732_v11, %v4740_v12  ;;  %v4793_v11 = vld [vmem:[%s7697_s4 + $0x288] sm:$0xff] }
0x125c   : > { %v4801_v12 = vld [vmem:[%s7697_s4 + $0x2c8] sm:$0xff] }
0x125d   : > { %5653 = vmatpush1.bf16.msra.mxu1 %v6606_v49  ;;  %v4716_v49 = vld [vmem:[%s7697_s4 + $0x20] sm:$0xff] }
0x125e   : > { %5654 = vmatprep.subr.bf16.mxu1 %v6591_v14  ;;  %v4724_v14 = vld [vmem:[%s7697_s4 + $0x60] sm:$0xff] }
0x125f   : > { %v6515_v15 = vcombine.high %v4716_v49, %v4724_v14  ;;  %v6514_v51 = vcombine.low %v4716_v49, %v4724_v14  ;;  %v4777_v49 = vld [vmem:[%s7697_s4 + $0x208] sm:$0xff] }
0x1260   : > { %v4785_v14 = vld [vmem:[%s7697_s4 + $0x248] sm:$0xff] }
0x1261   : > { %5655 = vmatpush1.bf16.msra.mxu1 %v6590_v22  ;;  %v4830_v22 = vld [vmem:[%s7697_s4 + $0x3b0] sm:$0xff]  ;;  %v6572_v53 = vcombine.low %v4777_v49, %v4785_v14 }
0x1262   : > { %5656 = vmatprep.subr.bf16.mxu1 %v6575_v46  ;;  %v4838_v46 = vld [vmem:[%s7697_s4 + $0x3f0] sm:$0xff] }
0x1263   : > { %v6631_v62 = vcombine.high %v4830_v22, %v4838_v46  ;;  %v6630_v21 = vcombine.low %v4830_v22, %v4838_v46  ;;  %v4761_v22 = vld [vmem:[%s7697_s4 + $0x188] sm:$0xff] }
0x1264   : > { %v4769_v46 = vld [vmem:[%s7697_s4 + $0x1c8] sm:$0xff] }
0x1265   : > { %5657 = vmatpush1.bf16.msra.mxu1 %v6574_v18  ;;  %v4814_v18 = vld [vmem:[%s7697_s4 + $0x330] sm:$0xff]  ;;  %v6557_v2 = vcombine.high %v4761_v22, %v4769_v46 }
0x1266   : > { %5658 = vmatprep.subr.bf16.mxu1 %v6559_v19  ;;  %v4822_v19 = vld [vmem:[%s7697_s4 + $0x370] sm:$0xff] }
0x1267   : > { %v6615_v23 = vcombine.high %v4814_v18, %v4822_v19  ;;  %v6614_v26 = vcombine.low %v4814_v18, %v4822_v19  ;;  %v4729_v19 = vld [vmem:[%s7697_s4 + $0x88] sm:$0xff] }
0x1269   : > { %5659 = vmatpush1.bf16.msra.mxu1 %v6558_v24  ;;  %v4798_v24 = vld [vmem:[%s7697_s4 + $0x2b0] sm:$0xff] }
0x126a   : > { %5660 = vmatprep.subr.bf16.mxu1 %v6543_v25  ;;  %v4806_v25 = vld [vmem:[%s7697_s4 + $0x2f0] sm:$0xff] }
0x126b   : > { %v6599_v17 = vcombine.high %v4798_v24, %v4806_v25  ;;  %v6598_v29 = vcombine.low %v4798_v24, %v4806_v25  ;;  %v4713_v25 = vld [vmem:[%s7697_s4 + $0x8] sm:$0xff] }
0x126d   : > { %5661 = vmatpush1.bf16.msra.mxu1 %v6542_v40  ;;  %v4782_v40 = vld [vmem:[%s7697_s4 + $0x230] sm:$0xff] }
0x126e   : > { %5662 = vmatprep.subr.bf16.mxu1 %v6527_v27  ;;  %v4790_v27 = vld [vmem:[%s7697_s4 + $0x270] sm:$0xff] }
0x126f   : > { %v6583_v33 = vcombine.high %v4782_v40, %v4790_v27  ;;  %v6582_v47 = vcombine.low %v4782_v40, %v4790_v27  ;;  %v8516_v27 = vld [vmem:[%s7702_s6] sm:$0xff] }
0x1271   : > { %5663 = vmatpush1.bf16.msra.mxu1 %v6526_v36  ;;  %v4766_v36 = vld [vmem:[%s7697_s4 + $0x1b0] sm:$0xff] }
0x1272   : > { %5664 = vmatprep.subr.bf16.mxu1 %v6511_v30  ;;  %v4774_v30 = vld [vmem:[%s7697_s4 + $0x1f0] sm:$0xff] }
0x1273   : > { %v6567_v48 = vcombine.high %v4766_v36, %v4774_v30  ;;  %v6566_v55 = vcombine.low %v4766_v36, %v4774_v30 }
0x1275   : > { %5665 = vmatpush1.bf16.msra.mxu1 %v6510_v39  ;;  %v4750_v39 = vld [vmem:[%s7697_s4 + $0x130] sm:$0xff] }
0x1276   : > { %5736 = vmatprep.subr.bf16.mxu1 %v6627_v54  ;;  %v4758_v54 = vld [vmem:[%s7697_s4 + $0x170] sm:$0xff] }
0x1277   : > { %v6551_v56 = vcombine.high %v4750_v39, %v4758_v54  ;;  %v6550_v44 = vcombine.low %v4750_v39, %v4758_v54  ;;  %v4811_v54 = vld [vmem:[%s7697_s4 + $0x318] sm:$0xff] }
0x1278   : > { %5683 = vmatmul.mubr.bf16.vlgmr.msra.gmra.mxu1 %v8346_v59 }
0x1279   : > { %5737 = vmatpush1.bf16.msra.mxu1 %v6626_v57  ;;  %5768 = vmatprep.mubr.bf16.mxu1 %v7523_v41  ;;  %v4734_v57 = vld [vmem:[%s7697_s4 + $0xb0] sm:$0xff] }
0x127a   : > { %5738 = vmatprep.subr.bf16.mxu1 %v6611_v60  ;;  %v4742_v60 = vld [vmem:[%s7697_s4 + $0xf0] sm:$0xff] }
0x127b   : > { %v6535_v35 = vcombine.high %v4734_v57, %v4742_v60  ;;  %v6534_v52 = vcombine.low %v4734_v57, %v4742_v60 }
0x127d   : > { %5739 = vmatpush1.bf16.msra.mxu1 %v6610_v37  ;;  %v4718_v37 = vld [vmem:[%s7697_s4 + $0x30] sm:$0xff] }
0x127e   : > { %5740 = vmatprep.subr.bf16.mxu1 %v6595_v0  ;;  %v4726_v0 = vld [vmem:[%s7697_s4 + $0x70] sm:$0xff] }
0x127f   : > { %v6519_v1 = vcombine.high %v4718_v37, %v4726_v0  ;;  %v6518_v50 = vcombine.low %v4718_v37, %v4726_v0  ;;  %v4795_v37 = vld [vmem:[%s7697_s4 + $0x298] sm:$0xff] }
0x1280   : > { %v4803_v0 = vld [vmem:[%s7697_s4 + $0x2d8] sm:$0xff] }
0x1281   : > { %5741 = vmatpush1.bf16.msra.mxu1 %v6594_v3  ;;  %v6488_v3 = vld [vmem:[%s8707_s26] ss:$0 sm:$0xff] }
0x1282   : > { %5742 = vmatprep.subr.bf16.mxu1 %v6579_v28 }
0x1285   : > { %5743 = vmatpush1.bf16.msra.mxu1 %v6578_v45  ;;  %v4817_v45 = vld [vmem:[%s7697_s4 + $0x348] sm:$0xff] }
0x1286   : > { %5744 = vmatprep.subr.bf16.mxu1 %v6563_v6 }
0x1289   : > { %5745 = vmatpush1.bf16.msra.mxu1 %v6562_v8  ;;  %v6605_v8 = vcombine.high %v4809_v5, %v4817_v45 }
0x128a   : > { %5746 = vmatprep.subr.bf16.mxu1 %v6547_v10 }
0x128d   : > { %5747 = vmatpush1.bf16.msra.mxu1 %v6546_v38  ;;  %v6604_v38 = vcombine.low %v4809_v5, %v4817_v45  ;;  %v4763_v5 = vld [vmem:[%s7697_s4 + $0x198] sm:$0xff] }
0x128e   : > { %5748 = vmatprep.subr.bf16.mxu1 %v6531_v13  ;;  %v6589_v13 = vcombine.high %v4793_v11, %v4801_v12  ;;  %v4771_v45 = vld [vmem:[%s7697_s4 + $0x1d8] sm:$0xff] }
0x1291   : > { %5749 = vmatpush1.bf16.msra.mxu1 %v6530_v43  ;;  %v6588_v43 = vcombine.low %v4793_v11, %v4801_v12  ;;  %v4731_v12 = vld [vmem:[%s7697_s4 + $0x98] sm:$0xff] }
0x1292   : > { %5750 = vmatprep.subr.bf16.mxu1 %v6515_v15  ;;  %v6573_v15 = vcombine.high %v4777_v49, %v4785_v14  ;;  %v4715_v14 = vld [vmem:[%s7697_s4 + $0x18] sm:$0xff] }
0x1295   : > { %5751 = vmatpush1.bf16.msra.mxu1 %v6514_v51  ;;  %v4753_v51 = vld [vmem:[%s7697_s4 + $0x148] sm:$0xff] }
0x1296   : > { %5822 = vmatprep.subr.bf16.mxu1 %v6631_v62  ;;  %v6556_v62 = vcombine.low %v4761_v22, %v4769_v46  ;;  %v4829_v46 = vld [vmem:[%s7697_s4 + $0x3a8] sm:$0xff] }
0x1298   : > { %5769 = vmatmul.mubr.bf16.vlgmr.msra.gmra.mxu1 %v8346_v59 }
0x1299   : > { %5823 = vmatpush1.bf16.msra.mxu1 %v6630_v21  ;;  %5854 = vmatprep.mubr.bf16.mxu1 %v7523_v41  ;;  %v4737_v21 = vld [vmem:[%s7697_s4 + $0xc8] sm:$0xff] }
0x129a   : > { %5824 = vmatprep.subr.bf16.mxu1 %v6615_v23  ;;  %v6525_v24 = vcombine.high %v4729_v19, %v4737_v21 }
0x129d   : > { %5825 = vmatpush1.bf16.msra.mxu1 %v6614_v26  ;;  %v4721_v26 = vld [vmem:[%s7697_s4 + $0x48] sm:$0xff] }
0x129e   : > { %5826 = vmatprep.subr.bf16.mxu1 %v6599_v17  ;;  %v6524_v17 = vcombine.low %v4729_v19, %v4737_v21  ;;  %v6509_v40 = vcombine.high %v4713_v25, %v4721_v26  ;;  %v6508_v30 = vcombine.low %v4713_v25, %v4721_v26  ;;  %v4797_v21 = vld [vmem:[%s7697_s4 + $0x2a8] sm:$0xff] }
0x129f   : > { %v4781_v26 = vld [vmem:[%s7697_s4 + $0x228] sm:$0xff] }
0x12a1   : > { %5827 = vmatpush1.bf16.msra.mxu1 %v6598_v29  ;;  %v4827_v29 = vld [vmem:[%s7697_s4 + $0x398] sm:$0xff] }
0x12a2   : > { %5828 = vmatprep.subr.bf16.mxu1 %v6583_v33  ;;  %v4835_v33 = vld [vmem:[%s7697_s4 + $0x3d8] sm:$0xff] }
0x12a3   : > { %v6624_v57 = vcombine.low %v4827_v29, %v4835_v33 }
0x12a5   : > { %5829 = vmatpush1.bf16.msra.mxu1 %v6582_v47  ;;  %v4847_v47 = vrot.slane %v8516_v27, %v7754_v32 }
0x12a6   : > { %5830 = vmatprep.subr.bf16.mxu1 %v6567_v48  ;;  %v6625_v48 = vcombine.high %v4827_v29, %v4835_v33  ;;  %v4765_v33 = vld [vmem:[%s7697_s4 + $0x1a8] sm:$0xff] }
0x12a9   : > { %5831 = vmatpush1.bf16.msra.mxu1 %v6566_v55  ;;  %v4819_v55 = vld [vmem:[%s7697_s4 + $0x358] sm:$0xff] }
0x12aa   : > { %5832 = vmatprep.subr.bf16.mxu1 %v6551_v56 }
0x12ad   : > { %5833 = vmatpush1.bf16.msra.mxu1 %v6550_v44 }
0x12ae   : > { %5834 = vmatprep.subr.bf16.mxu1 %v6535_v35  ;;  %v6609_v35 = vcombine.high %v4811_v54, %v4819_v55 }
0x12b1   : > { %5835 = vmatpush1.bf16.msra.mxu1 %v6534_v52 }
0x12b2   : > { %5836 = vmatprep.subr.bf16.mxu1 %v6519_v1  ;;  %v6608_v1 = vcombine.low %v4811_v54, %v4819_v55  ;;  %v4757_v54 = vld [vmem:[%s7697_s4 + $0x168] sm:$0xff] }
0x12b5   : > { %5837 = vmatpush1.bf16.msra.mxu1 %v6518_v50  ;;  %v6593_v50 = vcombine.high %v4795_v37, %v4803_v0 }
0x12b8   : > { %5855 = vmatmul.mubr.bf16.vlgmr.msra.gmra.mxu1 %v8346_v59 }
0x12f8   : > { %v4593_v4 = vpop.f32.mrf.mxu1 }
0x12f9   : > { %v4594_v28 = vadd.f32 %v6488_v3, %v4593_v4  ;;  %v4779_v3 = vld [vmem:[%s7697_s4 + $0x218] sm:$0xff] }
0x12fa   : > { %v6878_v63 = vpop.f32.mrf.mxu1  ;;  %v4787_v4 = vld [vmem:[%s7697_s4 + $0x258] sm:$0xff] }
0x12fb   : > { %v4599_v6 = vmax.f32 %v4594_v28, 0.0  ;;  %v6592_v28 = vcombine.low %v4795_v37, %v4803_v0  ;;  %v6577_v63 = vcombine.high %v4779_v3, %v4787_v4 }
0x12fc   : > { %v4596_v7 = vpop.f32.mrf.mxu1 }
0x12fd   : > { %v4616_v58 = vpack.c.bf16 %v4599_v6, %v4599_v6  ;;  %v6576_v6 = vcombine.low %v4779_v3, %v4787_v4  ;;  %v6561_v7 = vcombine.high %v4763_v5, %v4771_v45 }
0x12fe   : > { %v6879_v10 = vpop.f32.mrf.mxu1 }
0x12ff   : > { %6897 = vmatmul.mubr.bf16.vlgmr.msra.gmra.mxu0 %v4616_v58  ;;  %v4747_v58 = vld [vmem:[%s7697_s4 + $0x118] sm:$0xff]  ;;  %v6560_v10 = vcombine.low %v4763_v5, %v4771_v45 }
0x1300   : > { %5608 = vmatpush1.bf16.msra.mxu0 %v6620_v61  ;;  %5639 = vmatprep.mubr.bf16.mxu0 %v7523_v41  ;;  %v4745_v61 = vld [vmem:[%s7697_s4 + $0x108] sm:$0xff] }
0x1301   : > { %5609 = vmatprep.subr.bf16.mxu0 %v6605_v8  ;;  %v6541_v18 = vcombine.high %v4745_v61, %v4753_v51  ;;  %v6540_v23 = vcombine.low %v4745_v61, %v4753_v51  ;;  %v4755_v8 = vld [vmem:[%s7697_s4 + $0x158] sm:$0xff]  ;;  %v4813_v51 = vld [vmem:[%s7697_s4 + $0x328] sm:$0xff] }
0x1302   : > { %v6545_v11 = vcombine.high %v4747_v58, %v4755_v8 }
0x1304   : > { %5610 = vmatpush1.bf16.msra.mxu0 %v6604_v38  ;;  %v4739_v38 = vld [vmem:[%s7697_s4 + $0xd8] sm:$0xff] }
0x1305   : > { %5611 = vmatprep.subr.bf16.mxu0 %v6589_v13  ;;  %v6544_v13 = vcombine.low %v4747_v58, %v4755_v8  ;;  %v6529_v49 = vcombine.high %v4731_v12, %v4739_v38 }
0x1308   : > { %5612 = vmatpush1.bf16.msra.mxu0 %v6588_v43  ;;  %v4723_v43 = vld [vmem:[%s7697_s4 + $0x58] sm:$0xff] }
0x1309   : > { %5613 = vmatprep.subr.bf16.mxu0 %v6573_v15  ;;  %v6528_v15 = vcombine.low %v4731_v12, %v4739_v38  ;;  %v6513_v22 = vcombine.high %v4715_v14, %v4723_v43 }
0x130c   : > { %5614 = vmatpush1.bf16.msra.mxu0 %v6572_v53  ;;  %v4837_v53 = vld [vmem:[%s7697_s4 + $0x3e8] sm:$0xff] }
0x130d   : > { %5615 = vmatprep.subr.bf16.mxu0 %v6557_v2  ;;  %v6512_v2 = vcombine.low %v4715_v14, %v4723_v43  ;;  %v6629_v61 = vcombine.high %v4829_v46, %v4837_v53 }
0x1310   : > { %5616 = vmatpush1.bf16.msra.mxu0 %v6556_v62  ;;  %v4821_v62 = vld [vmem:[%s7697_s4 + $0x368] sm:$0xff] }
0x1311   : > { %5617 = vmatprep.subr.bf16.mxu0 %v6541_v18  ;;  %v6628_v18 = vcombine.low %v4829_v46, %v4837_v53  ;;  %v6613_v19 = vcombine.high %v4813_v51, %v4821_v62 }
0x1314   : > { %5618 = vmatpush1.bf16.msra.mxu0 %v6540_v23  ;;  %v4805_v23 = vld [vmem:[%s7697_s4 + $0x2e8] sm:$0xff] }
0x1315   : > { %5619 = vmatprep.subr.bf16.mxu0 %v6525_v24  ;;  %v6612_v24 = vcombine.low %v4813_v51, %v4821_v62  ;;  %v6597_v25 = vcombine.high %v4797_v21, %v4805_v23  ;;  %v4735_v62 = vld [vmem:[%s7697_s4 + $0xb8] sm:$0xff] }
0x1318   : > { %v5598_v36 = vpop.f32.mrf.mxu1  ;;  %5620 = vmatpush1.bf16.msra.mxu0 %v6524_v17  ;;  %v4789_v17 = vld [vmem:[%s7697_s4 + $0x268] sm:$0xff] }
0x1319   : > { %5621 = vmatprep.subr.bf16.mxu0 %v6509_v40  ;;  %v8526_v60 = vadd.f32 %v5598_v36, %v4847_v47  ;;  %v6596_v40 = vcombine.low %v4797_v21, %v4805_v23  ;;  %v6581_v29 = vcombine.high %v4781_v26, %v4789_v17  ;;  %v4773_v36 = vld [vmem:[%s7697_s4 + $0x1e8] sm:$0xff]  ;;  %v4719_v23 = vld [vmem:[%s7697_s4 + $0x38] sm:$0xff] }
0x131a   : > { %v8522_v39 = vpop.f32.mrf.mxu1  ;;  %v6564_v55 = vcombine.low %v4765_v33, %v4773_v36 }
0x131c   : > { %v5602_v56 = vpop.f32.mrf.mxu1  ;;  %5622 = vmatpush1.bf16.msra.mxu0 %v6508_v30  ;;  %v6580_v30 = vcombine.low %v4781_v26, %v4789_v17 }
0x131d   : > { %v8528_v44 = vadd.f32 %v5602_v56, %v4847_v47  ;;  %5693 = vmatprep.subr.bf16.mxu0 %v6625_v48  ;;  %v6565_v47 = vcombine.high %v4765_v33, %v4773_v36  ;;  %v4749_v48 = vld [vmem:[%s7697_s4 + $0x128] sm:$0xff] }
0x131e   : > { %v6549_v56 = vcombine.high %v4749_v48, %v4757_v54  ;;  %v6548_v37 = vcombine.low %v4749_v48, %v4757_v54 }
0x131f   : > { %v5988_v52 = vpack.c.bf16 %v8528_v44, %v8526_v60  ;;  %5640 = vmatmul.mubr.bf16.vlgmr.msra.gmra.mxu0 %v8346_v59 }
0x1320   : > { %5694 = vmatpush1.bf16.msra.mxu0 %v6624_v57  ;;  %5725 = vmatprep.mubr.bf16.mxu0 %v7523_v41  ;;  %v4733_v57 = vld [vmem:[%s7697_s4 + $0xa8] sm:$0xff] }
0x1321   : > { %5695 = vmatprep.subr.bf16.mxu0 %v6609_v35  ;;  %v4741_v35 = vld [vmem:[%s7697_s4 + $0xe8] sm:$0xff] }
0x1322   : > { %v6533_v0 = vcombine.high %v4733_v57, %v4741_v35  ;;  %v6532_v3 = vcombine.low %v4733_v57, %v4741_v35 }
0x1324   : > { %5696 = vmatpush1.bf16.msra.mxu0 %v6608_v1  ;;  %v4717_v1 = vld [vmem:[%s7697_s4 + $0x28] sm:$0xff] }
0x1325   : > { %5697 = vmatprep.subr.bf16.mxu0 %v6593_v50  ;;  %v4725_v50 = vld [vmem:[%s7697_s4 + $0x68] sm:$0xff] }
0x1326   : > { %v6517_v4 = vcombine.high %v4717_v1, %v4725_v50  ;;  %v6516_v5 = vcombine.low %v4717_v1, %v4725_v50 }
0x1328   : > { %5698 = vmatpush1.bf16.msra.mxu0 %v6592_v28  ;;  %v4831_v28 = vld [vmem:[%s7697_s4 + $0x3b8] sm:$0xff] }
0x1329   : > { %5699 = vmatprep.subr.bf16.mxu0 %v6577_v63  ;;  %v4839_v63 = vld [vmem:[%s7697_s4 + $0x3f8] sm:$0xff] }
0x132a   : > { %v6633_v45 = vcombine.high %v4831_v28, %v4839_v63  ;;  %v6632_v58 = vcombine.low %v4831_v28, %v4839_v63 }
0x132c   : > { %5700 = vmatpush1.bf16.msra.mxu0 %v6576_v6  ;;  %v4815_v6 = vld [vmem:[%s7697_s4 + $0x338] sm:$0xff] }
0x132d   : > { %5701 = vmatprep.subr.bf16.mxu0 %v6561_v7  ;;  %v4823_v7 = vld [vmem:[%s7697_s4 + $0x378] sm:$0xff] }
0x132e   : > { %v6617_v8 = vcombine.high %v4815_v6, %v4823_v7  ;;  %v6616_v12 = vcombine.low %v4815_v6, %v4823_v7 }
0x1330   : > { %5702 = vmatpush1.bf16.msra.mxu0 %v6560_v10  ;;  %v4799_v10 = vld [vmem:[%s7697_s4 + $0x2b8] sm:$0xff] }
0x1331   : > { %5703 = vmatprep.subr.bf16.mxu0 %v6545_v11  ;;  %v4807_v11 = vld [vmem:[%s7697_s4 + $0x2f8] sm:$0xff] }
0x1332   : > { %v6601_v38 = vcombine.high %v4799_v10, %v4807_v11  ;;  %v6600_v14 = vcombine.low %v4799_v10, %v4807_v11 }
0x1334   : > { %5704 = vmatpush1.bf16.msra.mxu0 %v6544_v13  ;;  %v4783_v13 = vld [vmem:[%s7697_s4 + $0x238] sm:$0xff] }
0x1335   : > { %5705 = vmatprep.subr.bf16.mxu0 %v6529_v49  ;;  %v4791_v49 = vld [vmem:[%s7697_s4 + $0x278] sm:$0xff] }
0x1336   : > { %v6585_v43 = vcombine.high %v4783_v13, %v4791_v49  ;;  %v6584_v46 = vcombine.low %v4783_v13, %v4791_v49 }
0x1338   : > { %5706 = vmatpush1.bf16.msra.mxu0 %v6528_v15  ;;  %v4767_v15 = vld [vmem:[%s7697_s4 + $0x1b8] sm:$0xff] }
0x1339   : > { %5707 = vmatprep.subr.bf16.mxu0 %v6513_v22  ;;  %v4775_v22 = vld [vmem:[%s7697_s4 + $0x1f8] sm:$0xff] }
0x133a   : > { %v6569_v53 = vcombine.high %v4767_v15, %v4775_v22 }
0x133c   : > { %5708 = vmatpush1.bf16.msra.mxu0 %v6512_v2  ;;  %v4759_v2 = vld [vmem:[%s7697_s4 + $0x178] sm:$0xff] }
0x133d   : > { %5779 = vmatprep.subr.bf16.mxu0 %v6629_v61  ;;  %v6568_v61 = vcombine.low %v4767_v15, %v4775_v22  ;;  %v8615_v15 = vld [vmem:[%s7702_s6 + $0x8] sm:$0xff] }
0x133f   : > { %5726 = vmatmul.mubr.bf16.vlgmr.msra.gmra.mxu0 %v8346_v59 }
0x1340   : > { %5780 = vmatpush1.bf16.msra.mxu0 %v6628_v18  ;;  %5811 = vmatprep.mubr.bf16.mxu0 %v7523_v41  ;;  %v4743_v18 = vld [vmem:[%s7697_s4 + $0xf8] sm:$0xff] }
0x1341   : > { %5781 = vmatprep.subr.bf16.mxu0 %v6613_v19  ;;  %v6537_v21 = vcombine.high %v4735_v62, %v4743_v18 }
0x1344   : > { %5782 = vmatpush1.bf16.msra.mxu0 %v6612_v24  ;;  %v4727_v24 = vld [vmem:[%s7697_s4 + $0x78] sm:$0xff] }
0x1345   : > { %5783 = vmatprep.subr.bf16.mxu0 %v6597_v25  ;;  %v6536_v25 = vcombine.low %v4735_v62, %v4743_v18  ;;  %v6521_v26 = vcombine.high %v4719_v23, %v4727_v24  ;;  %v6520_v17 = vcombine.low %v4719_v23, %v4727_v24 }
0x1348   : > { %5784 = vmatpush1.bf16.msra.mxu0 %v6596_v40  ;;  %v6497_v40 = vld [vmem:[%s7692_s27] ss:$0 sm:$0xff] }
0x1349   : > { %5785 = vmatprep.subr.bf16.mxu0 %v6581_v29 }
0x134c   : > { %5786 = vmatpush1.bf16.msra.mxu0 %v6580_v30 }
0x134d   : > { %5787 = vmatprep.subr.bf16.mxu0 %v6565_v47 }
0x1350   : > { %5788 = vmatpush1.bf16.msra.mxu0 %v6564_v55  ;;  %v4855_v55 = vrot.slane %v8516_v27, %v7913_v16 }
0x1351   : > { %5789 = vmatprep.subr.bf16.mxu0 %v6549_v56 }
0x1354   : > { %5790 = vmatpush1.bf16.msra.mxu0 %v6548_v37 }
0x1355   : > { %5791 = vmatprep.subr.bf16.mxu0 %v6533_v0  ;;  %v8597_v0 = vpop.f32.mrf.mxu1 }
0x1357   : > { %v8601_v50 = vpop.f32.mrf.mxu1 }
0x1358   : > { %5792 = vmatpush1.bf16.msra.mxu0 %v6532_v3 }
0x1359   : > { %5793 = vmatprep.subr.bf16.mxu0 %v6517_v4  ;;  %v5686_v4 = vpop.f32.mrf.mxu1 }
0x135b   : > { %v5688_v63 = vpop.f32.mrf.mxu1 }
0x135c   : > { %5794 = vmatpush1.bf16.msra.mxu0 %v6516_v5 }
0x135d   : > { %5865 = vmatprep.subr.bf16.mxu0 %v6633_v45  ;;  %v5690_v45 = vpop.f32.mrf.mxu1 }
0x135f   : > { %5812 = vmatmul.mubr.bf16.vlgmr.msra.gmra.mxu0 %v8346_v59  ;;  %v8603_v7 = vpop.f32.mrf.mxu1 }
0x1360   : > { %5866 = vmatpush1.bf16.msra.mxu0 %v6632_v58  ;;  %5897 = vmatprep.mubr.bf16.mxu0 %v7523_v41  ;;  %v4751_v41 = vld [vmem:[%s7697_s4 + $0x138] sm:$0xff] }
0x1361   : > { %5867 = vmatprep.subr.bf16.mxu0 %v6617_v8  ;;  %v6553_v51 = vcombine.high %v4751_v41, %v4759_v2  ;;  %v6552_v19 = vcombine.low %v4751_v41, %v4759_v2  ;;  %v8607_v8 = vpop.f32.mrf.mxu1 }
0x1363   : > { %v8609_v11 = vpop.f32.mrf.mxu1 }
0x1364   : > { %5868 = vmatpush1.bf16.msra.mxu0 %v6616_v12 }
0x1365   : > { %5869 = vmatprep.subr.bf16.mxu0 %v6601_v38  ;;  %v8611_v38 = vpop.f32.mrf.mxu1 }
0x1368   : > { %5870 = vmatpush1.bf16.msra.mxu0 %v6600_v14  ;;  %v4874_v14 = vsub.s32 7, %v7751_v31 }
0x1369   : > { %5871 = vmatprep.subr.bf16.mxu0 %v6585_v43 }
0x136a   : > { %v4875_v2 = vrot.slane %v8516_v27, %v4874_v14 }
0x136c   : > { %5872 = vmatpush1.bf16.msra.mxu0 %v6584_v46  ;;  %v4870_v46 = vsub.s32 6, %v7751_v31 }
0x136d   : > { %5873 = vmatprep.subr.bf16.mxu0 %v6569_v53  ;;  %v4907_v53 = vrot.slane %v8615_v15, %v4874_v14  ;;  %v4895_v14 = vrot.slane %v8615_v15, %v7936_v42 }
0x1370   : > { %5874 = vmatpush1.bf16.msra.mxu0 %v6568_v61 }
0x1371   : > { %5875 = vmatprep.subr.bf16.mxu0 %v6553_v51  ;;  %v4903_v51 = vrot.slane %v8615_v15, %v4870_v46 }
0x1374   : > { %5876 = vmatpush1.bf16.msra.mxu0 %v6552_v19 }
0x1375   : > { %5877 = vmatprep.subr.bf16.mxu0 %v6537_v21 }
0x1378   : > { %5878 = vmatpush1.bf16.msra.mxu0 %v6536_v25  ;;  %v5856_v49 = vpop.f32.mrf.mxu1 }
0x1379   : > { %5879 = vmatprep.subr.bf16.mxu0 %v6521_v26 }
0x137a   : > { %v5858_v41 = vpop.f32.mrf.mxu1 }
0x137c   : > { %5880 = vmatpush1.bf16.msra.mxu0 %v6520_v17  ;;  %v5860_v24 = vpop.f32.mrf.mxu1 }
0x137e   : > { %v5862_v31 = vpop.f32.mrf.mxu1 }
0x137f   : > { %5898 = vmatmul.mubr.bf16.vlgmr.msra.gmra.mxu0 %v8346_v59 }
0x13bf   : > { %v4706_v29 = vpop.f32.mrf.mxu0 }
0x13c0   : > { %v4707_v33 = vadd.f32 %v6497_v40, %v4706_v29 }
0x13c1   : > { %v6898_v36 = vpop.f32.mrf.mxu0 }
0x13c2   : > { %v8584_v30 = vpack.c.bf16 %v4707_v33, %v4707_v33  ;;  %v4871_v33 = vrot.slane %v8516_v27, %v4870_v46  ;;  %v4899_v36 = vrot.slane %v8615_v15, %v7952_v20 }
0x13c3   : > { %v4709_v47 = vpop.f32.mrf.mxu0 }
0x13c4   : > { %6742 = vmatprep.mubr.bf16.mxu1 %v8584_v30 }
0x13c5   : > { %v6899_v48 = vpop.f32.mrf.mxu0 }
0x13c6   : > { %v5863_v48 = vadd.f32 %v5862_v31, %v4899_v36 }
0x13df   : > { %v5641_v54 = vpop.f32.mrf.mxu0 }
0x13e0   : > { %v8591_v35 = vadd.f32 %v5641_v54, %v4855_v55 }
0x13e1   : > { %v8589_v56 = vpop.f32.mrf.mxu0 }
0x13e3   : > { %v5645_v57 = vpop.f32.mrf.mxu0 }
0x13e4   : > { %v8593_v59 = vadd.f32 %v5645_v57, %v4855_v55  ;;  %v5859_v55 = vadd.f32 %v5858_v41, %v4899_v36 }
0x13e5   : > { %v8599_v1 = vpop.f32.mrf.mxu0 }
0x13e6   : > { %v5990_v37 = vpack.c.bf16 %v8593_v59, %v8591_v35 }
0x13ff   : > { %v5727_v3 = vpop.f32.mrf.mxu0 }
0x1400   : > { %v5728_v54 = vadd.f32 %v5727_v3, %v4871_v33  ;;  %v4863_v3 = vrot.slane %v8516_v27, %v7936_v42 }
0x1401   : > { %v5729_v28 = vpop.f32.mrf.mxu0 }
0x1402   : > { %v5730_v25 = vadd.f32 %v5729_v28, %v4875_v2  ;;  %v4867_v28 = vrot.slane %v8516_v27, %v7952_v20  ;;  %v5689_v20 = vadd.f32 %v5688_v63, %v4863_v3 }
0x1403   : > { %v5731_v5 = vpop.f32.mrf.mxu0 }
0x1404   : > { %v5732_v47 = vadd.f32 %v5731_v5, %v4871_v33  ;;  %v5687_v46 = vadd.f32 %v5686_v4, %v4867_v28  ;;  %v4891_v5 = vrot.slane %v8615_v15, %v7946_v9  ;;  %v4859_v4 = vrot.slane %v8516_v27, %v7946_v9 }
0x1405   : > { %v5733_v6 = vpop.f32.mrf.mxu0 }
0x1406   : > { %v5734_v62 = vadd.f32 %v5733_v6, %v4875_v2  ;;  %v5994_v57 = vpack.c.bf16 %v5732_v47, %v5728_v54  ;;  %v6001_v6 = vpack.c.bf16 %v5863_v48, %v5859_v55  ;;  %v5648_v42 = vadd.f32 %v8599_v1, %v4859_v4 }
0x1407   : > { %v4851_v1 = vrot.slane %v8516_v27, %v7758_v34 }
0x1408   : > { %v5995_v40 = vpack.c.bf16 %v5734_v62, %v5730_v25 }
0x141f   : > { %v8605_v58 = vpop.f32.mrf.mxu0 }
0x1421   : > { %v5815_v10 = vpop.f32.mrf.mxu0 }
0x1422   : > { %v5816_v62 = vadd.f32 %v5815_v10, %v4891_v5  ;;  %v4883_v10 = vrot.slane %v8615_v15, %v7758_v34 }
0x1423   : > { %v5817_v12 = vpop.f32.mrf.mxu0 }
0x1424   : > { %v5777_v9 = vadd.f32 %v8611_v38, %v4883_v10 }
0x1425   : > { %v5819_v13 = vpop.f32.mrf.mxu0 }
0x1426   : > { %v5820_v41 = vadd.f32 %v5819_v13, %v4891_v5 }
0x143f   : > { %v5899_v43 = vpop.f32.mrf.mxu0 }
0x1440   : > { %v5900_v26 = vadd.f32 %v5899_v43, %v4903_v51  ;;  %v5691_v43 = vadd.f32 %v5690_v45, %v4867_v28  ;;  %v5999_v45 = vpack.c.bf16 %v5820_v41, %v5816_v62 }
0x1441   : > { %v5901_v22 = vpop.f32.mrf.mxu0 }
0x1442   : > { %v5902_v19 = vadd.f32 %v5901_v22, %v4907_v53  ;;  %v5861_v22 = vadd.f32 %v5860_v24, %v4895_v14  ;;  %v5993_v2 = vpack.c.bf16 %v5691_v43, %v5687_v46 }
0x1443   : > { %v5903_v61 = vpop.f32.mrf.mxu0 }
0x1444   : > { %v5904_v21 = vadd.f32 %v5903_v61, %v4903_v51  ;;  %v5685_v51 = vadd.f32 %v8601_v50, %v4863_v3 }
0x1445   : > { %v5905_v18 = vpop.f32.mrf.mxu0 }
0x1446   : > { %v5906_v23 = vadd.f32 %v5905_v18, %v4907_v53  ;;  %v6002_v29 = vpack.c.bf16 %v5904_v21, %v5900_v26  ;;  %v5857_v53 = vadd.f32 %v5856_v49, %v4895_v14  ;;  %v5992_v18 = vpack.c.bf16 %v5689_v20, %v5685_v51 }
0x1447   : > { %v4887_v49 = vrot.slane %v8615_v15, %v7913_v16  ;;  %v5644_v21 = vadd.f32 %v8589_v56, %v4859_v4  ;;  %v4879_v56 = vrot.slane %v8615_v15, %v7754_v32 }
0x1448   : > { %v6003_v17 = vpack.c.bf16 %v5906_v23, %v5902_v19  ;;  %v6000_v61 = vpack.c.bf16 %v5861_v22, %v5857_v53  ;;  %v5773_v23 = vadd.f32 %v8607_v8, %v4883_v10  ;;  %v5601_v8 = vadd.f32 %v8522_v39, %v4851_v1 }
0x1449   : > { %v5818_v19 = vadd.f32 %v5817_v12, %v4887_v49  ;;  %v5814_v63 = vadd.f32 %v8605_v58, %v4887_v49  ;;  %v5991_v13 = vpack.c.bf16 %v5648_v42, %v5644_v21  ;;  %v5605_v58 = vadd.f32 %v8597_v0, %v4851_v1 }
0x144a   : > { %6726 = vmatprep.subr.bf16.mxu1 %v6003_v17  ;;  %v5997_v16 = vpack.c.bf16 %v5777_v9, %v5773_v23  ;;  %v5775_v12 = vadd.f32 %v8609_v11, %v4879_v56  ;;  %v5771_v38 = vadd.f32 %v8603_v7, %v4879_v56 }
0x144b   : > { %6727 = vmatpush3.bf16.xpose.msra.mxu1 %v5995_v40  ;;  %v5998_v50 = vpack.c.bf16 %v5818_v19, %v5814_v63  ;;  %v5989_v24 = vpack.c.bf16 %v5605_v58, %v5601_v8 }
0x144c   : > { %6728 = vmatprep.subr.bf16.mxu1 %v6002_v29  ;;  %v5996_v25 = vpack.c.bf16 %v5775_v12, %v5771_v38 }
0x1453   : > { %6729 = vmatpush3.bf16.xpose.msra.mxu1 %v5994_v57 }
0x1454   : > { %6730 = vmatprep.subr.bf16.mxu1 %v6001_v6 }
0x145b   : > { %6731 = vmatpush3.bf16.xpose.msra.mxu1 %v5993_v2 }
0x145c   : > { %6732 = vmatprep.subr.bf16.mxu1 %v6000_v61 }
0x1463   : > { %6733 = vmatpush3.bf16.xpose.msra.mxu1 %v5992_v18 }
0x1464   : > { %6734 = vmatprep.subr.bf16.mxu1 %v5999_v45 }
0x146b   : > { %6735 = vmatpush3.bf16.xpose.msra.mxu1 %v5991_v13 }
0x146c   : > { %6736 = vmatprep.subr.bf16.mxu1 %v5998_v50 }
0x1473   : > { %6737 = vmatpush3.bf16.xpose.msra.mxu1 %v5990_v37 }
0x1474   : > { %6738 = vmatprep.subr.bf16.mxu1 %v5997_v16 }
0x147b   : > { %6739 = vmatpush3.bf16.xpose.msra.mxu1 %v5989_v24 }
0x147c   : > { %6740 = vmatprep.subr.bf16.mxu1 %v5996_v25 }
0x1483   : > { %6741 = vmatpush3.bf16.xpose.msra.mxu1 %v5988_v52 }
0x148a   : > { %6743 = vmatmul.mubr.bf16.vlgmr.msra.gmra.mxu1 %v8584_v30 }
0x154a   : > { %v6038_v32 = vpop.f32.mrf.mxu1 }
0x154c   : > { %v6040_v34 = vpop.f32.mrf.mxu1 }
0x154d   : > { %v6047_v27 = vcombine.low %v6038_v32, %v6040_v34 }
0x154e   : > { %v6042_v35 = vpop.f32.mrf.mxu1 }
0x154f   : > { %6049 = vst [vmem:[%s1070_s2] sm:$0x77] %v6047_v27 }
0x1550   : > { %v6043_v39 = vpop.f32.mrf.mxu1 }
0x1551 PF: > { %s81_s22 = sadd.s32 1, %s7484_s22  }
0x1552   : > { %p78_p4 = scmp.ge.s32.totalorder %s81_s22, 4  }
0x1554   :  { %80 = sbr.rel (!%p78_p4) target bundleno = 59 (0x3b), region = 240 }

</bundles_post_ra>
